<compile_context>
chip_gen: v5e
topology: v5e:2x2
jax: 0.10.0
libtpu: 0.0.40
codegen_flags: <defaults>
</compile_context>

<pallas_src>
import functools

import jax
import jax.numpy as jnp
from jax.experimental import pallas as pl
from jax.experimental.pallas import tpu as pltpu


def _round_up(x, m):
    return ((x + m - 1) // m) * m


def _vmem_limit_bytes():
    """~60% of physical VMEM (v5e/v6e: 128 MiB, v7x: 64 MiB); 64 MiB assumed
    if the hardware query is unavailable.  Clamped to [32, 96] MiB."""
    try:
        cap = int(pltpu.get_tpu_info().vmem_capacity_bytes)
    except Exception:  # noqa: BLE001 - conservative fallback on any failure
        cap = 64 * 1024 * 1024
    return max(min(int(cap * 0.6), 96 * 1024 * 1024), 32 * 1024 * 1024)


def _pick_pixel_tile(hw, lp, vmem_budget):
    # VMEM per pixel inside the encoder kernel:
    #   - (T, 3) f32 input block in native (8,128)-tiled VMEM: 64 B/px, double
    #     buffered by the BlockSpec pipeline,
    #   - (T, Lp) f32 conv/bias/ReLU intermediate: 4*Lp B/px.
    per_px = 2 * 64 + 4 * lp
    t_max = max(8, vmem_budget // per_px)
    if hw % 8 != 0 or hw <= t_max:
        # Whole image per step (grid effectively collapses to (B,)).  Also the
        # fallback for H*W not divisible by 8 (single, possibly large tile).
        return hw
    t = (min(t_max, hw) // 8) * 8
    while hw % t:
        t -= 8
    return t


def _pick_n_tile(n_pad, max_tile=2048):
    # Largest multiple-of-128 divisor of the padded fc5 output dim <= max_tile.
    t = min(n_pad, max_tile)
    while n_pad % t:
        t -= 128
    return t


# --------------------------------------------------------------------------
# Kernel 1: encoder = (Normalize folded into weights) 1x1-conv + ReLU + GAP.
# NHWC input, tiled over pixels; GAP accumulated in a lane-padded f32 scratch
# and the (1, 1, Lp) output block written exactly once per batch element.
# --------------------------------------------------------------------------
def _encoder_kernel(img_ref, w_ref, b_ref, feat_ref, acc_ref, *, inv_hw):
    # img_ref : (1, T, 3)   raw NHWC pixels, spatial flattened
    # w_ref   : (3, Lp)     1x1-conv weight with 1/std folded in (f32)
    # b_ref   : (1, Lp)     bias with -mean*w/std folded in (f32)
    # feat_ref: (1, 1, Lp)  output block (written once, at the last tile)
    # acc_ref : (1, 1, Lp)  f32 VMEM accumulator scratch
    t = pl.program_id(1)

    @pl.when(t == 0)
    def _():
        acc_ref[...] = jnp.zeros_like(acc_ref)

    x = img_ref[0].astype(jnp.float32)                      # (T, 3)
    # 1x1 conv on the MXU (K=3): output (T, Lp) is lane-dense in Lp.
    y = jnp.dot(x, w_ref[...], preferred_element_type=jnp.float32)
    y = jnp.maximum(y + b_ref[...], 0.0)                    # per-pixel bias+ReLU
    acc_ref[...] += jnp.sum(y, axis=0)[None, None, :]       # partial spatial sum

    @pl.when(t == pl.num_programs(1) - 1)
    def _():
        feat_ref[...] = acc_ref[...] * inv_hw               # global average pool


def _pallas_encoder(img_flat, w, b, vmem_limit):
    B, HW, C = img_flat.shape
    Lp = w.shape[1]
    T = _pick_pixel_tile(HW, Lp, vmem_limit // 2)
    n_t = HW // T

    feat = pl.pallas_call(
        functools.partial(_encoder_kernel, inv_hw=1.0 / HW),
        grid=(B, n_t),
        in_specs=[
            pl.BlockSpec((1, T, C), lambda b_, t_: (b_, t_, 0)),
            pl.BlockSpec((C, Lp), lambda b_, t_: (0, 0)),
            pl.BlockSpec((1, Lp), lambda b_, t_: (0, 0)),
        ],
        out_specs=pl.BlockSpec((1, 1, Lp), lambda b_, t_: (b_, 0, 0)),
        out_shape=jax.ShapeDtypeStruct((B, 1, Lp), jnp.float32),
        scratch_shapes=[pltpu.VMEM((1, 1, Lp), jnp.float32)],
        compiler_params=pltpu.CompilerParams(
            dimension_semantics=("parallel", "arbitrary"),
            vmem_limit_bytes=vmem_limit,
        ),
    )(img_flat, w, b)
    return feat.reshape(B, Lp)


# --------------------------------------------------------------------------
# Kernel 2: fused PointDecoder.  fc0..fc4 weights resident in VMEM; fc5's
# weight streamed in (1024, TN) column tiles over a "parallel" grid.
# --------------------------------------------------------------------------
def _point_decoder_kernel(x_ref,
                          w0_ref, b0_ref, w1_ref, b1_ref, w2_ref, b2_ref,
                          w3_ref, b3_ref, w4_ref, b4_ref,
                          w5_ref, b5_ref, o_ref):
    ws = (w0_ref, w1_ref, w2_ref, w3_ref, w4_ref)
    bs = (b0_ref, b1_ref, b2_ref, b3_ref, b4_ref)
    # fc0..fc4 recomputed per fc5 N-tile (negligible at small Bp) so the grid
    # axis is truly independent -> megacore-shardable.
    h = x_ref[...]                                           # (Bp, L0p) f32
    for i in range(5):
        h = jnp.dot(h.astype(jnp.bfloat16), ws[i][...],
                    preferred_element_type=jnp.float32) + bs[i][...]
        h = jnp.maximum(h, 0.0)
    y = jnp.dot(h.astype(jnp.bfloat16), w5_ref[...],
                preferred_element_type=jnp.float32) + b5_ref[...]
    o_ref[...] = jnp.tanh(y).astype(o_ref.dtype)


def _pallas_point_decoder(feat_p, params, vmem_limit):
    Bp, L0p = feat_p.shape
    K5, Npad = params["fc5_w"].shape
    TN = _pick_n_tile(Npad)
    const2 = lambda n: (0, 0)                                # noqa: E731

    in_specs = [pl.BlockSpec((Bp, L0p), const2)]
    args = [feat_p]
    for i in range(5):
        w, b_ = params[f"fc{i}_w"], params[f"fc{i}_b"]
        in_specs += [pl.BlockSpec(w.shape, const2), pl.BlockSpec(b_.shape, const2)]
        args += [w, b_]
    in_specs += [pl.BlockSpec((K5, TN), lambda n: (0, n)),
                 pl.BlockSpec((1, TN), lambda n: (0, n))]
    args += [params["fc5_w"], params["fc5_b"]]

    return pl.pallas_call(
        _point_decoder_kernel,
        grid=(Npad // TN,),
        in_specs=in_specs,
        out_specs=pl.BlockSpec((Bp, TN), lambda n: (0, n)),
        out_shape=jax.ShapeDtypeStruct((Bp, Npad), jnp.float32),
        compiler_params=pltpu.CompilerParams(
            dimension_semantics=("parallel",),
            vmem_limit_bytes=vmem_limit,
        ),
    )(*args)


# --------------------------------------------------------------------------
# Parameter init (deterministic, PyTorch nn.Linear-style uniform)
# --------------------------------------------------------------------------
def init_params(key, latent_size, n_points):
    def linear_init(k, in_dim, out_dim):
        kw, kb = jax.random.split(k)
        bound = 1.0 / (in_dim ** 0.5)
        w = jax.random.uniform(kw, (out_dim, in_dim), jnp.float32, -bound, bound)
        b = jax.random.uniform(kb, (out_dim,), jnp.float32, -bound, bound)
        return w, b  # torch layout: (out, in), (out,)

    keys = jax.random.split(key, 7)
    params = {}
    Lp = _round_up(latent_size, 128)

    # Synthetic encoder projection (stands in for the pretrained backbone),
    # with transforms.Normalize folded into weight/bias; zero-padded to 128
    # lanes (pad columns are exactly zero features downstream).
    mean = jnp.array([0.485, 0.456, 0.406], jnp.float32)
    std = jnp.array([0.229, 0.224, 0.225], jnp.float32)
    w_conv, b_conv = linear_init(keys[0], 3, latent_size)       # (L, 3), (L,)
    w_fold = w_conv / std[None, :]                              # (L, 3)
    b_fold = b_conv - jnp.sum(w_fold * mean[None, :], axis=1)   # (L,)
    enc_w = jnp.zeros((3, Lp), jnp.float32).at[:, :latent_size].set(w_fold.T)
    enc_b = jnp.zeros((1, Lp), jnp.float32).at[0, :latent_size].set(b_fold)
    params["enc_w"], params["enc_b"] = enc_w, enc_b

    # PointDecoder fc0..fc5, stored (in, out) == torch W.T, zero-padded to
    # lane-aligned feature dims, bf16 weights (f32 accumulation), f32 biases.
    dims = [latent_size, 100, 128, 256, 512, 1024, n_points * 3]
    pdims = [Lp, 128, 128, 256, 512, 1024, _round_up(n_points * 3, 128)]
    for i in range(6):
        w, b = linear_init(keys[i + 1], dims[i], dims[i + 1])
        wt = jnp.zeros((pdims[i], pdims[i + 1]), jnp.float32)
        wt = wt.at[:dims[i], :dims[i + 1]].set(w.T)
        bt = jnp.zeros((1, pdims[i + 1]), jnp.float32)
        bt = bt.at[0, :dims[i + 1]].set(b)
        params[f"fc{i}_w"] = wt.astype(jnp.bfloat16)
        params[f"fc{i}_b"] = bt
    return params


# --------------------------------------------------------------------------
# Forward (SingleViewto3D.forward, cfg.dtype == 'point')
# --------------------------------------------------------------------------
def single_view_to_3d_forward(images, params, cfg):
    # images: (B, H, W, 3) float32 NHWC, same convention as the torch forward.
    B, H, W, C = images.shape
    vmem_limit = _vmem_limit_bytes()

    # Free metadata reshape only -- no transpose / extra HBM pass.
    img = images.reshape(B, H * W, C)

    # encoder(normalize(images)) -> (B, Lp) padded features (pad cols are 0).
    feat = _pallas_encoder(img, params["enc_w"], params["enc_b"], vmem_limit)

    if cfg["dtype"] != "point":
        # TODO(synk): voxel branch (ConvTranspose3d/BatchNorm3d decoder) not implemented.
        raise NotImplementedError("only cfg.dtype == 'point' is implemented")

    # PointDecoder: pad batch to a multiple of 16 rows (bf16 sublane packing).
    n_out = cfg["n_points"] * 3
    Bp = _round_up(max(B, 16), 16)
    feat_p = jnp.pad(feat, ((0, Bp - B), (0, 0)))
    out = _pallas_point_decoder(feat_p, params, vmem_limit)     # (Bp, Npad)
    return out[:B, :n_out].reshape(B, cfg["n_points"], 3)


# --------------------------------------------------------------------------
# Pure-JAX f32 reference (same folded/padded params) for a sanity check.
# --------------------------------------------------------------------------
def _reference_forward(images, params, cfg):
    B, H, W, C = images.shape
    x = images.reshape(B, H * W, C).astype(jnp.float32)
    y = jnp.maximum(x @ params["enc_w"] + params["enc_b"][0], 0.0)
    h = jnp.mean(y, axis=1)                                     # (B, Lp)
    for i in range(5):
        h = jnp.maximum(h @ params[f"fc{i}_w"].astype(jnp.float32)
                        + params[f"fc{i}_b"][0], 0.0)
    out = jnp.tanh(h @ params["fc5_w"].astype(jnp.float32) + params["fc5_b"][0])
    n_out = cfg["n_points"] * 3
    return out[:, :n_out].reshape(B, cfg["n_points"], 3)


# --------------------------------------------------------------------------
if __name__ == "__main__":
    cfg = {"dtype": "point", "latent_size": 32, "n_points": 8, "arch": "resnet18"}

    root = jax.random.PRNGKey(0)
    k_img, k_par = jax.random.split(root)
    images = jax.random.uniform(k_img, (2, 16, 16, 3), dtype=jnp.float32)
    params = init_params(k_par, cfg["latent_size"], cfg["n_points"])

    fwd = jax.jit(lambda imgs: single_view_to_3d_forward(imgs, params, cfg))
    out = jax.block_until_ready(fwd(images))

    ref = _reference_forward(images, params, cfg)

    assert out.shape == (2, cfg["n_points"], 3), out.shape
    assert out.dtype == jnp.float32
    assert bool(jnp.all(jnp.isfinite(out)))
    assert bool(jnp.all(jnp.abs(out) <= 1.0 + 1e-6))            # tanh range
    # bf16 decoder weights/activations -> ~1e-2 level differences vs f32 ref.
    max_err = float(jnp.max(jnp.abs(out - ref)))
    assert max_err < 1e-1, f"mismatch vs f32 reference: {max_err}"
    print("KERNEL_OK")
</pallas_src>

<mosaic_0001>
module attributes {stable_mosaic.version = 11 : i64} {
  func.func @_point_decoder_kernel(%arg0: i32, %arg1: memref<16x128xf32, #tpu.memory_space<vmem>>, %arg2: memref<128x128xbf16, #tpu.memory_space<vmem>>, %arg3: memref<1x128xf32, #tpu.memory_space<vmem>>, %arg4: memref<128x128xbf16, #tpu.memory_space<vmem>>, %arg5: memref<1x128xf32, #tpu.memory_space<vmem>>, %arg6: memref<128x256xbf16, #tpu.memory_space<vmem>>, %arg7: memref<1x256xf32, #tpu.memory_space<vmem>>, %arg8: memref<256x512xbf16, #tpu.memory_space<vmem>>, %arg9: memref<1x512xf32, #tpu.memory_space<vmem>>, %arg10: memref<512x1024xbf16, #tpu.memory_space<vmem>>, %arg11: memref<1x1024xf32, #tpu.memory_space<vmem>>, %arg12: memref<1024x128xbf16, #tpu.memory_space<vmem>>, %arg13: memref<1x128xf32, #tpu.memory_space<vmem>>, %arg14: memref<16x128xf32, #tpu.memory_space<vmem>>) attributes {dimension_semantics = [#tpu.dimension_semantics<parallel>], iteration_bounds = array<i64: 1>, scalar_prefetch = 0 : i64, scratch_operands = 0 : i64, tpu.core_type = #tpu.core_type<tc>, window_params = [{pipeline_mode = #tpu.pipeline_mode<synchronous>, transform_indices = @transform_0, window_bounds = array<i64: 16, 128>}, {pipeline_mode = #tpu.pipeline_mode<synchronous>, transform_indices = @transform_1, window_bounds = array<i64: 128, 128>}, {pipeline_mode = #tpu.pipeline_mode<synchronous>, transform_indices = @transform_2, window_bounds = array<i64: 1, 128>}, {pipeline_mode = #tpu.pipeline_mode<synchronous>, transform_indices = @transform_3, window_bounds = array<i64: 128, 128>}, {pipeline_mode = #tpu.pipeline_mode<synchronous>, transform_indices = @transform_4, window_bounds = array<i64: 1, 128>}, {pipeline_mode = #tpu.pipeline_mode<synchronous>, transform_indices = @transform_5, window_bounds = array<i64: 128, 256>}, {pipeline_mode = #tpu.pipeline_mode<synchronous>, transform_indices = @transform_6, window_bounds = array<i64: 1, 256>}, {pipeline_mode = #tpu.pipeline_mode<synchronous>, transform_indices = @transform_7, window_bounds = array<i64: 256, 512>}, {pipeline_mode = #tpu.pipeline_mode<synchronous>, transform_indices = @transform_8, window_bounds = array<i64: 1, 512>}, {pipeline_mode = #tpu.pipeline_mode<synchronous>, transform_indices = @transform_9, window_bounds = array<i64: 512, 1024>}, {pipeline_mode = #tpu.pipeline_mode<synchronous>, transform_indices = @transform_10, window_bounds = array<i64: 1, 1024>}, {transform_indices = @transform_11, window_bounds = array<i64: 1024, 128>}, {transform_indices = @transform_12, window_bounds = array<i64: 1, 128>}, {transform_indices = @transform_13, window_bounds = array<i64: 16, 128>}]} {
    %c0 = arith.constant 0 : index
    %c0_0 = arith.constant 0 : index
    %0 = vector.load %arg1[%c0, %c0_0] : memref<16x128xf32, #tpu.memory_space<vmem>>, vector<16x128xf32>
    %1 = arith.truncf %0 : vector<16x128xf32> to vector<16x128xbf16>
    %c0_1 = arith.constant 0 : index
    %c0_2 = arith.constant 0 : index
    %2 = vector.load %arg2[%c0_1, %c0_2] : memref<128x128xbf16, #tpu.memory_space<vmem>>, vector<128x128xbf16>
    %cst = arith.constant dense<0.000000e+00> : vector<16x128xf32>
    %3 = tpu.matmul %1, %2, %cst {dimension_numbers = #tpu.dot_dimension_numbers<[1], [0], [0], [1], [0, 0, 1, 1], [], []>} : vector<16x128xbf16>, vector<128x128xbf16>, vector<16x128xf32> -> vector<16x128xf32>
    %c0_3 = arith.constant 0 : index
    %c0_4 = arith.constant 0 : index
    %4 = vector.load %arg3[%c0_3, %c0_4] : memref<1x128xf32, #tpu.memory_space<vmem>>, vector<1x128xf32>
    %5 = vector.broadcast %4 : vector<1x128xf32> to vector<16x128xf32>
    %6 = arith.addf %3, %5 : vector<16x128xf32>
    %cst_5 = arith.constant 0.000000e+00 : f32
    %7 = vector.broadcast %cst_5 : f32 to vector<16x128xf32>
    %8 = arith.maximumf %6, %7 : vector<16x128xf32>
    %9 = arith.truncf %8 : vector<16x128xf32> to vector<16x128xbf16>
    %c0_6 = arith.constant 0 : index
    %c0_7 = arith.constant 0 : index
    %10 = vector.load %arg4[%c0_6, %c0_7] : memref<128x128xbf16, #tpu.memory_space<vmem>>, vector<128x128xbf16>
    %cst_8 = arith.constant dense<0.000000e+00> : vector<16x128xf32>
    %11 = tpu.matmul %9, %10, %cst_8 {dimension_numbers = #tpu.dot_dimension_numbers<[1], [0], [0], [1], [0, 0, 1, 1], [], []>} : vector<16x128xbf16>, vector<128x128xbf16>, vector<16x128xf32> -> vector<16x128xf32>
    %c0_9 = arith.constant 0 : index
    %c0_10 = arith.constant 0 : index
    %12 = vector.load %arg5[%c0_9, %c0_10] : memref<1x128xf32, #tpu.memory_space<vmem>>, vector<1x128xf32>
    %13 = vector.broadcast %12 : vector<1x128xf32> to vector<16x128xf32>
    %14 = arith.addf %11, %13 : vector<16x128xf32>
    %cst_11 = arith.constant 0.000000e+00 : f32
    %15 = vector.broadcast %cst_11 : f32 to vector<16x128xf32>
    %16 = arith.maximumf %14, %15 : vector<16x128xf32>
    %17 = arith.truncf %16 : vector<16x128xf32> to vector<16x128xbf16>
    %c0_12 = arith.constant 0 : index
    %c0_13 = arith.constant 0 : index
    %18 = vector.load %arg6[%c0_12, %c0_13] : memref<128x256xbf16, #tpu.memory_space<vmem>>, vector<128x256xbf16>
    %cst_14 = arith.constant dense<0.000000e+00> : vector<16x256xf32>
    %19 = tpu.matmul %17, %18, %cst_14 {dimension_numbers = #tpu.dot_dimension_numbers<[1], [0], [0], [1], [0, 0, 1, 1], [], []>} : vector<16x128xbf16>, vector<128x256xbf16>, vector<16x256xf32> -> vector<16x256xf32>
    %c0_15 = arith.constant 0 : index
    %c0_16 = arith.constant 0 : index
    %20 = vector.load %arg7[%c0_15, %c0_16] : memref<1x256xf32, #tpu.memory_space<vmem>>, vector<1x256xf32>
    %21 = vector.broadcast %20 : vector<1x256xf32> to vector<16x256xf32>
    %22 = arith.addf %19, %21 : vector<16x256xf32>
    %cst_17 = arith.constant 0.000000e+00 : f32
    %23 = vector.broadcast %cst_17 : f32 to vector<16x256xf32>
    %24 = arith.maximumf %22, %23 : vector<16x256xf32>
    %25 = arith.truncf %24 : vector<16x256xf32> to vector<16x256xbf16>
    %c0_18 = arith.constant 0 : index
    %c0_19 = arith.constant 0 : index
    %26 = vector.load %arg8[%c0_18, %c0_19] : memref<256x512xbf16, #tpu.memory_space<vmem>>, vector<256x512xbf16>
    %cst_20 = arith.constant dense<0.000000e+00> : vector<16x512xf32>
    %27 = tpu.matmul %25, %26, %cst_20 {dimension_numbers = #tpu.dot_dimension_numbers<[1], [0], [0], [1], [0, 0, 1, 1], [], []>} : vector<16x256xbf16>, vector<256x512xbf16>, vector<16x512xf32> -> vector<16x512xf32>
    %c0_21 = arith.constant 0 : index
    %c0_22 = arith.constant 0 : index
    %28 = vector.load %arg9[%c0_21, %c0_22] : memref<1x512xf32, #tpu.memory_space<vmem>>, vector<1x512xf32>
    %29 = vector.broadcast %28 : vector<1x512xf32> to vector<16x512xf32>
    %30 = arith.addf %27, %29 : vector<16x512xf32>
    %cst_23 = arith.constant 0.000000e+00 : f32
    %31 = vector.broadcast %cst_23 : f32 to vector<16x512xf32>
    %32 = arith.maximumf %30, %31 : vector<16x512xf32>
    %33 = arith.truncf %32 : vector<16x512xf32> to vector<16x512xbf16>
    %c0_24 = arith.constant 0 : index
    %c0_25 = arith.constant 0 : index
    %34 = vector.load %arg10[%c0_24, %c0_25] : memref<512x1024xbf16, #tpu.memory_space<vmem>>, vector<512x1024xbf16>
    %cst_26 = arith.constant dense<0.000000e+00> : vector<16x1024xf32>
    %35 = tpu.matmul %33, %34, %cst_26 {dimension_numbers = #tpu.dot_dimension_numbers<[1], [0], [0], [1], [0, 0, 1, 1], [], []>} : vector<16x512xbf16>, vector<512x1024xbf16>, vector<16x1024xf32> -> vector<16x1024xf32>
    %c0_27 = arith.constant 0 : index
    %c0_28 = arith.constant 0 : index
    %36 = vector.load %arg11[%c0_27, %c0_28] : memref<1x1024xf32, #tpu.memory_space<vmem>>, vector<1x1024xf32>
    %37 = vector.broadcast %36 : vector<1x1024xf32> to vector<16x1024xf32>
    %38 = arith.addf %35, %37 : vector<16x1024xf32>
    %cst_29 = arith.constant 0.000000e+00 : f32
    %39 = vector.broadcast %cst_29 : f32 to vector<16x1024xf32>
    %40 = arith.maximumf %38, %39 : vector<16x1024xf32>
    %41 = arith.truncf %40 : vector<16x1024xf32> to vector<16x1024xbf16>
    %c0_30 = arith.constant 0 : index
    %c0_31 = arith.constant 0 : index
    %42 = vector.load %arg12[%c0_30, %c0_31] : memref<1024x128xbf16, #tpu.memory_space<vmem>>, vector<1024x128xbf16>
    %cst_32 = arith.constant dense<0.000000e+00> : vector<16x128xf32>
    %43 = tpu.matmul %41, %42, %cst_32 {dimension_numbers = #tpu.dot_dimension_numbers<[1], [0], [0], [1], [0, 0, 1, 1], [], []>} : vector<16x1024xbf16>, vector<1024x128xbf16>, vector<16x128xf32> -> vector<16x128xf32>
    %c0_33 = arith.constant 0 : index
    %c0_34 = arith.constant 0 : index
    %44 = vector.load %arg13[%c0_33, %c0_34] : memref<1x128xf32, #tpu.memory_space<vmem>>, vector<1x128xf32>
    %45 = vector.broadcast %44 : vector<1x128xf32> to vector<16x128xf32>
    %46 = arith.addf %43, %45 : vector<16x128xf32>
    %47 = math.tanh %46 : vector<16x128xf32>
    %c0_35 = arith.constant 0 : index
    %c0_36 = arith.constant 0 : index
    %48 = vector.load %arg14[%c0_35, %c0_36] : memref<16x128xf32, #tpu.memory_space<vmem>>, vector<16x128xf32>
    tpu.vector_store %arg14[%c0_35, %c0_36], %47 {strides = array<i32>} : memref<16x128xf32, #tpu.memory_space<vmem>>, vector<16x128xf32>,
    return
  }
  func.func @transform_0(%arg0: i32) -> (i32, i32) {
    %c0_i32 = arith.constant 0 : i32
    %c0_i32_0 = arith.constant 0 : i32
    %c0_i32_1 = arith.constant 0 : i32
    return %c0_i32, %c0_i32_0 : i32, i32
  }
  func.func @transform_1(%arg0: i32) -> (i32, i32) {
    %c0_i32 = arith.constant 0 : i32
    %c0_i32_0 = arith.constant 0 : i32
    %c0_i32_1 = arith.constant 0 : i32
    return %c0_i32, %c0_i32_0 : i32, i32
  }
  func.func @transform_2(%arg0: i32) -> (i32, i32) {
    %c0_i32 = arith.constant 0 : i32
    %c0_i32_0 = arith.constant 0 : i32
    %c0_i32_1 = arith.constant 0 : i32
    return %c0_i32, %c0_i32_0 : i32, i32
  }
  func.func @transform_3(%arg0: i32) -> (i32, i32) {
    %c0_i32 = arith.constant 0 : i32
    %c0_i32_0 = arith.constant 0 : i32
    %c0_i32_1 = arith.constant 0 : i32
    return %c0_i32, %c0_i32_0 : i32, i32
  }
  func.func @transform_4(%arg0: i32) -> (i32, i32) {
    %c0_i32 = arith.constant 0 : i32
    %c0_i32_0 = arith.constant 0 : i32
    %c0_i32_1 = arith.constant 0 : i32
    return %c0_i32, %c0_i32_0 : i32, i32
  }
  func.func @transform_5(%arg0: i32) -> (i32, i32) {
    %c0_i32 = arith.constant 0 : i32
    %c0_i32_0 = arith.constant 0 : i32
    %c0_i32_1 = arith.constant 0 : i32
    return %c0_i32, %c0_i32_0 : i32, i32
  }
  func.func @transform_6(%arg0: i32) -> (i32, i32) {
    %c0_i32 = arith.constant 0 : i32
    %c0_i32_0 = arith.constant 0 : i32
    %c0_i32_1 = arith.constant 0 : i32
    return %c0_i32, %c0_i32_0 : i32, i32
  }
  func.func @transform_7(%arg0: i32) -> (i32, i32) {
    %c0_i32 = arith.constant 0 : i32
    %c0_i32_0 = arith.constant 0 : i32
    %c0_i32_1 = arith.constant 0 : i32
    return %c0_i32, %c0_i32_0 : i32, i32
  }
  func.func @transform_8(%arg0: i32) -> (i32, i32) {
    %c0_i32 = arith.constant 0 : i32
    %c0_i32_0 = arith.constant 0 : i32
    %c0_i32_1 = arith.constant 0 : i32
    return %c0_i32, %c0_i32_0 : i32, i32
  }
  func.func @transform_9(%arg0: i32) -> (i32, i32) {
    %c0_i32 = arith.constant 0 : i32
    %c0_i32_0 = arith.constant 0 : i32
    %c0_i32_1 = arith.constant 0 : i32
    return %c0_i32, %c0_i32_0 : i32, i32
  }
  func.func @transform_10(%arg0: i32) -> (i32, i32) {
    %c0_i32 = arith.constant 0 : i32
    %c0_i32_0 = arith.constant 0 : i32
    %c0_i32_1 = arith.constant 0 : i32
    return %c0_i32, %c0_i32_0 : i32, i32
  }
  func.func @transform_11(%arg0: i32) -> (i32, i32) {
    %c0_i32 = arith.constant 0 : i32
    %c0_i32_0 = arith.constant 0 : i32
    return %c0_i32, %arg0 : i32, i32
  }
  func.func @transform_12(%arg0: i32) -> (i32, i32) {
    %c0_i32 = arith.constant 0 : i32
    %c0_i32_0 = arith.constant 0 : i32
    return %c0_i32, %arg0 : i32, i32
  }
  func.func @transform_13(%arg0: i32) -> (i32, i32) {
    %c0_i32 = arith.constant 0 : i32
    %c0_i32_0 = arith.constant 0 : i32
    return %c0_i32, %arg0 : i32, i32
  }
}

module attributes {stable_mosaic.version = 11 : i64} {
  func.func @_encoder_kernel(%arg0: i32, %arg1: i32, %arg2: memref<1x256x3xf32, #tpu.memory_space<vmem>>, %arg3: memref<3x128xf32, #tpu.memory_space<vmem>>, %arg4: memref<1x128xf32, #tpu.memory_space<vmem>>, %arg5: memref<1x1x128xf32, #tpu.memory_space<vmem>>, %arg6: memref<1x1x128xf32, #tpu.memory_space<vmem>>) attributes {dimension_semantics = [#tpu.dimension_semantics<parallel>, #tpu.dimension_semantics<arbitrary>], iteration_bounds = array<i64: 2, 1>, scalar_prefetch = 0 : i64, scratch_operands = 1 : i64, tpu.core_type = #tpu.core_type<tc>, window_params = [{transform_indices = @transform_0, window_bounds = array<i64: 1, 256, 3>}, {pipeline_mode = #tpu.pipeline_mode<synchronous>, transform_indices = @transform_1, window_bounds = array<i64: 3, 128>}, {pipeline_mode = #tpu.pipeline_mode<synchronous>, transform_indices = @transform_2, window_bounds = array<i64: 1, 128>}, {transform_indices = @transform_3, window_bounds = array<i64: 1, 1, 128>}]} {
    %c0_i32 = arith.constant 0 : i32
    %0 = arith.cmpi eq, %arg1, %c0_i32 : i32
    %1 = arith.extui %0 : i1 to i32
    %c0_i32_0 = arith.constant 0 : i32
    %2 = arith.cmpi ne, %1, %c0_i32_0 : i32
    scf.if %2 {
      %cst_17 = arith.constant 0.000000e+00 : f32
      %20 = vector.broadcast %cst_17 : f32 to vector<1x1x128xf32>
      %c0_18 = arith.constant 0 : index
      %c0_19 = arith.constant 0 : index
      %c0_20 = arith.constant 0 : index
      %21 = vector.load %arg6[%c0_18, %c0_19, %c0_20] : memref<1x1x128xf32, #tpu.memory_space<vmem>>, vector<1x1x128xf32>
      tpu.vector_store %arg6[%c0_18, %c0_19, %c0_20], %20 {strides = array<i32>} : memref<1x1x128xf32, #tpu.memory_space<vmem>>, vector<1x1x128xf32>,
    } else {
    }
    %c0 = arith.constant 0 : index
    %c0_1 = arith.constant 0 : index
    %c0_2 = arith.constant 0 : index
    %3 = vector.load %arg2[%c0, %c0_1, %c0_2] : memref<1x256x3xf32, #tpu.memory_space<vmem>>, vector<1x256x3xf32>
    %4 = vector.shape_cast %3 : vector<1x256x3xf32> to vector<256x3xf32>
    %c0_3 = arith.constant 0 : index
    %c0_4 = arith.constant 0 : index
    %5 = vector.load %arg3[%c0_3, %c0_4] : memref<3x128xf32, #tpu.memory_space<vmem>>, vector<3x128xf32>
    %cst = arith.constant dense<0.000000e+00> : vector<256x128xf32>
    %6 = tpu.matmul %4, %5, %cst {dimension_numbers = #tpu.dot_dimension_numbers<[1], [0], [0], [1], [0, 0, 1, 1], [], []>} : vector<256x3xf32>, vector<3x128xf32>, vector<256x128xf32> -> vector<256x128xf32>
    %c0_5 = arith.constant 0 : index
    %c0_6 = arith.constant 0 : index
    %7 = vector.load %arg4[%c0_5, %c0_6] : memref<1x128xf32, #tpu.memory_space<vmem>>, vector<1x128xf32>
    %8 = vector.broadcast %7 : vector<1x128xf32> to vector<256x128xf32>
    %9 = arith.addf %6, %8 : vector<256x128xf32>
    %cst_7 = arith.constant 0.000000e+00 : f32
    %10 = vector.broadcast %cst_7 : f32 to vector<256x128xf32>
    %11 = arith.maximumf %9, %10 : vector<256x128xf32>
    %c0_8 = arith.constant 0 : index
    %c0_9 = arith.constant 0 : index
    %c0_10 = arith.constant 0 : index
    %12 = vector.load %arg6[%c0_8, %c0_9, %c0_10] : memref<1x1x128xf32, #tpu.memory_space<vmem>>, vector<1x1x128xf32>
    %cst_11 = arith.constant dense<0.000000e+00> : vector<128xf32>
    %13 = vector.multi_reduction <add>, %11, %cst_11 [0] : vector<256x128xf32> to vector<128xf32>
    %14 = vector.shape_cast %13 : vector<128xf32> to vector<1x1x128xf32>
    %15 = arith.addf %12, %14 : vector<1x1x128xf32>
    %c0_12 = arith.constant 0 : index
    %c0_13 = arith.constant 0 : index
    %c0_14 = arith.constant 0 : index
    %16 = vector.load %arg6[%c0_12, %c0_13, %c0_14] : memref<1x1x128xf32, #tpu.memory_space<vmem>>, vector<1x1x128xf32>
    tpu.vector_store %arg6[%c0_12, %c0_13, %c0_14], %15 {strides = array<i32>} : memref<1x1x128xf32, #tpu.memory_space<vmem>>, vector<1x1x128xf32>,
    %c0_i32_15 = arith.constant 0 : i32
    %17 = arith.cmpi eq, %arg1, %c0_i32_15 : i32
    %18 = arith.extui %17 : i1 to i32
    %c0_i32_16 = arith.constant 0 : i32
    %19 = arith.cmpi ne, %18, %c0_i32_16 : i32
    scf.if %19 {
      %c0_17 = arith.constant 0 : index
      %c0_18 = arith.constant 0 : index
      %c0_19 = arith.constant 0 : index
      %20 = vector.load %arg6[%c0_17, %c0_18, %c0_19] : memref<1x1x128xf32, #tpu.memory_space<vmem>>, vector<1x1x128xf32>
      %cst_20 = arith.constant 3.906250e-03 : f32
      %21 = vector.broadcast %cst_20 : f32 to vector<1x1x128xf32>
      %22 = arith.mulf %20, %21 : vector<1x1x128xf32>
      %c0_21 = arith.constant 0 : index
      %c0_22 = arith.constant 0 : index
      %c0_23 = arith.constant 0 : index
      %23 = vector.load %arg5[%c0_21, %c0_22, %c0_23] : memref<1x1x128xf32, #tpu.memory_space<vmem>>, vector<1x1x128xf32>
      tpu.vector_store %arg5[%c0_21, %c0_22, %c0_23], %22 {strides = array<i32>} : memref<1x1x128xf32, #tpu.memory_space<vmem>>, vector<1x1x128xf32>,
    } else {
    }
    return
  }
  func.func @transform_0(%arg0: i32, %arg1: i32) -> (i32, i32, i32) {
    %c0_i32 = arith.constant 0 : i32
    %c0_i32_0 = arith.constant 0 : i32
    return %arg0, %arg1, %c0_i32 : i32, i32, i32
  }
  func.func @transform_1(%arg0: i32, %arg1: i32) -> (i32, i32) {
    %c0_i32 = arith.constant 0 : i32
    %c0_i32_0 = arith.constant 0 : i32
    %c0_i32_1 = arith.constant 0 : i32
    return %c0_i32, %c0_i32_0 : i32, i32
  }
  func.func @transform_2(%arg0: i32, %arg1: i32) -> (i32, i32) {
    %c0_i32 = arith.constant 0 : i32
    %c0_i32_0 = arith.constant 0 : i32
    %c0_i32_1 = arith.constant 0 : i32
    return %c0_i32, %c0_i32_0 : i32, i32
  }
  func.func @transform_3(%arg0: i32, %arg1: i32) -> (i32, i32, i32) {
    %c0_i32 = arith.constant 0 : i32
    %c0_i32_0 = arith.constant 0 : i32
    %c0_i32_1 = arith.constant 0 : i32
    return %arg0, %c0_i32, %c0_i32_0 : i32, i32, i32
  }
}

</mosaic_0001>

<bundles_post_ra>
// kernel: _lambda_.2
= control target key start
LH: loop header
LB: loop body
LE: loop exit
PB: predicated region body
PF: predicated region fallthrough
CT: control target
= control target key end

     0   :  { %8 = vsyncpa [#allocation4], 0  ;;  %s783_s12 = smov 0   ;;  %s785_s13 = smov 0   ;;  %s951_s0 = inlined_call_operand.vmem [shape: f32[2,256,3], index: 0, kind: input, shape index: {}]   ;;  %s952_s1 = inlined_call_operand.hbm [shape: f32[3,128], index: 1, kind: input, shape index: {}]   ;;  %s953_s2 = inlined_call_operand.vmem [shape: f32[1,128], index: 2, kind: input, shape index: {}]   ;;  %s954_s3 = inlined_call_operand.vmem [shape: f32[2,1,128], index: 3, kind: output, shape index: {}]  }
   0x1   :  { %s787_s14 = smov 0  }
   0x2 LB: > { %s618_s15 = sadd.s32 4294967295, %s759_s14   ;;  %s26_s16 = sadd.s32 1, %s755_s13  ;;  %s759_s14 = sphi %s787_s14, %s14_s14   ;;  %s755_s13 = sphi %s785_s13, %s956_s13   ;;  %s751_s12 = sphi %s783_s12, %s955_s12  }
   0x3   : > { %p28_p0 = scmp.ge.s32.totalorder %s26_s16, 2  ;;  %p620_p1 = scmp.ge.s32.totalorder %s759_s14, 1 }
   0x4   : > { %p127_p2 = scmp.lt.s32.totalorder %s759_s14, 3  ;;  %p674_p4 = scmp.eq.s32.totalorder %s618_s15, 0 }
   0x5   : > { %s958_s16 = smov (%p28_p0, %s26_s16), 0  ;;  %s139_s19 = sshll.u32 %s952_s1, 4  ;;  %s140_s19 = int_to_ptr.hbm [resolvable:$true] %s139_s19 }
   0x6   : > { %p128_p3 = pnand %p620_p1, %p127_p2  ;;  %s761_s20 = smov [#allocation3]  }
   0x7   : > { %s141_s21 = sshll.u32 %s761_s20, 4  ;;  %s142_s21 = int_to_ptr.vmem [resolvable:$true] %s141_s21 }
   0x8   : > { %p670_p5 = pneg %p128_p3  ;;  %170 = sbr.rel (%p128_p3) target bundleno = 281 (0x119), region = 32 }
   0xa   : > { %p671_p6 = pnand %p674_p4, %p670_p5 }
   0xc   : > { %673 = dma.hbm_to_vmem [thread:$0]  (!%p671_p6), %s140_s19, 64, %s142_s21, [#allocation4]  }
   0xd   : > { %746 = dma.done.wait (%p674_p4), [#allocation4], 64  }
   0xe   : > { %748 = vsyncadd (%p674_p4), [#allocation4], 4294967232  ;;  %p198_p7 = scmp.lt.s32.totalorder %s751_s12, 1  ;;  %vm349_vm0 = vcmask 1042432   ;;  %vm252_vm1 = vcmask 23552  }
   0xf   : > { %v247_v0 = vld [vmem:[#allocation3] sm:$0x7]  ;;  %v890_v48 = vld [vmem:[%s953_s2] ss:$0 sm:$0xff] }
  0x10   : > { %s960_s12 = smov (!%p198_p7, %s751_s12), 1  ;;  %627 = vmatpush.msk.msra.mxu0 %vm349_vm0, %v247_v0  ;;  %663 = vmatpush.msk.msra.mxu1 %vm349_vm0, %v247_v0 }
  0x11   : > { %s662_s22 = sshll.u32 %s960_s12, 8  ;;  %664 = vmatpush.msk.msra.mxu2 %vm349_vm0, %v247_v0  ;;  %665 = vmatpush.msk.msra.mxu3 %vm349_vm0, %v247_v0  ;;  %s209_s30 = scalar_lea.vmem %s954_s3, %s960_s12 }
  0x12   : > { %s811_s25 = scalar_lea.vmem %s951_s0, %s662_s22 }
  0x13   : > { %v215_v1 = vld [vmem:[%s811_s25] sm:$0xff]  ;;  %v216_v4 = vld [vmem:[%s811_s25 + $0x8] sm:$0xff]  ;;  %v217_v8 = vld [vmem:[%s811_s25 + $0x10] sm:$0xff] }
  0x14   : > { %v223_v2 = vld [vmem:[%s811_s25 + $0x40] sm:$0xff]  ;;  %628 = vmatmul.msk.f32.vlgmr.msra.gmra.mxu0 %vm252_vm1, %v215_v1  ;;  %v224_v5 = vld [vmem:[%s811_s25 + $0x48] sm:$0xff]  ;;  %v225_v9 = vld [vmem:[%s811_s25 + $0x50] sm:$0xff] }
  0x15   : > { %636 = vmatmul.msk.f32.vlgmr.msra.gmra.mxu1 %vm252_vm1, %v223_v2  ;;  %v231_v3 = vld [vmem:[%s811_s25 + $0x80] sm:$0xff]  ;;  %v232_v6 = vld [vmem:[%s811_s25 + $0x88] sm:$0xff]  ;;  %v233_v10 = vld [vmem:[%s811_s25 + $0x90] sm:$0xff] }
  0x16   : > { %644 = vmatmul.msk.f32.vlgmr.msra.gmra.mxu2 %vm252_vm1, %v231_v3  ;;  %v239_v7 = vld [vmem:[%s811_s25 + $0xc0] sm:$0xff]  ;;  %v240_v11 = vld [vmem:[%s811_s25 + $0xc8] sm:$0xff]  ;;  %v218_v12 = vld [vmem:[%s811_s25 + $0x18] sm:$0xff] }
  0x17   : > { %652 = vmatmul.msk.f32.vlgmr.msra.gmra.mxu3 %vm252_vm1, %v239_v7  ;;  %v226_v13 = vld [vmem:[%s811_s25 + $0x58] sm:$0xff]  ;;  %v241_v15 = vld [vmem:[%s811_s25 + $0xd0] sm:$0xff]  ;;  %v219_v16 = vld [vmem:[%s811_s25 + $0x20] sm:$0xff] }
  0x18   : > { %v234_v14 = vld [vmem:[%s811_s25 + $0x98] sm:$0xff]  ;;  %v227_v17 = vld [vmem:[%s811_s25 + $0x60] sm:$0xff]  ;;  %v220_v20 = vld [vmem:[%s811_s25 + $0x28] sm:$0xff] }
  0x19   : > { %v242_v18 = vld [vmem:[%s811_s25 + $0xd8] sm:$0xff]  ;;  %v235_v19 = vld [vmem:[%s811_s25 + $0xa0] sm:$0xff]  ;;  %v228_v21 = vld [vmem:[%s811_s25 + $0x68] sm:$0xff] }
  0x1a   : > { %v243_v22 = vld [vmem:[%s811_s25 + $0xe0] sm:$0xff]  ;;  %v236_v23 = vld [vmem:[%s811_s25 + $0xa8] sm:$0xff]  ;;  %v221_v24 = vld [vmem:[%s811_s25 + $0x30] sm:$0xff] }
  0x1b   : > { %v229_v25 = vld [vmem:[%s811_s25 + $0x70] sm:$0xff]  ;;  %v244_v26 = vld [vmem:[%s811_s25 + $0xe8] sm:$0xff]  ;;  %v222_v28 = vld [vmem:[%s811_s25 + $0x38] sm:$0xff] }
  0x1c   : > { %629 = vmatmul.msk.f32.gmra.mxu0 %vm252_vm1, %v216_v4  ;;  %v237_v27 = vld [vmem:[%s811_s25 + $0xb0] sm:$0xff]  ;;  %v230_v29 = vld [vmem:[%s811_s25 + $0x78] sm:$0xff] }
  0x1d   : > { %637 = vmatmul.msk.f32.gmra.mxu1 %vm252_vm1, %v224_v5  ;;  %v245_v30 = vld [vmem:[%s811_s25 + $0xf0] sm:$0xff]  ;;  %v238_v31 = vld [vmem:[%s811_s25 + $0xb8] sm:$0xff] }
  0x1e   : > { %645 = vmatmul.msk.f32.gmra.mxu2 %vm252_vm1, %v232_v6  ;;  %v246_v32 = vld [vmem:[%s811_s25 + $0xf8] sm:$0xff] }
  0x1f   : > { %653 = vmatmul.msk.f32.gmra.mxu3 %vm252_vm1, %v240_v11 }
  0x24   : > { %630 = vmatmul.msk.f32.gmra.mxu0 %vm252_vm1, %v217_v8 }
  0x25   : > { %638 = vmatmul.msk.f32.gmra.mxu1 %vm252_vm1, %v225_v9 }
  0x26   : > { %646 = vmatmul.msk.f32.gmra.mxu2 %vm252_vm1, %v233_v10 }
  0x27   : > { %654 = vmatmul.msk.f32.gmra.mxu3 %vm252_vm1, %v241_v15 }
  0x2c   : > { %631 = vmatmul.msk.f32.gmra.mxu0 %vm252_vm1, %v218_v12 }
  0x2d   : > { %639 = vmatmul.msk.f32.gmra.mxu1 %vm252_vm1, %v226_v13 }
  0x2e   : > { %647 = vmatmul.msk.f32.gmra.mxu2 %vm252_vm1, %v234_v14 }
  0x2f   : > { %655 = vmatmul.msk.f32.gmra.mxu3 %vm252_vm1, %v242_v18 }
  0x34   : > { %632 = vmatmul.msk.f32.gmra.mxu0 %vm252_vm1, %v219_v16 }
  0x35   : > { %640 = vmatmul.msk.f32.gmra.mxu1 %vm252_vm1, %v227_v17 }
  0x36   : > { %648 = vmatmul.msk.f32.gmra.mxu2 %vm252_vm1, %v235_v19 }
  0x37   : > { %656 = vmatmul.msk.f32.gmra.mxu3 %vm252_vm1, %v243_v22 }
  0x3c   : > { %633 = vmatmul.msk.f32.gmra.mxu0 %vm252_vm1, %v220_v20 }
  0x3d   : > { %641 = vmatmul.msk.f32.gmra.mxu1 %vm252_vm1, %v228_v21 }
  0x3e   : > { %649 = vmatmul.msk.f32.gmra.mxu2 %vm252_vm1, %v236_v23 }
  0x3f   : > { %657 = vmatmul.msk.f32.gmra.mxu3 %vm252_vm1, %v244_v26 }
  0x44   : > { %634 = vmatmul.msk.f32.gmra.mxu0 %vm252_vm1, %v221_v24 }
  0x45   : > { %642 = vmatmul.msk.f32.gmra.mxu1 %vm252_vm1, %v229_v25 }
  0x46   : > { %650 = vmatmul.msk.f32.gmra.mxu2 %vm252_vm1, %v237_v27 }
  0x47   : > { %658 = vmatmul.msk.f32.gmra.mxu3 %vm252_vm1, %v245_v30 }
  0x4c   : > { %635 = vmatmul.msk.f32.gmra.mxu0 %vm252_vm1, %v222_v28 }
  0x4d   : > { %643 = vmatmul.msk.f32.gmra.mxu1 %vm252_vm1, %v230_v29 }
  0x4e   : > { %651 = vmatmul.msk.f32.gmra.mxu2 %vm252_vm1, %v238_v31 }
  0x4f   : > { %659 = vmatmul.msk.f32.gmra.mxu3 %vm252_vm1, %v246_v32 }
  0x91   : > { %v370_v33 = vpop.f32.mrf.mxu0 }
  0x92   : > { %v394_v34 = vpop.f32.mrf.mxu1  ;;  %v371_v52 = vadd.f32 %v890_v48, %v370_v33 }
  0x93   : > { %v395_v11 = vadd.f32 %v890_v48, %v394_v34 }
  0x94   : > { %v466_v57 = vmax.f32 %v371_v52, 0.0 }
  0x95   : > { %v474_v18 = vmax.f32 %v395_v11, 0.0 }
  0x99   : > { %v373_v35 = vpop.f32.mrf.mxu0  ;;  %v877_v37 = vpop.f32.mrf.mxu2 }
  0x9a   : > { %v397_v36 = vpop.f32.mrf.mxu1  ;;  %v881_v43 = vpop.f32.mrf.mxu3  ;;  %v374_v50 = vadd.f32 %v890_v48, %v373_v35 }
  0x9b   : > { %v398_v15 = vadd.f32 %v890_v48, %v397_v36 }
  0x9c   : > { %v467_v54 = vmax.f32 %v374_v50, 0.0 }
  0x9d   : > { %v475_v22 = vmax.f32 %v398_v15, 0.0 }
  0x9e   : > { %v499_v62 = vadd.f32 %v467_v54, %v466_v57 }
  0xa1   : > { %v376_v38 = vpop.f32.mrf.mxu0  ;;  %v879_v40 = vpop.f32.mrf.mxu2 }
  0xa2   : > { %v400_v39 = vpop.f32.mrf.mxu1  ;;  %v885_v47 = vpop.f32.mrf.mxu3  ;;  %v377_v53 = vadd.f32 %v890_v48, %v376_v38  ;;  %v422_v50 = vadd.f32 %v890_v48, %v879_v40 }
  0xa3   : > { %v401_v19 = vadd.f32 %v890_v48, %v400_v39 }
  0xa4   : > { %v468_v58 = vmax.f32 %v377_v53, 0.0  ;;  %v762_v53 = vmov 0.0  }
  0xa5   : > { %v476_v25 = vmax.f32 %v401_v19, 0.0  ;;  %214 = vst [vmem:[#allocation2] sm:$0x1] %v762_v53 }
  0xa6   : > { %v500_v1 = vadd.f32 %v499_v62, %v468_v58  ;;  %v483_v58 = vmax.f32 %v422_v50, 0.0 }
  0xa9   : > { %v379_v41 = vpop.f32.mrf.mxu0  ;;  %v883_v45 = vpop.f32.mrf.mxu2 }
  0xaa   : > { %v403_v42 = vpop.f32.mrf.mxu1  ;;  %v380_v55 = vadd.f32 %v890_v48, %v379_v41  ;;  %v899_v61 = vpop.f32.mrf.mxu3 }
  0xab   : > { %v404_v23 = vadd.f32 %v890_v48, %v403_v42  ;;  %v419_v42 = vadd.f32 %v890_v48, %v877_v37 }
  0xac   : > { %v469_v63 = vmax.f32 %v380_v55, 0.0  ;;  %v425_v55 = vadd.f32 %v890_v48, %v883_v45 }
  0xad   : > { %v477_v29 = vmax.f32 %v404_v23, 0.0  ;;  %v482_v54 = vmax.f32 %v419_v42, 0.0  ;;  %v498_v42 = vld [vmem:[#allocation2] sm:$0x1] }
  0xae   : > { %v501_v5 = vadd.f32 %v500_v1, %v469_v63 }
  0xb1   : > { %v382_v44 = vpop.f32.mrf.mxu0  ;;  %v893_v51 = vpop.f32.mrf.mxu2 }
  0xb2   : > { %v406_v46 = vpop.f32.mrf.mxu1  ;;  %v383_v59 = vadd.f32 %v890_v48, %v382_v44  ;;  %v905_v14 = vpop.f32.mrf.mxu3 }
  0xb3   : > { %v407_v26 = vadd.f32 %v890_v48, %v406_v46  ;;  %v452_v19 = vadd.f32 %v890_v48, %v905_v14 }
  0xb4   : > { %v470_v2 = vmax.f32 %v383_v59, 0.0  ;;  %v428_v59 = vadd.f32 %v890_v48, %v893_v51  ;;  %v443_v51 = vadd.f32 %v890_v48, %v881_v43 }
  0xb5   : > { %v478_v33 = vmax.f32 %v407_v26, 0.0 }
  0xb6   : > { %v502_v7 = vadd.f32 %v501_v5, %v470_v2  ;;  %v485_v40 = vmax.f32 %v428_v59, 0.0  ;;  %v490_v15 = vmax.f32 %v443_v51, 0.0 }
  0xb9   : > { %v385_v49 = vpop.f32.mrf.mxu0  ;;  %v430_v4 = vpop.f32.mrf.mxu2 }
  0xba   : > { %v409_v56 = vpop.f32.mrf.mxu1  ;;  %v386_v0 = vadd.f32 %v890_v48, %v385_v49  ;;  %v454_v32 = vpop.f32.mrf.mxu3  ;;  %v431_v62 = vadd.f32 %v890_v48, %v430_v4 }
  0xbb   : > { %v410_v30 = vadd.f32 %v890_v48, %v409_v56  ;;  %v455_v43 = vadd.f32 %v890_v48, %v454_v32 }
  0xbc   : > { %v471_v6 = vmax.f32 %v386_v0, 0.0 }
  0xbd   : > { %v479_v38 = vmax.f32 %v410_v30, 0.0  ;;  %v494_v26 = vmax.f32 %v455_v43, 0.0 }
  0xbe   : > { %v503_v12 = vadd.f32 %v502_v7, %v471_v6 }
  0xc1   : > { %v388_v60 = vpop.f32.mrf.mxu0  ;;  %v433_v21 = vpop.f32.mrf.mxu2 }
  0xc2   : > { %v389_v3 = vadd.f32 %v890_v48, %v388_v60  ;;  %v412_v10 = vpop.f32.mrf.mxu1  ;;  %v457_v57 = vpop.f32.mrf.mxu3  ;;  %v484_v60 = vmax.f32 %v425_v55, 0.0  ;;  %v434_v1 = vadd.f32 %v890_v48, %v433_v21 }
  0xc3   : > { %v413_v35 = vadd.f32 %v890_v48, %v412_v10 }
  0xc4   : > { %v472_v8 = vmax.f32 %v389_v3, 0.0  ;;  %v486_v3 = vmax.f32 %v431_v62, 0.0  ;;  %v487_v7 = vmax.f32 %v434_v1, 0.0 }
  0xc5   : > { %v480_v46 = vmax.f32 %v413_v35, 0.0 }
  0xc6   : > { %v504_v16 = vadd.f32 %v503_v12, %v472_v8  ;;  %v446_v12 = vadd.f32 %v890_v48, %v885_v47 }
  0xc9   : > { %v391_v9 = vpop.f32.mrf.mxu0  ;;  %v436_v41 = vpop.f32.mrf.mxu2 }
  0xca   : > { %v392_v13 = vadd.f32 %v890_v48, %v391_v9  ;;  %v415_v28 = vpop.f32.mrf.mxu1  ;;  %v437_v45 = vadd.f32 %v890_v48, %v436_v41  ;;  %v460_v9 = vpop.f32.mrf.mxu3 }
  0xcb   : > { %v416_v36 = vadd.f32 %v890_v48, %v415_v28  ;;  %v461_v28 = vadd.f32 %v890_v48, %v460_v9 }
  0xcc   : > { %v473_v17 = vmax.f32 %v392_v13, 0.0  ;;  %v488_v4 = vmax.f32 %v437_v45, 0.0 }
  0xcd   : > { %v481_v49 = vmax.f32 %v416_v36, 0.0 }
  0xce   : > { %v505_v20 = vadd.f32 %v504_v16, %v473_v17  ;;  %v449_v16 = vadd.f32 %v890_v48, %v899_v61 }
  0xd0   : > { %v506_v24 = vadd.f32 %v505_v20, %v474_v18  ;;  %v491_v18 = vmax.f32 %v446_v12, 0.0  ;;  %v492_v21 = vmax.f32 %v449_v16, 0.0 }
  0xd1   : > { %v439_v0 = vpop.f32.mrf.mxu2 }
  0xd2   : > { %v507_v27 = vadd.f32 %v506_v24, %v475_v22  ;;  %v440_v6 = vadd.f32 %v890_v48, %v439_v0  ;;  %v463_v23 = vpop.f32.mrf.mxu3  ;;  %v493_v24 = vmax.f32 %v452_v19, 0.0 }
  0xd3   : > { %v464_v61 = vadd.f32 %v890_v48, %v463_v23 }
  0xd4   : > { %v508_v31 = vadd.f32 %v507_v27, %v476_v25  ;;  %v489_v11 = vmax.f32 %v440_v6, 0.0  ;;  %v458_v25 = vadd.f32 %v890_v48, %v457_v57 }
  0xd6   : > { %v509_v34 = vadd.f32 %v508_v31, %v477_v29  ;;  %v495_v29 = vmax.f32 %v458_v25, 0.0  ;;  %v496_v31 = vmax.f32 %v461_v28, 0.0 }
  0xd8   : > { %v510_v39 = vadd.f32 %v509_v34, %v478_v33  ;;  %v497_v33 = vmax.f32 %v464_v61, 0.0 }
  0xda   : > { %v511_v44 = vadd.f32 %v510_v39, %v479_v38 }
  0xdc   : > { %v512_v52 = vadd.f32 %v511_v44, %v480_v46 }
  0xde   : > { %v513_v56 = vadd.f32 %v512_v52, %v481_v49 }
  0xe0   : > { %v514_v37 = vadd.f32 %v513_v56, %v482_v54 }
  0xe2   : > { %v515_v63 = vadd.f32 %v514_v37, %v483_v58 }
  0xe4   : > { %v516_v2 = vadd.f32 %v515_v63, %v484_v60 }
  0xe6   : > { %v517_v5 = vadd.f32 %v516_v2, %v485_v40 }
  0xe8   : > { %v518_v8 = vadd.f32 %v517_v5, %v486_v3 }
  0xea   : > { %v519_v10 = vadd.f32 %v518_v8, %v487_v7 }
  0xec   : > { %v520_v13 = vadd.f32 %v519_v10, %v488_v4 }
  0xee   : > { %v521_v17 = vadd.f32 %v520_v13, %v489_v11 }
  0xf0   : > { %v522_v20 = vadd.f32 %v521_v17, %v490_v15 }
  0xf2   : > { %v523_v22 = vadd.f32 %v522_v20, %v491_v18 }
  0xf4   : > { %v524_v47 = vadd.f32 %v523_v22, %v492_v21 }
  0xf6   : > { %v525_v27 = vadd.f32 %v524_v47, %v493_v24 }
  0xf8   : > { %v526_v30 = vadd.f32 %v525_v27, %v494_v26 }
  0xfa   : > { %v527_v14 = vadd.f32 %v526_v30, %v495_v29 }
  0xfc   : > { %v528_v34 = vadd.f32 %v527_v14, %v496_v31 }
  0xfe   : > { %v529_v32 = vadd.f32 %v528_v34, %v497_v33 }
 0x100   : > { %v530_v35 = vrot.slane %v529_v32, 4 }
 0x102   : > { %v531_v36 = vadd.f32 %v530_v35, %v529_v32 }
 0x104   : > { %v532_v38 = vrot.slane %v531_v36, 2 }
 0x106   : > { %v533_v39 = vadd.f32 %v532_v38, %v531_v36 }
 0x108   : > { %v534_v41 = vrot.slane %v533_v39, 1 }
 0x10a   : > { %v535_v44 = vadd.f32 %v534_v41, %v533_v39 }
 0x10c   : > { %v536_v46 = vadd.f32 %v535_v44, %v498_v42 }
 0x10e   : > { %537 = vst [vmem:[#allocation2] sm:$0x1] %v536_v46 }
 0x115   : > { %v541_v48 = vld [vmem:[#allocation2] sm:$0x1] }
 0x116   : > { %v542_v49 = vmul.f32 0.00390625, %v541_v48 }
 0x118   : > { %543 = vst [vmem:[%s209_s30] sm:$0x1] %v542_v49 }
 0x119 PF: > { %s14_s14 = sadd.s32 1, %s759_s14   ;;  %s955_s12 = smov %s755_s13 }
 0x11a   : > { %p11_p8 = scmp.ge.s32.totalorder %s14_s14, 4   ;;  %s956_s13 = smov %s958_s16 }
 0x11c   :  { %13 = sbr.rel (!%p11_p8) target bundleno = 2 (0x2), region = 75 }
 0x121   :  { %561 = vsyncpa [#allocation4], 1 }
 0x122   :  { %563 = vsyncpa [#allocation4 + $0x1], 1 }

// kernel: _lambda_.3
= control target key start
LH: loop header
LB: loop body
LE: loop exit
PB: predicated region body
PF: predicated region fallthrough
CT: control target
= control target key end

     0   :  { %18 = vsyncpa [#allocation3], 0  ;;  %s6582_s0 = inlined_call_operand.vmem [shape: f32[16,128], index: 0, kind: input, shape index: {}]   ;;  %s6583_s1 = inlined_call_operand.hbm [shape: bf16[128,128], index: 1, kind: input, shape index: {}]   ;;  %s6584_s2 = inlined_call_operand.hbm [shape: f32[1,128], index: 2, kind: input, shape index: {}]   ;;  %s6585_s3 = inlined_call_operand.hbm [shape: bf16[128,128], index: 3, kind: input, shape index: {}]   ;;  %s6586_s4 = inlined_call_operand.hbm [shape: f32[1,128], index: 4, kind: input, shape index: {}]   ;;  %s6587_s5 = inlined_call_operand.vmem [shape: bf16[128,256], index: 5, kind: input, shape index: {}]   ;;  %s6588_s6 = inlined_call_operand.hbm [shape: f32[1,256], index: 6, kind: input, shape index: {}]   ;;  %s6589_s7 = inlined_call_operand.hbm [shape: bf16[256,512], index: 7, kind: input, shape index: {}]   ;;  %s6590_s8 = inlined_call_operand.hbm [shape: f32[1,512], index: 8, kind: input, shape index: {}]   ;;  %s6591_s9 = inlined_call_operand.hbm [shape: bf16[512,1024], index: 9, kind: input, shape index: {}]   ;;  %s6592_s10 = inlined_call_operand.hbm [shape: f32[1,1024], index: 10, kind: input, shape index: {}]   ;;  %s6593_s11 = inlined_call_operand.vmem [shape: bf16[1024,128], index: 11, kind: input, shape index: {}]   ;;  %s6594_s12 = inlined_call_operand.hbm [shape: f32[1,128], index: 12, kind: input, shape index: {}]   ;;  %s6595_s13 = inlined_call_operand.vmem [shape: f32[16,128], index: 13, kind: output, shape index: {}]  }
   0x1   :  { %19 = vsyncpa [#allocation5], 0 }
   0x2   :  { %20 = vsyncpa [#allocation8], 0 }
   0x3   :  { %21 = vsyncpa [#allocation11], 0 }
   0x4   :  { %22 = vsyncpa [#allocation14], 0  ;;  %s44_s27 = sshll.u32 %s6584_s2, 4  ;;  %s45_s27 = int_to_ptr.hbm [resolvable:$true] %s44_s27 }
   0x5   :  { %23 = vsyncpa [#allocation17], 0  ;;  %s6038_s28 = smov [#allocation4]   ;;  %s68_s15 = sshll.u32 %s6586_s4, 4  ;;  %s69_s15 = int_to_ptr.hbm [resolvable:$true] %s68_s15 }
   0x6   :  { %s46_s29 = sshll.u32 %s6038_s28, 4  ;;  %s6039_s16 = smov [#allocation7]   ;;  %s47_s29 = int_to_ptr.vmem [resolvable:$true] %s46_s29 }
   0x7   :  { %49 = dma.hbm_to_vmem [thread:$0]  %s45_s27, 16, %s47_s29, [#allocation5]  }
   0x8   :  { %s70_s17 = sshll.u32 %s6039_s16, 4  ;;  %s91_s20 = sshll.u32 %s6589_s7, 4  ;;  %s71_s17 = int_to_ptr.vmem [resolvable:$true] %s70_s17  ;;  %s92_s20 = int_to_ptr.hbm [resolvable:$true] %s91_s20 }
   0x9   :  { %73 = dma.hbm_to_vmem [thread:$0]  %s69_s15, 16, %s71_s17, [#allocation8]  }
   0xa   :  { %s6040_s2 = smov [#allocation10]   ;;  %s115_s24 = sshll.u32 %s6591_s9, 4  ;;  %s116_s24 = int_to_ptr.hbm [resolvable:$true] %s115_s24 }
   0xb   :  { %s93_s21 = sshll.u32 %s6040_s2, 4  ;;  %s6041_s25 = smov 256   ;;  %s94_s21 = int_to_ptr.vmem [resolvable:$true] %s93_s21 }
   0xc   :  { %s6042_s4 = smov 16   ;;  %s6043_s26 = smov [#allocation13]  }
   0xd   :  { %99 = dma.hbm_to_vmem [thread:$0]  %s92_s20, 8192, %s94_s21, [#allocation11], %s6041_s25, %s6041_s25, %s6042_s4  }
   0xe   :  { %s117_s27 = sshll.u32 %s6043_s26, 4  ;;  %s6044_s28 = smov 512   ;;  %s118_s27 = int_to_ptr.vmem [resolvable:$true] %s117_s27 }
   0xf   :  { %s6045_s29 = smov 32   ;;  %s30_s14 = sshll.u32 %s6583_s1, 4  ;;  %s31_s14 = int_to_ptr.hbm [resolvable:$true] %s30_s14 }
  0x10   :  { %123 = dma.hbm_to_vmem [thread:$0]  %s116_s24, 32768, %s118_s27, [#allocation14], %s6044_s28, %s6044_s28, %s6045_s29  }
  0x11   :  { %s6046_s15 = smov [#allocation2]   ;;  %s54_s18 = sshll.u32 %s6585_s3, 4  ;;  %s55_s18 = int_to_ptr.hbm [resolvable:$true] %s54_s18 }
  0x12   :  { %s32_s16 = sshll.u32 %s6046_s15, 4  ;;  %s6047_s19 = smov 64   ;;  %s33_s16 = int_to_ptr.vmem [resolvable:$true] %s32_s16 }
  0x13   :  { %s6048_s20 = smov 4   ;;  %s6049_s2 = smov [#allocation6]  }
  0x14   :  { %38 = dma.hbm_to_vmem [thread:$0]  %s31_s14, 1024, %s33_s16, [#allocation3], %s6047_s19, %s6047_s19, %s6048_s20  }
  0x15   :  { %s56_s21 = sshll.u32 %s6049_s2, 4  ;;  %s81_s24 = sshll.u32 %s6588_s6, 4  ;;  %s57_s21 = int_to_ptr.vmem [resolvable:$true] %s56_s21  ;;  %s82_s24 = int_to_ptr.hbm [resolvable:$true] %s81_s24 }
  0x16   :  { %62 = dma.hbm_to_vmem [thread:$0]  %s55_s18, 1024, %s57_s21, [#allocation5], %s6047_s19, %s6047_s19, %s6048_s20  }
  0x17   :  { %s105_s4 = sshll.u32 %s6590_s8, 4  ;;  %s6050_s26 = smov [#allocation9]   ;;  %s106_s4 = int_to_ptr.hbm [resolvable:$true] %s105_s4 }
  0x18   :  { %s83_s27 = sshll.u32 %s6050_s26, 4  ;;  %s6051_s3 = smov [#allocation12]   ;;  %s84_s27 = int_to_ptr.vmem [resolvable:$true] %s83_s27 }
  0x19   :  { %86 = dma.hbm_to_vmem [thread:$0]  %s82_s24, 32, %s84_s27, [#allocation8]  }
  0x1a   :  { %s107_s28 = sshll.u32 %s6051_s3, 4  ;;  %s129_s30 = sshll.u32 %s6592_s10, 4  ;;  %s108_s28 = int_to_ptr.vmem [resolvable:$true] %s107_s28  ;;  %s130_s30 = int_to_ptr.hbm [resolvable:$true] %s129_s30 }
  0x1b   :  { %110 = dma.hbm_to_vmem [thread:$0]  %s106_s4, 64, %s108_s28, [#allocation11]  }
  0x1c   :  { %s142_s15 = sshll.u32 %s6594_s12, 4  ;;  %s6052_s16 = smov [#allocation15]   ;;  %s143_s15 = int_to_ptr.hbm [resolvable:$true] %s142_s15 }
  0x1d   :  { %s131_s8 = sshll.u32 %s6052_s16, 4  ;;  %s6053_s17 = smov [#allocation16]   ;;  %s132_s8 = int_to_ptr.vmem [resolvable:$true] %s131_s8 }
  0x1e   :  { %134 = dma.hbm_to_vmem [thread:$0]  %s130_s30, 128, %s132_s8, [#allocation14]  }
  0x1f   :  { %s144_s9 = sshll.u32 %s6053_s17, 4  ;;  %s145_s9 = int_to_ptr.vmem [resolvable:$true] %s144_s9 }
  0x20   :  { %147 = dma.hbm_to_vmem [thread:$0]  %s143_s15, 16, %s145_s9, [#allocation17]  }
  0x21   :  { %6026 = dma.done.wait [#allocation3], 1024  }
  0x22   :  { %6027 = vsyncadd [#allocation3], 4294966272 }
  0x23   :  { %6028 = dma.done.wait [#allocation5], 1040  }
  0x24   :  { %6029 = vsyncadd [#allocation5], 4294966256 }
  0x25   :  { %6030 = dma.done.wait [#allocation8], 48  }
  0x26   :  { %6031 = vsyncadd [#allocation8], 4294967248 }
  0x27   :  { %6032 = dma.done.wait [#allocation11], 8256  }
  0x28   :  { %6033 = vsyncadd [#allocation11], 4294959040 }
  0x29   :  { %6034 = dma.done.wait [#allocation14], 32896  }
  0x2a   :  { %6035 = vsyncadd [#allocation14], 4294934400 }
  0x2b   :  { %6036 = dma.done.wait [#allocation17], 16  }
  0x2c   :  { %6037 = vsyncadd [#allocation17], 4294967280  ;;  %v5354_v0 = vld [vmem:[#allocation2 + $0x38] sm:$0xff]  ;;  %v5353_v1 = vld [vmem:[#allocation2 + $0x30] sm:$0xff] }
  0x2d   :  { %259 = vmatpush.bf16.msra.mxu0 %v5354_v0  ;;  %v5362_v2 = vld [vmem:[#allocation6 + $0x38] sm:$0xff]  ;;  %v5361_v3 = vld [vmem:[#allocation6 + $0x30] sm:$0xff]  ;;  %v5352_v4 = vld [vmem:[#allocation2 + $0x28] sm:$0xff] }
  0x2e   :  { %344 = vmatpush.bf16.msra.mxu1 %v5362_v2  ;;  %v5360_v5 = vld [vmem:[#allocation6 + $0x28] sm:$0xff]  ;;  %v5351_v6 = vld [vmem:[#allocation2 + $0x20] sm:$0xff]  ;;  %v5350_v8 = vld [vmem:[#allocation2 + $0x18] sm:$0xff] }
  0x2f   :  { %v5359_v7 = vld [vmem:[#allocation6 + $0x20] sm:$0xff]  ;;  %v5349_v9 = vld [vmem:[#allocation2 + $0x10] sm:$0xff]  ;;  %v5358_v15 = vld [vmem:[#allocation6 + $0x18] sm:$0xff] }
  0x30   :  { %v5348_v10 = vld [vmem:[#allocation2 + $0x8] sm:$0xff]  ;;  %v5347_v11 = vld [vmem:[#allocation2] sm:$0xff]  ;;  %v5357_v16 = vld [vmem:[#allocation6 + $0x10] sm:$0xff] }
  0x31   :  { %260 = vmatpush.bf16.msra.mxu0 %v5353_v1  ;;  %v188_v12 = vld [vmem:[%s6582_s0] sm:$0xff]  ;;  %v189_v13 = vld [vmem:[%s6582_s0 + $0x8] sm:$0xff]  ;;  %v3805_v19 = vld [vmem:[%s6587_s5 + $0x70] sm:$0xf] }
  0x32   :  { %345 = vmatpush.bf16.msra.mxu1 %v5361_v3  ;;  %v190_v14 = vpack.c.bf16 %v189_v13, %v188_v12  ;;  %v5356_v17 = vld [vmem:[#allocation6 + $0x8] sm:$0xff]  ;;  %v5355_v18 = vld [vmem:[#allocation6] sm:$0xff]  ;;  %v5378_v20 = vld [vmem:[%s6587_s5 + $0x74] sm:$0xf0] }
  0x33   :  { %v5377_v21 = vld [vmem:[%s6587_s5 + $0x74] sm:$0xf]  ;;  %v3806_v22 = vor.u32 %v5378_v20, %v3805_v19  ;;  %v3807_v23 = vld [vmem:[%s6587_s5 + $0x78] sm:$0xf0]  ;;  %v3797_v24 = vld [vmem:[%s6587_s5 + $0x60] sm:$0xf] }
  0x34   :  { %v5376_v25 = vld [vmem:[%s6587_s5 + $0x64] sm:$0xf0]  ;;  %v3810_v26 = vor.u32 %v5377_v21, %v3807_v23  ;;  %v5375_v27 = vld [vmem:[%s6587_s5 + $0x64] sm:$0xf]  ;;  %v3799_v28 = vld [vmem:[%s6587_s5 + $0x68] sm:$0xf0] }
  0x35   :  { %261 = vmatpush.bf16.msra.mxu0 %v5352_v4  ;;  %463 = vmatpush.bf16.msra.mxu2 %v3806_v22  ;;  %v3798_v29 = vor.u32 %v5376_v25, %v3797_v24  ;;  %v3802_v30 = vor.u32 %v5375_v27, %v3799_v28  ;;  %v3789_v31 = vld [vmem:[%s6587_s5 + $0x50] sm:$0xf]  ;;  %v5374_v32 = vld [vmem:[%s6587_s5 + $0x54] sm:$0xf0]  ;;  %v5373_v33 = vld [vmem:[%s6587_s5 + $0x54] sm:$0xf] }
  0x36   :  { %346 = vmatpush.bf16.msra.mxu1 %v5360_v5  ;;  %477 = vmatpush.bf16.msra.mxu3 %v3810_v26  ;;  %v3791_v34 = vld [vmem:[%s6587_s5 + $0x58] sm:$0xf0]  ;;  %v3790_v35 = vor.u32 %v5374_v32, %v3789_v31  ;;  %v3781_v37 = vld [vmem:[%s6587_s5 + $0x40] sm:$0xf]  ;;  %v5372_v38 = vld [vmem:[%s6587_s5 + $0x44] sm:$0xf0] }
  0x37   :  { %v3794_v36 = vor.u32 %v5373_v33, %v3791_v34  ;;  %v5371_v39 = vld [vmem:[%s6587_s5 + $0x44] sm:$0xf]  ;;  %v3783_v40 = vld [vmem:[%s6587_s5 + $0x48] sm:$0xf0]  ;;  %v3782_v41 = vor.u32 %v5372_v38, %v3781_v37  ;;  %v5779_v44 = vld [vmem:[#allocation4] ss:$0 sm:$0xff] }
  0x38   :  { %v3786_v42 = vor.u32 %v5371_v39, %v3783_v40  ;;  %v3773_v51 = vld [vmem:[%s6587_s5 + $0x30] sm:$0xf]  ;;  %v5370_v52 = vld [vmem:[%s6587_s5 + $0x34] sm:$0xf0]  ;;  %v5369_v53 = vld [vmem:[%s6587_s5 + $0x34] sm:$0xf] }
  0x39   :  { %262 = vmatpush.bf16.msra.mxu0 %v5351_v6  ;;  %464 = vmatpush.bf16.msra.mxu2 %v3798_v29  ;;  %v3774_v54 = vor.u32 %v5370_v52, %v3773_v51  ;;  %v3775_v55 = vld [vmem:[%s6587_s5 + $0x38] sm:$0xf0]  ;;  %v3765_v57 = vld [vmem:[%s6587_s5 + $0x20] sm:$0xf]  ;;  %v5368_v58 = vld [vmem:[%s6587_s5 + $0x24] sm:$0xf0] }
  0x3a   :  { %347 = vmatpush.bf16.msra.mxu1 %v5359_v7  ;;  %478 = vmatpush.bf16.msra.mxu3 %v3802_v30  ;;  %v3778_v56 = vor.u32 %v5369_v53, %v3775_v55  ;;  %v5367_v59 = vld [vmem:[%s6587_s5 + $0x24] sm:$0xf]  ;;  %v3766_v60 = vor.u32 %v5368_v58, %v3765_v57  ;;  %v3767_v61 = vld [vmem:[%s6587_s5 + $0x28] sm:$0xf0]  ;;  %v3757_v63 = vld [vmem:[%s6587_s5 + $0x10] sm:$0xf] }
  0x3b   :  { %v3770_v62 = vor.u32 %v5367_v59, %v3767_v61  ;;  %v5366_v0 = vld [vmem:[%s6587_s5 + $0x14] sm:$0xf0]  ;;  %v5365_v1 = vld [vmem:[%s6587_s5 + $0x14] sm:$0xf]  ;;  %v3759_v3 = vld [vmem:[%s6587_s5 + $0x18] sm:$0xf0] }
  0x3c   :  { %v3758_v2 = vor.u32 %v5366_v0, %v3757_v63  ;;  %v3762_v4 = vor.u32 %v5365_v1, %v3759_v3  ;;  %v3749_v5 = vld [vmem:[%s6587_s5] sm:$0xf]  ;;  %v5364_v6 = vld [vmem:[%s6587_s5 + $0x4] sm:$0xf0]  ;;  %v5363_v7 = vld [vmem:[%s6587_s5 + $0x4] sm:$0xf] }
  0x3d   :  { %263 = vmatpush.bf16.msra.mxu0 %v5350_v8  ;;  %465 = vmatpush.bf16.msra.mxu2 %v3790_v35  ;;  %v3750_v8 = vor.u32 %v5364_v6, %v3749_v5  ;;  %v5409_v12 = vld [vmem:[#allocation10 + $0xec] sm:$0xf0]  ;;  %v4053_v13 = vld [vmem:[#allocation10 + $0x1e0] sm:$0xf]  ;;  %v5439_v20 = vld [vmem:[#allocation10 + $0x1e4] sm:$0xf] }
  0x3e   :  { %348 = vmatpush.bf16.msra.mxu1 %v5358_v15  ;;  %479 = vmatpush.bf16.msra.mxu3 %v3794_v36  ;;  %v5441_v15 = vld [vmem:[#allocation10 + $0x1ec] sm:$0xf0]  ;;  %v4055_v21 = vld [vmem:[#allocation10 + $0x1f0] sm:$0xf0]  ;;  %v3909_v22 = vld [vmem:[#allocation10 + $0xc0] sm:$0xf] }
  0x3f   :  { %v4058_v23 = vor.u32 %v5439_v20, %v4055_v21  ;;  %v5405_v24 = vld [vmem:[#allocation10 + $0xcc] sm:$0xf0]  ;;  %v4037_v25 = vld [vmem:[#allocation10 + $0x1c0] sm:$0xf]  ;;  %v5403_v29 = vld [vmem:[#allocation10 + $0xc4] sm:$0xf] }
  0x40   :  { %v5437_v26 = vld [vmem:[#allocation10 + $0x1cc] sm:$0xf0]  ;;  %v3910_v27 = vor.u32 %v5405_v24, %v3909_v22  ;;  %v3911_v30 = vld [vmem:[#allocation10 + $0xd0] sm:$0xf0]  ;;  %v5435_v31 = vld [vmem:[#allocation10 + $0x1c4] sm:$0xf] }
  0x41   :  { %264 = vmatpush.bf16.msra.mxu0 %v5349_v9  ;;  %466 = vmatpush.bf16.msra.mxu2 %v3782_v41  ;;  %v3751_v9 = vld [vmem:[%s6587_s5 + $0x8] sm:$0xf0]  ;;  %v4038_v28 = vor.u32 %v5437_v26, %v4037_v25  ;;  %v3914_v32 = vor.u32 %v5403_v29, %v3911_v30  ;;  %v4039_v33 = vld [vmem:[#allocation10 + $0x1d0] sm:$0xf0]  ;;  %v3893_v34 = vld [vmem:[#allocation10 + $0xa0] sm:$0xf] }
  0x42   :  { %349 = vmatpush.bf16.msra.mxu1 %v5357_v16  ;;  %480 = vmatpush.bf16.msra.mxu3 %v3786_v42  ;;  %v5407_v16 = vld [vmem:[#allocation10 + $0xe4] sm:$0xf]  ;;  %v5401_v35 = vld [vmem:[#allocation10 + $0xac] sm:$0xf0]  ;;  %v4042_v36 = vor.u32 %v5435_v31, %v4039_v33  ;;  %v4021_v37 = vld [vmem:[#allocation10 + $0x1a0] sm:$0xf] }
  0x43   :  { %v5433_v38 = vld [vmem:[#allocation10 + $0x1ac] sm:$0xf0]  ;;  %v5399_v39 = vld [vmem:[#allocation10 + $0xa4] sm:$0xf]  ;;  %v3894_v40 = vor.u32 %v5401_v35, %v3893_v34  ;;  %v3895_v41 = vld [vmem:[#allocation10 + $0xb0] sm:$0xf0] }
  0x44   :  { %v5431_v42 = vld [vmem:[#allocation10 + $0x1a4] sm:$0xf]  ;;  %v3879_v52 = vld [vmem:[#allocation10 + $0x90] sm:$0xf0]  ;;  %v3861_v58 = vld [vmem:[#allocation10 + $0x60] sm:$0xf] }
  0x45   :  { %265 = vmatpush.bf16.msra.mxu0 %v5348_v10  ;;  %467 = vmatpush.bf16.msra.mxu2 %v3774_v54  ;;  %v3754_v10 = vor.u32 %v5363_v7, %v3751_v9  ;;  %v5395_v51 = vld [vmem:[#allocation10 + $0x84] sm:$0xf]  ;;  %v4007_v54 = vld [vmem:[#allocation10 + $0x190] sm:$0xf0]  ;;  %v5393_v59 = vld [vmem:[#allocation10 + $0x6c] sm:$0xf0] }
  0x46   :  { %350 = vmatpush.bf16.msra.mxu1 %v5356_v17  ;;  %481 = vmatpush.bf16.msra.mxu3 %v3778_v56  ;;  %v3927_v17 = vld [vmem:[#allocation10 + $0xf0] sm:$0xf0]  ;;  %v5427_v53 = vld [vmem:[#allocation10 + $0x184] sm:$0xf]  ;;  %v3882_v57 = vor.u32 %v5395_v51, %v3879_v52  ;;  %v3862_v3 = vor.u32 %v5393_v59, %v3861_v58  ;;  %v3845_v6 = vld [vmem:[#allocation10 + $0x40] sm:$0xf] }
  0x47   :  { %v3930_v19 = vor.u32 %v5407_v16, %v3927_v17  ;;  %v4010_v61 = vor.u32 %v5427_v53, %v4007_v54  ;;  %v5391_v63 = vld [vmem:[#allocation10 + $0x64] sm:$0xf]  ;;  %v3863_v0 = vld [vmem:[#allocation10 + $0x70] sm:$0xf0]  ;;  %v5389_v7 = vld [vmem:[#allocation10 + $0x4c] sm:$0xf0] }
  0x48   :  { %v5423_v1 = vld [vmem:[#allocation10 + $0x164] sm:$0xf]  ;;  %v3866_v5 = vor.u32 %v5391_v63, %v3863_v0  ;;  %v5780_v16 = vld [vmem:[#allocation7] ss:$0 sm:$0xff]  ;;  %v3846_v17 = vor.u32 %v5389_v7, %v3845_v6  ;;  %v3829_v20 = vld [vmem:[#allocation10 + $0x20] sm:$0xf] }
  0x49   :  { %266 = vmatpush.bf16.msra.mxu0 %v5347_v11  ;;  %468 = vmatpush.bf16.msra.mxu2 %v3766_v60  ;;  %v3925_v11 = vld [vmem:[#allocation10 + $0xe0] sm:$0xf]  ;;  %v5385_v21 = vld [vmem:[#allocation10 + $0x2c] sm:$0xf0]  ;;  %v5383_v25 = vld [vmem:[#allocation10 + $0x24] sm:$0xf] }
  0x4a   :  { %351 = vmatpush.bf16.msra.mxu1 %v5355_v18  ;;  %482 = vmatpush.bf16.msra.mxu3 %v3770_v62  ;;  %v4054_v18 = vor.u32 %v5441_v15, %v4053_v13  ;;  %v3989_v60 = vld [vmem:[#allocation10 + $0x160] sm:$0xf]  ;;  %v5425_v62 = vld [vmem:[#allocation10 + $0x16c] sm:$0xf0]  ;;  %v3847_v13 = vld [vmem:[#allocation10 + $0x50] sm:$0xf0]  ;;  %v3830_v29 = vor.u32 %v5385_v21, %v3829_v20 }
  0x4b   :  { %v3975_v15 = vld [vmem:[#allocation10 + $0x150] sm:$0xf0]  ;;  %v3957_v22 = vld [vmem:[#allocation10 + $0x120] sm:$0xf]  ;;  %v5417_v24 = vld [vmem:[#allocation10 + $0x12c] sm:$0xf0] }
  0x4c   :  { %267 = vmatmul.bf16.vlgmr.msra.gmra.mxu0 %v190_v14  ;;  %v3926_v14 = vor.u32 %v5409_v12, %v3925_v11  ;;  %v5421_v11 = vld [vmem:[#allocation10 + $0x14c] sm:$0xf0]  ;;  %v5387_v12 = vld [vmem:[#allocation10 + $0x44] sm:$0xf]  ;;  %v3831_v26 = vld [vmem:[#allocation10 + $0x30] sm:$0xf0]  ;;  %v3958_v31 = vor.u32 %v5417_v24, %v3957_v22 }
  0x4d   :  { %469 = vmatpush.bf16.msra.mxu2 %v3758_v2  ;;  %v3991_v2 = vld [vmem:[#allocation10 + $0x170] sm:$0xf0]  ;;  %v3813_v33 = vld [vmem:[#allocation10] sm:$0xf]  ;;  %v5381_v34 = vld [vmem:[#allocation10 + $0xc] sm:$0xf0] }
  0x4e   :  { %483 = vmatpush.bf16.msra.mxu3 %v3762_v4  ;;  %891 = vmatpush.bf16.msrb.mxu0 %v3926_v14  ;;  %v3990_v4 = vor.u32 %v5425_v62, %v3989_v60  ;;  %v5419_v14 = vld [vmem:[#allocation10 + $0x144] sm:$0xf]  ;;  %v3933_v51 = vld [vmem:[#allocation10 + $0xe8] sm:$0xf]  ;;  %v5410_v52 = vld [vmem:[#allocation10 + $0xf4] sm:$0xf0] }
  0x4f   :  { %905 = vmatpush.bf16.msrb.mxu1 %v4054_v18  ;;  %v4061_v53 = vld [vmem:[#allocation10 + $0x1e8] sm:$0xf]  ;;  %v3934_v54 = vor.u32 %v5410_v52, %v3933_v51  ;;  %v5440_v60 = vld [vmem:[#allocation10 + $0x1ec] sm:$0xf]  ;;  %v5406_v0 = vld [vmem:[#allocation10 + $0xd4] sm:$0xf0] }
  0x50   :  { %v3917_v63 = vld [vmem:[#allocation10 + $0xc8] sm:$0xf]  ;;  %v5432_v20 = vld [vmem:[#allocation10 + $0x1ac] sm:$0xf]  ;;  %v4031_v21 = vld [vmem:[#allocation10 + $0x1b8] sm:$0xf0] }
  0x51   :  { %470 = vmatpush.bf16.msra.mxu2 %v3750_v8  ;;  %v3973_v8 = vld [vmem:[#allocation10 + $0x140] sm:$0xf]  ;;  %v4034_v22 = vor.u32 %v5432_v20, %v4031_v21  ;;  %v5398_v24 = vld [vmem:[#allocation10 + $0x94] sm:$0xf0] }
  0x52   :  { %484 = vmatpush.bf16.msra.mxu3 %v3754_v10  ;;  %892 = vmatpush.bf16.msrb.mxu0 %v3910_v27  ;;  %v3994_v10 = vor.u32 %v5423_v1, %v3991_v2  ;;  %v3974_v18 = vor.u32 %v5421_v11, %v3973_v8  ;;  %v5415_v27 = vld [vmem:[#allocation10 + $0x124] sm:$0xf]  ;;  %v4045_v1 = vld [vmem:[#allocation10 + $0x1c8] sm:$0xf]  ;;  %v3918_v2 = vor.u32 %v5406_v0, %v3917_v63  ;;  %v5436_v8 = vld [vmem:[#allocation10 + $0x1cc] sm:$0xf] }
  0x53   :  { %906 = vmatpush.bf16.msrb.mxu1 %v4038_v28  ;;  %v3959_v28 = vld [vmem:[#allocation10 + $0x130] sm:$0xf0]  ;;  %v3901_v11 = vld [vmem:[#allocation10 + $0xa8] sm:$0xf]  ;;  %v5384_v63 = vld [vmem:[#allocation10 + $0x2c] sm:$0xf] }
  0x55   :  { %919 = vmatpush.bf16.msrb.mxu2 %v3930_v19  ;;  %v3850_v19 = vor.u32 %v5387_v12, %v3847_v13  ;;  %v5402_v12 = vld [vmem:[#allocation10 + $0xb4] sm:$0xf0]  ;;  %v4029_v13 = vld [vmem:[#allocation10 + $0x1a8] sm:$0xf] }
  0x56   :  { %933 = vmatpush.bf16.msrb.mxu3 %v4058_v23  ;;  %893 = vmatpush.bf16.msrb.mxu0 %v3894_v40  ;;  %v3978_v23 = vor.u32 %v5419_v14, %v3975_v15  ;;  %v5379_v40 = vld [vmem:[#allocation10 + $0x4] sm:$0xf]  ;;  %v3902_v14 = vor.u32 %v5402_v12, %v3901_v11  ;;  %v5434_v15 = vld [vmem:[#allocation10 + $0x1b4] sm:$0xf0]  ;;  %v5380_v11 = vld [vmem:[#allocation10 + $0xc] sm:$0xf] }
  0x57   :  { %v3823_v12 = vld [vmem:[#allocation10 + $0x18] sm:$0xf0] }
  0x59   :  { %920 = vmatpush.bf16.msrb.mxu2 %v3914_v32  ;;  %v3834_v32 = vor.u32 %v5383_v25, %v3831_v26  ;;  %v4013_v25 = vld [vmem:[#allocation10 + $0x188] sm:$0xf] }
  0x5a   :  { %934 = vmatpush.bf16.msrb.mxu3 %v4042_v36  ;;  %v3962_v36 = vor.u32 %v5415_v27, %v3959_v28  ;;  %v5430_v27 = vld [vmem:[#allocation10 + $0x194] sm:$0xf0]  ;;  %v5396_v28 = vld [vmem:[#allocation10 + $0x8c] sm:$0xf] }
  0xc9   :  { %v268_v43 = vpop.f32.mrf.mxu0 }
  0xca   :  { %v269_v45 = vadd.f32 %v5779_v44, %v268_v43  ;;  %v4023_v43 = vld [vmem:[#allocation10 + $0x1b0] sm:$0xf0] }
  0xcc   :  { %v273_v48 = vmax.f32 %v269_v45, 0.0  ;;  %v3898_v45 = vor.u32 %v5399_v39, %v3895_v41  ;;  %v5413_v39 = vld [vmem:[#allocation10 + $0x10c] sm:$0xf0]  ;;  %v3815_v41 = vld [vmem:[#allocation10 + $0x10] sm:$0xf0] }
  0xce   :  { %921 = vmatpush.bf16.msrb.mxu2 %v3898_v45 }
  0xd1   :  { %v270_v46 = vpop.f32.mrf.mxu0 }
  0xd2   :  { %v271_v47 = vadd.f32 %v5779_v44, %v270_v46  ;;  %v4022_v44 = vor.u32 %v5433_v38, %v4021_v37  ;;  %v3877_v46 = vld [vmem:[#allocation10 + $0x80] sm:$0xf]  ;;  %922 = vmatpush.bf16.msrb.mxu2 %v3882_v57  ;;  %v3935_v57 = vld [vmem:[#allocation10 + $0xf8] sm:$0xf0] }
  0xd3   :  { %v3941_v37 = vld [vmem:[#allocation10 + $0x100] sm:$0xf] }
  0xd4   :  { %v274_v49 = vmax.f32 %v271_v47, 0.0  ;;  %v5397_v47 = vld [vmem:[#allocation10 + $0x8c] sm:$0xf0]  ;;  %907 = vmatpush.bf16.msrb.mxu1 %v4022_v44  ;;  %v3943_v44 = vld [vmem:[#allocation10 + $0x110] sm:$0xf0] }
  0xd5   :  { %v3878_v55 = vor.u32 %v5397_v47, %v3877_v46  ;;  %v3942_v47 = vor.u32 %v5413_v39, %v3941_v37  ;;  %v3997_v37 = vld [vmem:[#allocation10 + $0x168] sm:$0xf]  ;;  %v5426_v39 = vld [vmem:[#allocation10 + $0x174] sm:$0xf0] }
  0xd6   :  { %v275_v50 = vpack.c.bf16 %v274_v49, %v273_v48  ;;  %v4005_v48 = vld [vmem:[#allocation10 + $0x180] sm:$0xf]  ;;  %v4026_v49 = vor.u32 %v5431_v42, %v4023_v43  ;;  %923 = vmatpush.bf16.msrb.mxu2 %v3866_v5  ;;  %v3814_v42 = vor.u32 %v5381_v34, %v3813_v33  ;;  %v5411_v43 = vld [vmem:[#allocation10 + $0x104] sm:$0xf]  ;;  %v3919_v5 = vld [vmem:[#allocation10 + $0xd8] sm:$0xf0] }
  0xd7   :  { %894 = vmatpush.bf16.msrb.mxu0 %v3878_v55  ;;  %v5442_v55 = vld [vmem:[#allocation10 + $0x1f4] sm:$0xf0]  ;;  %v4015_v33 = vld [vmem:[#allocation10 + $0x198] sm:$0xf0] }
  0xd8   :  { %352 = vmatmul.bf16.vlgmr.msra.gmra.mxu1 %v275_v50  ;;  %v5429_v50 = vld [vmem:[#allocation10 + $0x18c] sm:$0xf0]  ;;  %935 = vmatpush.bf16.msrb.mxu3 %v4026_v49  ;;  %v4062_v58 = vor.u32 %v5442_v55, %v4061_v53  ;;  %v5388_v53 = vld [vmem:[#allocation10 + $0x4c] sm:$0xf] }
  0xd9   :  { %v4006_v56 = vor.u32 %v5429_v50, %v4005_v48  ;;  %v3818_v48 = vor.u32 %v5379_v40, %v3815_v41  ;;  %v3946_v50 = vor.u32 %v5411_v43, %v3943_v44  ;;  %v5392_v40 = vld [vmem:[#allocation10 + $0x6c] sm:$0xf]  ;;  %v3871_v41 = vld [vmem:[#allocation10 + $0x78] sm:$0xf0] }
  0xda   :  { %924 = vmatpush.bf16.msrb.mxu2 %v3850_v19  ;;  %v3874_v43 = vor.u32 %v5392_v40, %v3871_v41  ;;  %v5424_v44 = vld [vmem:[#allocation10 + $0x16c] sm:$0xf]  ;;  %v5061_v40 = vld [vmem:[#allocation13 + $0x7c0] sm:$0xf] }
  0xdb   :  { %908 = vmatpush.bf16.msrb.mxu1 %v4006_v56  ;;  %895 = vmatpush.bf16.msrb.mxu0 %v3862_v3  ;;  %v5408_v56 = vld [vmem:[#allocation10 + $0xec] sm:$0xf]  ;;  %v5438_v3 = vld [vmem:[#allocation10 + $0x1d4] sm:$0xf0]  ;;  %v5695_v41 = vld [vmem:[#allocation13 + $0x7dc] sm:$0xf0] }
  0xdc   :  { %936 = vmatpush.bf16.msrb.mxu3 %v4010_v61  ;;  %v3938_v59 = vor.u32 %v5408_v56, %v3935_v57  ;;  %v4063_v61 = vld [vmem:[#allocation10 + $0x1f8] sm:$0xf0]  ;;  %v4046_v6 = vor.u32 %v5438_v3, %v4045_v1  ;;  %v5420_v55 = vld [vmem:[#allocation10 + $0x14c] sm:$0xf] }
  0xdd   :  { %v4066_v62 = vor.u32 %v5440_v60, %v4063_v61  ;;  %v3983_v57 = vld [vmem:[#allocation10 + $0x158] sm:$0xf0]  ;;  %v3965_v61 = vld [vmem:[#allocation10 + $0x128] sm:$0xf] }
  0xde   :  { %925 = vmatpush.bf16.msrb.mxu2 %v3834_v32  ;;  %v5428_v32 = vld [vmem:[#allocation10 + $0x18c] sm:$0xf]  ;;  %v3986_v60 = vor.u32 %v5420_v55, %v3983_v57  ;;  %v3839_v1 = vld [vmem:[#allocation10 + $0x38] sm:$0xf0]  ;;  %v5687_v55 = vld [vmem:[#allocation13 + $0x79c] sm:$0xf0] }
  0xdf   :  { %909 = vmatpush.bf16.msrb.mxu1 %v3990_v4  ;;  %896 = vmatpush.bf16.msrb.mxu0 %v3846_v17  ;;  %v5404_v4 = vld [vmem:[#allocation10 + $0xcc] sm:$0xf]  ;;  %v3903_v17 = vld [vmem:[#allocation10 + $0xb8] sm:$0xf0]  ;;  %v4018_v34 = vor.u32 %v5428_v32, %v4015_v33  ;;  %v4549_v32 = vld [vmem:[#allocation13 + $0x3c0] sm:$0xf] }
  0xe0   :  { %937 = vmatpush.bf16.msrb.mxu3 %v3994_v10  ;;  %v3922_v7 = vor.u32 %v5404_v4, %v3919_v5  ;;  %v3967_v3 = vld [vmem:[#allocation10 + $0x138] sm:$0xf0]  ;;  %v3842_v5 = vor.u32 %v5384_v63, %v3839_v1  ;;  %v5567_v33 = vld [vmem:[#allocation13 + $0x3dc] sm:$0xf0] }
  0xe1   :  { %v4229_v57 = vld [vmem:[#allocation13 + $0x140] sm:$0xf] }
  0xe2   :  { %926 = vmatpush.bf16.msrb.mxu2 %v3818_v48  ;;  %v5390_v48 = vld [vmem:[#allocation10 + $0x54] sm:$0xf0]  ;;  %v4741_v63 = vld [vmem:[#allocation13 + $0x540] sm:$0xf] }
  0xe3   :  { %910 = vmatpush.bf16.msrb.mxu1 %v3974_v18  ;;  %897 = vmatpush.bf16.msrb.mxu0 %v3830_v29  ;;  %v4030_v18 = vor.u32 %v5434_v15, %v4029_v13  ;;  %v3887_v29 = vld [vmem:[#allocation10 + $0x98] sm:$0xf0]  ;;  %v5412_v13 = vld [vmem:[#allocation10 + $0x10c] sm:$0xf]  ;;  %v5615_v1 = vld [vmem:[#allocation13 + $0x55c] sm:$0xf0] }
  0xe4   :  { %938 = vmatpush.bf16.msrb.mxu3 %v3978_v23  ;;  %v3885_v23 = vld [vmem:[#allocation10 + $0x88] sm:$0xf] }
  0xe5   :  { %v3886_v26 = vor.u32 %v5398_v24, %v3885_v23 }
  0xe7   :  { %911 = vmatpush.bf16.msrb.mxu1 %v3958_v31  ;;  %898 = vmatpush.bf16.msrb.mxu0 %v3814_v42  ;;  %v3890_v31 = vor.u32 %v5396_v28, %v3887_v29  ;;  %v3998_v42 = vor.u32 %v5426_v39, %v3997_v37  ;;  %v4293_v28 = vld [vmem:[#allocation13 + $0x1c0] sm:$0xf] }
  0xe8   :  { %939 = vmatpush.bf16.msrb.mxu3 %v3962_v36  ;;  %v5394_v36 = vld [vmem:[#allocation10 + $0x74] sm:$0xf0]  ;;  %v5631_v37 = vld [vmem:[#allocation13 + $0x5dc] sm:$0xf0] }
  0xeb   :  { %912 = vmatpush.bf16.msrb.mxu1 %v3942_v47  ;;  %947 = vmatpush.bf16.msra.mxu0 %v3934_v54  ;;  %v3855_v54 = vld [vmem:[#allocation10 + $0x58] sm:$0xf0] }
  0xec   :  { %940 = vmatpush.bf16.msrb.mxu3 %v3946_v50  ;;  %v5422_v50 = vld [vmem:[#allocation10 + $0x154] sm:$0xf0]  ;;  %v3858_v56 = vor.u32 %v5388_v53, %v3855_v54  ;;  %v5623_v53 = vld [vmem:[#allocation13 + $0x59c] sm:$0xf0] }
  0xed   :  { %v5029_v54 = vld [vmem:[#allocation13 + $0x780] sm:$0xf] }
  0xef   :  { %961 = vmatpush.bf16.msra.mxu1 %v4062_v58  ;;  %948 = vmatpush.bf16.msra.mxu0 %v3918_v2  ;;  %v3837_v58 = vld [vmem:[#allocation10 + $0x28] sm:$0xf]  ;;  %v5416_v2 = vld [vmem:[#allocation10 + $0x12c] sm:$0xf] }
  0xf3   :  { %962 = vmatpush.bf16.msra.mxu1 %v4046_v6  ;;  %949 = vmatpush.bf16.msra.mxu0 %v3902_v14  ;;  %v3821_v6 = vld [vmem:[#allocation10 + $0x8] sm:$0xf]  ;;  %v3951_v14 = vld [vmem:[#allocation10 + $0x118] sm:$0xf0] }
  0xf7   :  { %963 = vmatpush.bf16.msra.mxu1 %v4030_v18  ;;  %950 = vmatpush.bf16.msra.mxu0 %v3886_v26  ;;  %v3954_v18 = vor.u32 %v5412_v13, %v3951_v14  ;;  %v5607_v13 = vld [vmem:[#allocation13 + $0x51c] sm:$0xf0] }
  0xf8   :  { %v4965_v14 = vld [vmem:[#allocation13 + $0x700] sm:$0xf] }
 0x155   :  { %v353_v9 = vpop.f32.mrf.mxu1 }
 0x156   :  { %v354_v30 = vadd.f32 %v5780_v16, %v353_v9  ;;  %v4047_v9 = vld [vmem:[#allocation10 + $0x1d8] sm:$0xf0] }
 0x157   :  { %v4050_v10 = vor.u32 %v5436_v8, %v4047_v9  ;;  %v3949_v8 = vld [vmem:[#allocation10 + $0x108] sm:$0xf]  ;;  %v3970_v9 = vor.u32 %v5416_v2, %v3967_v3  ;;  %v4997_v2 = vld [vmem:[#allocation13 + $0x740] sm:$0xf] }
 0x158   :  { %v358_v45 = vmax.f32 %v354_v30, 0.0  ;;  %v4014_v30 = vor.u32 %v5430_v27, %v4013_v25  ;;  %v5679_v3 = vld [vmem:[#allocation13 + $0x75c] sm:$0xf0] }
 0x15a   :  { %964 = vmatpush.bf16.msra.mxu1 %v4014_v30 }
 0x15d   :  { %v355_v35 = vpop.f32.mrf.mxu1 }
 0x15e   :  { %v356_v38 = vadd.f32 %v5780_v16, %v355_v35  ;;  %v5400_v16 = vld [vmem:[#allocation10 + $0xac] sm:$0xf]  ;;  %v3869_v35 = vld [vmem:[#allocation10 + $0x68] sm:$0xf]  ;;  %965 = vmatpush.bf16.msra.mxu1 %v3998_v42 }
 0x15f   :  { %v3906_v19 = vor.u32 %v5400_v16, %v3903_v17  ;;  %v3826_v17 = vor.u32 %v5380_v11, %v3823_v12  ;;  %v4709_v11 = vld [vmem:[#allocation13 + $0x500] sm:$0xf]  ;;  %v4998_v12 = vor.u32 %v5679_v3, %v4997_v2 }
 0x160   :  { %v359_v46 = vmax.f32 %v356_v38, 0.0  ;;  %v3870_v38 = vor.u32 %v5394_v36, %v3869_v35  ;;  %v4805_v36 = vld [vmem:[#allocation13 + $0x5c0] sm:$0xf] }
 0x162   :  { %v360_v49 = vpack.c.bf16 %v359_v46, %v358_v45  ;;  %v3999_v45 = vld [vmem:[#allocation10 + $0x178] sm:$0xf0]  ;;  %v3853_v46 = vld [vmem:[#allocation10 + $0x48] sm:$0xf]  ;;  %951 = vmatpush.bf16.msra.mxu0 %v3870_v38 }
 0x163   :  { %v4002_v47 = vor.u32 %v5424_v44, %v3999_v45  ;;  %v3854_v51 = vor.u32 %v5390_v48, %v3853_v46  ;;  %v4261_v45 = vld [vmem:[#allocation13 + $0x180] sm:$0xf] }
 0x164   :  { %471 = vmatmul.bf16.vlgmr.msra.gmra.mxu2 %v360_v49  ;;  %485 = vmatmul.bf16.vlgmr.msra.gmra.mxu3 %v360_v49  ;;  %v3981_v49 = vld [vmem:[#allocation10 + $0x148] sm:$0xf]  ;;  %v5495_v46 = vld [vmem:[#allocation13 + $0x19c] sm:$0xf0] }
 0x165   :  { %975 = vmatpush.bf16.msra.mxu2 %v3938_v59  ;;  %989 = vmatpush.bf16.msra.mxu3 %v4066_v62  ;;  %v3982_v52 = vor.u32 %v5422_v50, %v3981_v49  ;;  %v5386_v59 = vld [vmem:[#allocation10 + $0x34] sm:$0xf0]  ;;  %v4517_v48 = vld [vmem:[#allocation13 + $0x380] sm:$0xf]  ;;  %v4806_v50 = vor.u32 %v5631_v37, %v4805_v36 }
 0x166   :  { %v5418_v62 = vld [vmem:[#allocation10 + $0x134] sm:$0xf0]  ;;  %952 = vmatpush.bf16.msra.mxu0 %v3854_v51  ;;  %v3838_v0 = vor.u32 %v5386_v59, %v3837_v58  ;;  %v5559_v49 = vld [vmem:[#allocation13 + $0x39c] sm:$0xf0] }
 0x167   :  { %966 = vmatpush.bf16.msra.mxu1 %v3982_v52  ;;  %v3966_v4 = vor.u32 %v5418_v62, %v3965_v61  ;;  %v4773_v51 = vld [vmem:[#allocation13 + $0x580] sm:$0xf]  ;;  %v5062_v52 = vor.u32 %v5695_v41, %v5061_v40  ;;  %v4518_v59 = vor.u32 %v5559_v49, %v4517_v48 }
 0x168   :  { %v5487_v58 = vld [vmem:[#allocation13 + $0x15c] sm:$0xf0]  ;;  %v4774_v62 = vor.u32 %v5623_v53, %v4773_v51 }
 0x169   :  { %976 = vmatpush.bf16.msra.mxu2 %v3922_v7  ;;  %990 = vmatpush.bf16.msra.mxu3 %v4050_v10  ;;  %v5382_v7 = vld [vmem:[#allocation10 + $0x14] sm:$0xf0]  ;;  %v5551_v61 = vld [vmem:[#allocation13 + $0x35c] sm:$0xf0] }
 0x16a   :  { %v5414_v10 = vld [vmem:[#allocation10 + $0x114] sm:$0xf0]  ;;  %953 = vmatpush.bf16.msra.mxu0 %v3838_v0  ;;  %v3822_v15 = vor.u32 %v5382_v7, %v3821_v6  ;;  %v5030_v0 = vor.u32 %v5687_v55, %v5029_v54  ;;  %v5479_v6 = vld [vmem:[#allocation13 + $0x11c] sm:$0xf0]  ;;  %v4295_v55 = vld [vmem:[#allocation13 + $0x1e0] sm:$0xf0] }
 0x16b   :  { %967 = vmatpush.bf16.msra.mxu1 %v3966_v4  ;;  %v3950_v16 = vor.u32 %v5414_v10, %v3949_v8  ;;  %v4230_v4 = vor.u32 %v5487_v58, %v4229_v57  ;;  %v4453_v8 = vld [vmem:[#allocation13 + $0x300] sm:$0xf]  ;;  %v4742_v10 = vor.u32 %v5615_v1, %v4741_v63  ;;  %v4551_v57 = vld [vmem:[#allocation13 + $0x3e0] sm:$0xf0] }
 0x16c   :  { %v4645_v36 = vld [vmem:[#allocation13 + $0x480] sm:$0xf]  ;;  %v4263_v63 = vld [vmem:[#allocation13 + $0x1a0] sm:$0xf0] }
 0x16d   :  { %977 = vmatpush.bf16.msra.mxu2 %v3906_v19  ;;  %991 = vmatpush.bf16.msra.mxu3 %v4034_v22  ;;  %v377_v19 = vld [vmem:[#allocation9] sm:$0x3]  ;;  %v5591_v37 = vld [vmem:[#allocation13 + $0x49c] sm:$0xf0]  ;;  %v4519_v1 = vld [vmem:[#allocation13 + $0x3a0] sm:$0xf0] }
 0x16e   :  { %954 = vmatpush.bf16.msra.mxu0 %v3822_v15  ;;  %v379_v22 = vperm.slane %v377_v19, 0  ;;  %v380_v23 = vperm.slane %v377_v19, 1  ;;  %v5671_v15 = vld [vmem:[#allocation13 + $0x71c] sm:$0xf0] }
 0x16f   :  { %968 = vmatpush.bf16.msra.mxu1 %v3950_v16  ;;  %v5455_v41 = vld [vmem:[#allocation13 + $0x5c] sm:$0xf0] }
 0x170   :  { %v5583_v48 = vld [vmem:[#allocation13 + $0x45c] sm:$0xf0] }
 0x171   :  { %978 = vmatpush.bf16.msra.mxu2 %v3890_v31  ;;  %992 = vmatpush.bf16.msra.mxu3 %v4018_v34  ;;  %v5503_v31 = vld [vmem:[#allocation13 + $0x1dc] sm:$0xf0] }
 0x172   :  { %v4294_v44 = vor.u32 %v5503_v31, %v4293_v28  ;;  %v5463_v31 = vld [vmem:[#allocation13 + $0x9c] sm:$0xf0] }
 0x173   :  { %v5511_v53 = vld [vmem:[#allocation13 + $0x21c] sm:$0xf0] }
 0x175   :  { %979 = vmatpush.bf16.msra.mxu2 %v3874_v43  ;;  %993 = vmatpush.bf16.msra.mxu3 %v4002_v47  ;;  %v4550_v47 = vor.u32 %v5567_v33, %v4549_v32  ;;  %v4389_v32 = vld [vmem:[#allocation13 + $0x280] sm:$0xf] }
 0x176   :  { %v5527_v33 = vld [vmem:[#allocation13 + $0x29c] sm:$0xf0] }
 0x177   :  { %v4390_v40 = vor.u32 %v5527_v33, %v4389_v32  ;;  %v4135_v32 = vld [vmem:[#allocation13 + $0xa0] sm:$0xf0] }
 0x178   :  { %v5619_v33 = vld [vmem:[#allocation13 + $0x584] sm:$0xf] }
 0x179   :  { %980 = vmatpush.bf16.msra.mxu2 %v3858_v56  ;;  %994 = vmatpush.bf16.msra.mxu3 %v3986_v60  ;;  %v4262_v56 = vor.u32 %v5495_v46, %v4261_v45  ;;  %v4485_v60 = vld [vmem:[#allocation13 + $0x340] sm:$0xf]  ;;  %v4646_v46 = vor.u32 %v5591_v37, %v4645_v36 }
 0x17a   :  { %v4486_v7 = vor.u32 %v5551_v61, %v4485_v60  ;;  %v5519_v45 = vld [vmem:[#allocation13 + $0x25c] sm:$0xf0]  ;;  %v5491_v61 = vld [vmem:[#allocation13 + $0x184] sm:$0xf] }
 0x17b   :  { %v4266_v2 = vor.u32 %v5491_v61, %v4263_v63  ;;  %v4837_v36 = vld [vmem:[#allocation13 + $0x600] sm:$0xf] }
 0x17c   :  { %v5639_v37 = vld [vmem:[#allocation13 + $0x61c] sm:$0xf0] }
 0x17d   :  { %981 = vmatpush.bf16.msra.mxu2 %v3842_v5  ;;  %995 = vmatpush.bf16.msra.mxu3 %v3970_v9  ;;  %v4197_v5 = vld [vmem:[#allocation13 + $0x100] sm:$0xf] }
 0x17e   :  { %v5543_v9 = vld [vmem:[#allocation13 + $0x31c] sm:$0xf0]  ;;  %v4198_v16 = vor.u32 %v5479_v6, %v4197_v5  ;;  %v4231_v5 = vld [vmem:[#allocation13 + $0x160] sm:$0xf0] }
 0x17f   :  { %v4454_v19 = vor.u32 %v5543_v9, %v4453_v8  ;;  %v4199_v8 = vld [vmem:[#allocation13 + $0x120] sm:$0xf0] }
 0x181   :  { %982 = vmatpush.bf16.msra.mxu2 %v3826_v17  ;;  %996 = vmatpush.bf16.msra.mxu3 %v3954_v18  ;;  %v4165_v17 = vld [vmem:[#allocation13 + $0xc0] sm:$0xf] }
 0x182   :  { %v5471_v18 = vld [vmem:[#allocation13 + $0xdc] sm:$0xf0] }
 0x183   :  { %v4166_v28 = vor.u32 %v5471_v18, %v4165_v17  ;;  %v5575_v17 = vld [vmem:[#allocation13 + $0x41c] sm:$0xf0] }
 0x1e7   :  { %v472_v20 = vpop.f32.mrf.mxu2  ;;  %v486_v21 = vpop.f32.mrf.mxu3 }
 0x1e8   :  { %v473_v24 = vadd.f32 %v472_v20, %v379_v22  ;;  %v487_v25 = vadd.f32 %v486_v21, %v380_v23  ;;  %v4421_v20 = vld [vmem:[#allocation13 + $0x2c0] sm:$0xf] }
 0x1e9   :  { %v5535_v21 = vld [vmem:[#allocation13 + $0x2dc] sm:$0xf0] }
 0x1ea   :  { %v491_v34 = vmax.f32 %v473_v24, 0.0  ;;  %v492_v35 = vmax.f32 %v487_v25, 0.0  ;;  %v4966_v24 = vor.u32 %v5671_v15, %v4965_v14  ;;  %v5599_v25 = vld [vmem:[#allocation13 + $0x4dc] sm:$0xf0]  ;;  %v4487_v14 = vld [vmem:[#allocation13 + $0x360] sm:$0xf0] }
 0x1ef   :  { %v474_v26 = vpop.f32.mrf.mxu2  ;;  %v488_v27 = vpop.f32.mrf.mxu3 }
 0x1f0   :  { %v475_v29 = vadd.f32 %v474_v26, %v379_v22  ;;  %v489_v30 = vadd.f32 %v488_v27, %v380_v23  ;;  %v4710_v22 = vor.u32 %v5607_v13, %v4709_v11  ;;  %v4677_v23 = vld [vmem:[#allocation13 + $0x4c0] sm:$0xf]  ;;  %v5547_v13 = vld [vmem:[#allocation13 + $0x344] sm:$0xf] }
 0x1f1   :  { %v4933_v26 = vld [vmem:[#allocation13 + $0x6c0] sm:$0xf]  ;;  %v4490_v15 = vor.u32 %v5547_v13, %v4487_v14  ;;  %v4967_v13 = vld [vmem:[#allocation13 + $0x720] sm:$0xf0] }
 0x1f2   :  { %v493_v38 = vmax.f32 %v475_v29, 0.0  ;;  %v494_v39 = vmax.f32 %v489_v30, 0.0  ;;  %v5663_v27 = vld [vmem:[#allocation13 + $0x6dc] sm:$0xf0]  ;;  %v4422_v30 = vor.u32 %v5535_v21, %v4421_v20  ;;  %v4167_v20 = vld [vmem:[#allocation13 + $0xe0] sm:$0xf0] }
 0x1f3   :  { %v4133_v29 = vld [vmem:[#allocation13 + $0x80] sm:$0xf]  ;;  %v5627_v21 = vld [vmem:[#allocation13 + $0x5c4] sm:$0xf] }
 0x1f4   :  { %v6256_v42 = vpack.c.bf16 %v493_v38, %v491_v34  ;;  %v6258_v43 = vpack.c.bf16 %v494_v39, %v492_v35  ;;  %v4678_v34 = vor.u32 %v5599_v25, %v4677_v23  ;;  %v4934_v35 = vor.u32 %v5663_v27, %v4933_v26  ;;  %v4101_v39 = vld [vmem:[#allocation13 + $0x40] sm:$0xf]  ;;  %v4807_v23 = vld [vmem:[#allocation13 + $0x5e0] sm:$0xf0] }
 0x1f5   :  { %v4134_v38 = vor.u32 %v5463_v31, %v4133_v29  ;;  %v4102_v49 = vor.u32 %v5455_v41, %v4101_v39  ;;  %v5655_v11 = vld [vmem:[#allocation13 + $0x69c] sm:$0xf0]  ;;  %v4810_v26 = vor.u32 %v5627_v21, %v4807_v23  ;;  %v4455_v29 = vld [vmem:[#allocation13 + $0x320] sm:$0xf0]  ;;  %v4838_v39 = vor.u32 %v5639_v37, %v4837_v36 }
 0x1f6   :  { %899 = vmatmul.bf16.vlgmr.msrb.gmra.mxu0 %v6256_v42  ;;  %913 = vmatmul.bf16.vlgmr.msrb.gmra.mxu1 %v6258_v43  ;;  %v5647_v25 = vld [vmem:[#allocation13 + $0x65c] sm:$0xf0]  ;;  %v5459_v31 = vld [vmem:[#allocation13 + $0x84] sm:$0xf] }
 0x1f7   :  { %927 = vmatmul.bf16.vlgmr.msrb.gmra.mxu2 %v6256_v42  ;;  %941 = vmatmul.bf16.vlgmr.msrb.gmra.mxu3 %v6258_v43  ;;  %v4423_v41 = vld [vmem:[#allocation13 + $0x2e0] sm:$0xf0] }
 0x1f8   :  { %2569 = vmatpush.bf16.msrb.mxu0 %v4294_v44  ;;  %2583 = vmatpush.bf16.msrb.mxu1 %v4550_v47  ;;  %v4357_v44 = vld [vmem:[#allocation13 + $0x240] sm:$0xf]  ;;  %v5579_v21 = vld [vmem:[#allocation13 + $0x444] sm:$0xf] }
 0x1f9   :  { %2597 = vmatpush.bf16.msrb.mxu2 %v4806_v50  ;;  %2611 = vmatpush.bf16.msrb.mxu3 %v5062_v52  ;;  %v4613_v47 = vld [vmem:[#allocation13 + $0x440] sm:$0xf]  ;;  %v4358_v51 = vor.u32 %v5519_v45, %v4357_v44  ;;  %v5691_v44 = vld [vmem:[#allocation13 + $0x7c4] sm:$0xf] }
 0x1fa   :  { %v4069_v50 = vld [vmem:[#allocation13] sm:$0xf]  ;;  %v4614_v54 = vor.u32 %v5583_v48, %v4613_v47  ;;  %v5451_v48 = vld [vmem:[#allocation13 + $0x44] sm:$0xf] }
 0x1fb   :  { %v4325_v52 = vld [vmem:[#allocation13 + $0x200] sm:$0xf] }
 0x1fc   :  { %2570 = vmatpush.bf16.msrb.mxu0 %v4262_v56  ;;  %2584 = vmatpush.bf16.msrb.mxu1 %v4518_v59  ;;  %v5563_v56 = vld [vmem:[#allocation13 + $0x3c4] sm:$0xf]  ;;  %v4326_v59 = vor.u32 %v5511_v53, %v4325_v52 }
 0x1fd   :  { %2598 = vmatpush.bf16.msrb.mxu2 %v4774_v62  ;;  %2612 = vmatpush.bf16.msrb.mxu3 %v5030_v0  ;;  %v4554_v62 = vor.u32 %v5563_v56, %v4551_v57  ;;  %v5555_v0 = vld [vmem:[#allocation13 + $0x384] sm:$0xf] }
 0x1fe   :  { %v4522_v3 = vor.u32 %v5555_v0, %v4519_v1  ;;  %v5523_v52 = vld [vmem:[#allocation13 + $0x284] sm:$0xf] }
 0x1ff   :  { %v4391_v53 = vld [vmem:[#allocation13 + $0x2a0] sm:$0xf0] }
 0x200   :  { %2571 = vmatpush.bf16.msrb.mxu0 %v4230_v4  ;;  %2585 = vmatpush.bf16.msrb.mxu1 %v4486_v7  ;;  %v5483_v4 = vld [vmem:[#allocation13 + $0x144] sm:$0xf] }
 0x201   :  { %2599 = vmatpush.bf16.msrb.mxu2 %v4742_v10  ;;  %2613 = vmatpush.bf16.msrb.mxu3 %v4998_v12  ;;  %v4234_v6 = vor.u32 %v5483_v4, %v4231_v5  ;;  %v5475_v7 = vld [vmem:[#allocation13 + $0x104] sm:$0xf]  ;;  %v4901_v10 = vld [vmem:[#allocation13 + $0x680] sm:$0xf] }
 0x202   :  { %v4202_v9 = vor.u32 %v5475_v7, %v4199_v8  ;;  %v4902_v12 = vor.u32 %v5655_v11, %v4901_v10  ;;  %v5031_v56 = vld [vmem:[#allocation13 + $0x7a0] sm:$0xf0] }
 0x203   :  { %v5515_v0 = vld [vmem:[#allocation13 + $0x244] sm:$0xf] }
 0x204   :  { %2572 = vmatpush.bf16.msrb.mxu0 %v4198_v16  ;;  %2586 = vmatpush.bf16.msrb.mxu1 %v4454_v19  ;;  %v4581_v16 = vld [vmem:[#allocation13 + $0x400] sm:$0xf]  ;;  %v5467_v19 = vld [vmem:[#allocation13 + $0xc4] sm:$0xf] }
 0x205   :  { %2600 = vmatpush.bf16.msrb.mxu2 %v4710_v22  ;;  %2614 = vmatpush.bf16.msrb.mxu3 %v4966_v24  ;;  %v4582_v18 = vor.u32 %v5575_v17, %v4581_v16  ;;  %v4170_v22 = vor.u32 %v5467_v19, %v4167_v20  ;;  %v4869_v24 = vld [vmem:[#allocation13 + $0x640] sm:$0xf]  ;;  %v4359_v1 = vld [vmem:[#allocation13 + $0x260] sm:$0xf0] }
 0x206   :  { %955 = vmatmul.bf16.vlgmr.msra.gmra.mxu0 %v6256_v42  ;;  %969 = vmatmul.bf16.vlgmr.msra.gmra.mxu1 %v6258_v43  ;;  %v4870_v27 = vor.u32 %v5647_v25, %v4869_v24  ;;  %v4999_v4 = vld [vmem:[#allocation13 + $0x760] sm:$0xf0] }
 0x207   :  { %983 = vmatmul.bf16.vlgmr.msra.gmra.mxu2 %v6256_v42  ;;  %997 = vmatmul.bf16.vlgmr.msra.gmra.mxu3 %v6258_v43  ;;  %v5447_v42 = vld [vmem:[#allocation13 + $0x1c] sm:$0xf0]  ;;  %v5499_v43 = vld [vmem:[#allocation13 + $0x1c4] sm:$0xf] }
 0x208   :  { %2573 = vmatpush.bf16.msrb.mxu0 %v4166_v28  ;;  %2587 = vmatpush.bf16.msrb.mxu1 %v4422_v30  ;;  %v4070_v58 = vor.u32 %v5447_v42, %v4069_v50  ;;  %v4298_v60 = vor.u32 %v5499_v43, %v4295_v55  ;;  %v5539_v28 = vld [vmem:[#allocation13 + $0x304] sm:$0xf]  ;;  %v4394_v55 = vor.u32 %v5523_v52, %v4391_v53 }
 0x209   :  { %2601 = vmatpush.bf16.msrb.mxu2 %v4678_v34  ;;  %2615 = vmatpush.bf16.msrb.mxu3 %v4934_v35  ;;  %v4458_v30 = vor.u32 %v5539_v28, %v4455_v29  ;;  %v4138_v34 = vor.u32 %v5459_v31, %v4135_v32  ;;  %v4775_v35 = vld [vmem:[#allocation13 + $0x5a0] sm:$0xf0] }
 0x20a   :  { %v5611_v50 = vld [vmem:[#allocation13 + $0x544] sm:$0xf] }
 0x20b   :  { %v4679_v7 = vld [vmem:[#allocation13 + $0x4e0] sm:$0xf0] }
 0x20c   :  { %2574 = vmatpush.bf16.msrb.mxu0 %v4134_v38  ;;  %2588 = vmatpush.bf16.msrb.mxu1 %v4390_v40  ;;  %v4778_v38 = vor.u32 %v5619_v33, %v4775_v35  ;;  %v5531_v40 = vld [vmem:[#allocation13 + $0x2c4] sm:$0xf] }
 0x20d   :  { %2602 = vmatpush.bf16.msrb.mxu2 %v4646_v46  ;;  %2616 = vmatpush.bf16.msrb.mxu3 %v4902_v12  ;;  %v4426_v45 = vor.u32 %v5531_v40, %v4423_v41  ;;  %v5063_v46 = vld [vmem:[#allocation13 + $0x7e0] sm:$0xf0] }
 0x20e   :  { %v5066_v47 = vor.u32 %v5691_v44, %v5063_v46  ;;  %v4327_v10 = vld [vmem:[#allocation13 + $0x220] sm:$0xf0] }
 0x20f   :  { %v5667_v11 = vld [vmem:[#allocation13 + $0x704] sm:$0xf] }
 0x210   :  { %2575 = vmatpush.bf16.msrb.mxu0 %v4102_v49  ;;  %2589 = vmatpush.bf16.msrb.mxu1 %v4358_v51  ;;  %v4103_v49 = vld [vmem:[#allocation13 + $0x60] sm:$0xf0]  ;;  %v4970_v14 = vor.u32 %v5667_v11, %v4967_v13  ;;  %v4525_v13 = vld [vmem:[#allocation13 + $0x388] sm:$0xf] }
 0x211   :  { %2603 = vmatpush.bf16.msrb.mxu2 %v4614_v54  ;;  %2617 = vmatpush.bf16.msrb.mxu3 %v4870_v27  ;;  %v4106_v42 = vor.u32 %v5451_v48, %v4103_v49  ;;  %v4743_v51 = vld [vmem:[#allocation13 + $0x560] sm:$0xf0] }
 0x212   :  { %v4746_v43 = vor.u32 %v5611_v50, %v4743_v51  ;;  %v5683_v54 = vld [vmem:[#allocation13 + $0x784] sm:$0xf]  ;;  %v5504_v51 = vld [vmem:[#allocation13 + $0x1e4] sm:$0xf0] }
 0x213   :  { %v5034_v57 = vor.u32 %v5683_v54, %v5031_v56  ;;  %v4647_v16 = vld [vmem:[#allocation13 + $0x4a0] sm:$0xf0] }
 0x214   :  { %2576 = vmatpush.bf16.msrb.mxu0 %v4070_v58  ;;  %2590 = vmatpush.bf16.msrb.mxu1 %v4326_v59  ;;  %v5443_v58 = vld [vmem:[#allocation13 + $0x4] sm:$0xf] }
 0x215   :  { %2604 = vmatpush.bf16.msrb.mxu2 %v4582_v18  ;;  %2618 = vmatpush.bf16.msrb.mxu3 %v4838_v39  ;;  %v4071_v59 = vld [vmem:[#allocation13 + $0x20] sm:$0xf0] }
 0x216   :  { %v4074_v61 = vor.u32 %v5443_v58, %v4071_v59  ;;  %v5659_v18 = vld [vmem:[#allocation13 + $0x6c4] sm:$0xf]  ;;  %v4269_v58 = vld [vmem:[#allocation13 + $0x188] sm:$0xf] }
 0x217   :  { %v4935_v19 = vld [vmem:[#allocation13 + $0x6e0] sm:$0xf0]  ;;  %v5496_v59 = vld [vmem:[#allocation13 + $0x1a4] sm:$0xf0] }
 0x218   :  { %2625 = vmatpush.bf16.msra.mxu0 %v4298_v60  ;;  %2639 = vmatpush.bf16.msra.mxu1 %v4554_v62  ;;  %v5603_v60 = vld [vmem:[#allocation13 + $0x504] sm:$0xf]  ;;  %v4938_v20 = vor.u32 %v5659_v18, %v4935_v19  ;;  %v5480_v18 = vld [vmem:[#allocation13 + $0x124] sm:$0xf0] }
 0x219   :  { %2653 = vmatpush.bf16.msra.mxu2 %v4810_v26  ;;  %2667 = vmatpush.bf16.msra.mxu3 %v5066_v47  ;;  %v4711_v62 = vld [vmem:[#allocation13 + $0x520] sm:$0xf0]  ;;  %v6268_v26 = vld [vmem:[#allocation12] sm:$0xf] }
 0x21a   :  { %v4714_v63 = vor.u32 %v5603_v60, %v4711_v62  ;;  %v5651_v24 = vld [vmem:[#allocation13 + $0x684] sm:$0xf]  ;;  %v563_v33 = vperm.slane %v6268_v26, 0  ;;  %v566_v19 = vperm.slane %v6268_v26, 3 }
 0x21b   :  { %v4903_v25 = vld [vmem:[#allocation13 + $0x6a0] sm:$0xf0] }
 0x21c   :  { %2626 = vmatpush.bf16.msra.mxu0 %v4266_v2  ;;  %2640 = vmatpush.bf16.msra.mxu1 %v4522_v3  ;;  %v4362_v2 = vor.u32 %v5515_v0, %v4359_v1  ;;  %v5675_v3 = vld [vmem:[#allocation13 + $0x744] sm:$0xf]  ;;  %v4906_v27 = vor.u32 %v5651_v24, %v4903_v25  ;;  %v565_v0 = vperm.slane %v6268_v26, 2 }
 0x21d   :  { %2654 = vmatpush.bf16.msra.mxu2 %v4778_v38  ;;  %2668 = vmatpush.bf16.msra.mxu3 %v5034_v57  ;;  %v5002_v5 = vor.u32 %v5675_v3, %v4999_v4  ;;  %v5571_v28 = vld [vmem:[#allocation13 + $0x404] sm:$0xf]  ;;  %v4557_v3 = vld [vmem:[#allocation13 + $0x3c8] sm:$0xf] }
 0x21e   :  { %v4583_v29 = vld [vmem:[#allocation13 + $0x420] sm:$0xf0]  ;;  %v5568_v4 = vld [vmem:[#allocation13 + $0x3e4] sm:$0xf0] }
 0x21f   :  { %v4586_v32 = vor.u32 %v5571_v28, %v4583_v29  ;;  %v4871_v35 = vld [vmem:[#allocation13 + $0x660] sm:$0xf0]  ;;  %v5552_v28 = vld [vmem:[#allocation13 + $0x364] sm:$0xf0] }
 0x220   :  { %2627 = vmatpush.bf16.msra.mxu0 %v4234_v6  ;;  %2641 = vmatpush.bf16.msra.mxu1 %v4490_v15  ;;  %v5595_v6 = vld [vmem:[#allocation13 + $0x4c4] sm:$0xf] }
 0x221   :  { %2655 = vmatpush.bf16.msra.mxu2 %v4746_v43  ;;  %v4682_v8 = vor.u32 %v5595_v6, %v4679_v7  ;;  %2669 = vmatpush.bf16.msra.mxu3 %v5002_v5  ;;  %v5587_v15 = vld [vmem:[#allocation13 + $0x484] sm:$0xf]  ;;  %v4237_v5 = vld [vmem:[#allocation13 + $0x148] sm:$0xf] }
 0x222   :  { %v4650_v17 = vor.u32 %v5587_v15, %v4647_v16  ;;  %v5635_v38 = vld [vmem:[#allocation13 + $0x604] sm:$0xf]  ;;  %v5488_v6 = vld [vmem:[#allocation13 + $0x164] sm:$0xf0] }
 0x223   :  { %v4839_v39 = vld [vmem:[#allocation13 + $0x620] sm:$0xf0] }
 0x224   :  { %2628 = vmatpush.bf16.msra.mxu0 %v4202_v9  ;;  %2642 = vmatpush.bf16.msra.mxu1 %v4458_v30  ;;  %v5507_v9 = vld [vmem:[#allocation13 + $0x204] sm:$0xf]  ;;  %v4842_v44 = vor.u32 %v5635_v38, %v4839_v39  ;;  %v4461_v38 = vld [vmem:[#allocation13 + $0x308] sm:$0xf] }
 0x225   :  { %2656 = vmatpush.bf16.msra.mxu2 %v4714_v63  ;;  %v4330_v12 = vor.u32 %v5507_v9, %v4327_v10  ;;  %2670 = vmatpush.bf16.msra.mxu3 %v4970_v14  ;;  %v4558_v10 = vor.u32 %v5568_v4, %v4557_v3  ;;  %v5560_v14 = vld [vmem:[#allocation13 + $0x3a4] sm:$0xf0] }
 0x226   :  { %v5544_v39 = vld [vmem:[#allocation13 + $0x324] sm:$0xf0] }
 0x227   :  { %v4397_v3 = vld [vmem:[#allocation13 + $0x288] sm:$0xf] }
 0x228   :  { %2629 = vmatpush.bf16.msra.mxu0 %v4170_v22  ;;  %2643 = vmatpush.bf16.msra.mxu1 %v4426_v45  ;;  %v4615_v22 = vld [vmem:[#allocation13 + $0x460] sm:$0xf0]  ;;  %v564_v45 = vperm.slane %v6268_v26, 1 }
 0x229   :  { %2657 = vmatpush.bf16.msra.mxu2 %v4682_v8  ;;  %2671 = vmatpush.bf16.msra.mxu3 %v4938_v20  ;;  %v4618_v23 = vor.u32 %v5579_v21, %v4615_v22 }
 0x22c   :  { %2630 = vmatpush.bf16.msra.mxu0 %v4138_v34  ;;  %2644 = vmatpush.bf16.msra.mxu1 %v4394_v55  ;;  %v5643_v34 = vld [vmem:[#allocation13 + $0x644] sm:$0xf] }
 0x22d   :  { %2658 = vmatpush.bf16.msra.mxu2 %v4650_v17  ;;  %2672 = vmatpush.bf16.msra.mxu3 %v4906_v27  ;;  %v4874_v36 = vor.u32 %v5643_v34, %v4871_v35  ;;  %v4205_v17 = vld [vmem:[#allocation13 + $0x108] sm:$0xf] }
 0x22e   :  { %v4206_v25 = vor.u32 %v5480_v18, %v4205_v17  ;;  %v4493_v27 = vld [vmem:[#allocation13 + $0x348] sm:$0xf]  ;;  %v5500_v17 = vld [vmem:[#allocation13 + $0x1cc] sm:$0xf] }
 0x22f   :  { %v5472_v34 = vld [vmem:[#allocation13 + $0xe4] sm:$0xf0]  ;;  %v4303_v18 = vld [vmem:[#allocation13 + $0x1e8] sm:$0xf0] }
 0x230   :  { %2631 = vmatpush.bf16.msra.mxu0 %v4106_v42  ;;  %2645 = vmatpush.bf16.msra.mxu1 %v4362_v2  ;;  %v4301_v42 = vld [vmem:[#allocation13 + $0x1c8] sm:$0xf]  ;;  %v4270_v2 = vor.u32 %v5496_v59, %v4269_v58 }
 0x231   :  { %2659 = vmatpush.bf16.msra.mxu2 %v4618_v23  ;;  %2673 = vmatpush.bf16.msra.mxu3 %v4874_v36  ;;  %v4302_v54 = vor.u32 %v5504_v51, %v4301_v42  ;;  %v4526_v23 = vor.u32 %v5560_v14, %v4525_v13  ;;  %v4494_v36 = vor.u32 %v5552_v28, %v4493_v27  ;;  %v4749_v59 = vld [vmem:[#allocation13 + $0x548] sm:$0xf] }
 0x232   :  { %v4462_v51 = vor.u32 %v5544_v39, %v4461_v38  ;;  %v4077_v13 = vld [vmem:[#allocation13 + $0x8] sm:$0xf]  ;;  %v4559_v38 = vld [vmem:[#allocation13 + $0x3e8] sm:$0xf0] }
 0x233   :  { %v5448_v14 = vld [vmem:[#allocation13 + $0x24] sm:$0xf0] }
 0x234   :  { %2632 = vmatpush.bf16.msra.mxu0 %v4074_v61  ;;  %2646 = vmatpush.bf16.msra.mxu1 %v4330_v12  ;;  %v4238_v12 = vor.u32 %v5488_v6, %v4237_v5  ;;  %v5528_v6 = vld [vmem:[#allocation13 + $0x2a4] sm:$0xf0] }
 0x235   :  { %2660 = vmatpush.bf16.msra.mxu2 %v4586_v32  ;;  %2674 = vmatpush.bf16.msra.mxu3 %v4842_v44  ;;  %v4685_v27 = vld [vmem:[#allocation13 + $0x4c8] sm:$0xf] }
 0x236   :  { %v5600_v28 = vld [vmem:[#allocation13 + $0x4e4] sm:$0xf0] }
 0x273   :  { %v900_v30 = vpop.f32.mrf.mxu0  ;;  %v914_v31 = vpop.f32.mrf.mxu1 }
 0x274   :  { %v901_v37 = vadd.f32 %v900_v30, %v563_v33  ;;  %v4813_v30 = vld [vmem:[#allocation13 + $0x5c8] sm:$0xf] }
 0x276   :  { %v915_v48 = vadd.f32 %v914_v31, %v901_v37  ;;  %v5632_v31 = vld [vmem:[#allocation13 + $0x5e4] sm:$0xf0] }
 0x277   :  { %v4814_v37 = vor.u32 %v5632_v31, %v4813_v30  ;;  %v5492_v31 = vld [vmem:[#allocation13 + $0x18c] sm:$0xf] }
 0x278   :  { %v1003_v52 = vmax.f32 %v915_v48, 0.0 }
 0x27a   :  { %v928_v40 = vpop.f32.mrf.mxu2  ;;  %v942_v41 = vpop.f32.mrf.mxu3 }
 0x27b   :  { %v902_v46 = vpop.f32.mrf.mxu0  ;;  %v916_v47 = vpop.f32.mrf.mxu1  ;;  %v929_v43 = vadd.f32 %v928_v40, %v564_v45 }
 0x27c   :  { %v903_v49 = vadd.f32 %v902_v46, %v563_v33  ;;  %v4173_v33 = vld [vmem:[#allocation13 + $0xc8] sm:$0xf] }
 0x27d   :  { %v943_v60 = vadd.f32 %v942_v41, %v929_v43  ;;  %v4174_v44 = vor.u32 %v5472_v34, %v4173_v33  ;;  %v5624_v46 = vld [vmem:[#allocation13 + $0x5a4] sm:$0xf0] }
 0x27e   :  { %v917_v50 = vadd.f32 %v916_v47, %v903_v49  ;;  %v4141_v49 = vld [vmem:[#allocation13 + $0x88] sm:$0xf] }
 0x27f   :  { %v1004_v7 = vmax.f32 %v943_v60, 0.0  ;;  %v4429_v43 = vld [vmem:[#allocation13 + $0x2c8] sm:$0xf] }
 0x280   :  { %v1007_v53 = vmax.f32 %v917_v50, 0.0  ;;  %v5464_v50 = vld [vmem:[#allocation13 + $0xa4] sm:$0xf0] }
 0x281   :  { %v4142_v58 = vor.u32 %v5464_v50, %v4141_v49  ;;  %v5616_v60 = vld [vmem:[#allocation13 + $0x564] sm:$0xf0] }
 0x282   :  { %v6272_v55 = vpack.c.bf16 %v1007_v53, %v1003_v52  ;;  %v930_v56 = vpop.f32.mrf.mxu2  ;;  %v944_v57 = vpop.f32.mrf.mxu3  ;;  %v4750_v5 = vor.u32 %v5616_v60, %v4749_v59  ;;  %v4333_v33 = vld [vmem:[#allocation13 + $0x208] sm:$0xf]  ;;  %v4207_v59 = vld [vmem:[#allocation13 + $0x128] sm:$0xf0] }
 0x283   :  { %v931_v61 = vadd.f32 %v930_v56, %v564_v45  ;;  %v956_v62 = vpop.f32.mrf.mxu0  ;;  %v970_v63 = vpop.f32.mrf.mxu1  ;;  %v4781_v45 = vld [vmem:[#allocation13 + $0x588] sm:$0xf] }
 0x284   :  { %2577 = vmatmul.bf16.vlgmr.msrb.gmra.mxu0 %v6272_v55  ;;  %v957_v9 = vadd.f32 %v956_v62, %v565_v0  ;;  %v4782_v53 = vor.u32 %v5624_v46, %v4781_v45  ;;  %v5069_v56 = vld [vmem:[#allocation13 + $0x7c8] sm:$0xf] }
 0x285   :  { %v945_v1 = vadd.f32 %v944_v57, %v931_v61  ;;  %2681 = vmatpush.bf16.msrb.mxu0 %v4302_v54  ;;  %v5536_v54 = vld [vmem:[#allocation13 + $0x2e4] sm:$0xf0] }
 0x286   :  { %v971_v21 = vadd.f32 %v970_v63, %v957_v9  ;;  %v5696_v57 = vld [vmem:[#allocation13 + $0x7e4] sm:$0xf0] }
 0x287   :  { %v1008_v8 = vmax.f32 %v945_v1, 0.0  ;;  %v4109_v63 = vld [vmem:[#allocation13 + $0x48] sm:$0xf]  ;;  %v4430_v1 = vor.u32 %v5536_v54, %v4429_v43  ;;  %v5556_v43 = vld [vmem:[#allocation13 + $0x38c] sm:$0xf] }
 0x288   :  { %v1005_v35 = vmax.f32 %v971_v21, 0.0  ;;  %v5520_v21 = vld [vmem:[#allocation13 + $0x264] sm:$0xf0] }
 0x289   :  { %v6276_v11 = vpack.c.bf16 %v1008_v8, %v1004_v7  ;;  %2682 = vmatpush.bf16.msrb.mxu0 %v4270_v2  ;;  %v5070_v2 = vor.u32 %v5696_v57, %v5069_v56  ;;  %v5037_v7 = vld [vmem:[#allocation13 + $0x788] sm:$0xf] }
 0x28a   :  { %v984_v15 = vpop.f32.mrf.mxu2  ;;  %v998_v16 = vpop.f32.mrf.mxu3  ;;  %v5688_v8 = vld [vmem:[#allocation13 + $0x7a4] sm:$0xf0] }
 0x28b   :  { %2591 = vmatmul.bf16.vlgmr.msrb.gmra.mxu1 %v6276_v11  ;;  %v958_v20 = vpop.f32.mrf.mxu0  ;;  %v972_v24 = vpop.f32.mrf.mxu1  ;;  %v985_v32 = vadd.f32 %v984_v15, %v566_v19  ;;  %v4398_v15 = vor.u32 %v5528_v6, %v4397_v3  ;;  %v5512_v34 = vld [vmem:[#allocation13 + $0x224] sm:$0xf0]  ;;  %v5468_v6 = vld [vmem:[#allocation13 + $0xcc] sm:$0xf] }
 0x28c   :  { %2695 = vmatpush.bf16.msrb.mxu1 %v4558_v10  ;;  %v959_v22 = vadd.f32 %v958_v20, %v565_v0  ;;  %v5456_v0 = vld [vmem:[#allocation13 + $0x64] sm:$0xf0]  ;;  %v4334_v45 = vor.u32 %v5512_v34, %v4333_v33 }
 0x28d   :  { %2683 = vmatpush.bf16.msrb.mxu0 %v4238_v12  ;;  %v999_v47 = vadd.f32 %v998_v16, %v985_v32  ;;  %v4110_v9 = vor.u32 %v5456_v0, %v4109_v63  ;;  %v4717_v10 = vld [vmem:[#allocation13 + $0x508] sm:$0xf]  ;;  %v5038_v16 = vor.u32 %v5688_v8, %v5037_v7  ;;  %v4271_v32 = vld [vmem:[#allocation13 + $0x1a8] sm:$0xf0] }
 0x28e   :  { %v973_v29 = vadd.f32 %v972_v24, %v959_v22  ;;  %v5608_v12 = vld [vmem:[#allocation13 + $0x524] sm:$0xf0]  ;;  %v4078_v24 = vor.u32 %v5448_v14, %v4077_v13  ;;  %v4274_v39 = vor.u32 %v5492_v31, %v4271_v32  ;;  %v5548_v0 = vld [vmem:[#allocation13 + $0x34c] sm:$0xf] }
 0x28f   :  { %v1006_v61 = vmax.f32 %v999_v47, 0.0  ;;  %v4718_v20 = vor.u32 %v5608_v12, %v4717_v10  ;;  %v5005_v22 = vld [vmem:[#allocation13 + $0x748] sm:$0xf]  ;;  %v5484_v47 = vld [vmem:[#allocation13 + $0x14c] sm:$0xf] }
 0x290   :  { %v1009_v26 = vmax.f32 %v973_v29, 0.0  ;;  %2696 = vmatpush.bf16.msrb.mxu1 %v4526_v23  ;;  %v5680_v23 = vld [vmem:[#allocation13 + $0x764] sm:$0xf0]  ;;  %v4175_v8 = vld [vmem:[#allocation13 + $0xe8] sm:$0xf0] }
 0x291   :  { %2684 = vmatpush.bf16.msrb.mxu0 %v4206_v25  ;;  %v4306_v25 = vor.u32 %v5500_v17, %v4303_v18  ;;  %v5006_v30 = vor.u32 %v5680_v23, %v5005_v22  ;;  %v4941_v50 = vld [vmem:[#allocation13 + $0x6c8] sm:$0xf]  ;;  %v4815_v10 = vld [vmem:[#allocation13 + $0x5e8] sm:$0xf0]  ;;  %v4178_v18 = vor.u32 %v5468_v6, %v4175_v8  ;;  %v5497_v6 = vld [vmem:[#allocation13 + $0x1ac] sm:$0xf0] }
 0x292   :  { %v6280_v40 = vpack.c.bf16 %v1009_v26, %v1005_v35  ;;  %v986_v41 = vpop.f32.mrf.mxu2  ;;  %v1000_v42 = vpop.f32.mrf.mxu3  ;;  %v4973_v35 = vld [vmem:[#allocation13 + $0x708] sm:$0xf]  ;;  %v4463_v17 = vld [vmem:[#allocation13 + $0x328] sm:$0xf0] }
 0x293   :  { %v987_v48 = vadd.f32 %v986_v41, %v566_v19  ;;  %v4365_v19 = vld [vmem:[#allocation13 + $0x248] sm:$0xf]  ;;  %v4143_v22 = vld [vmem:[#allocation13 + $0xa8] sm:$0xf0] }
 0x294   :  { %2697 = vmatpush.bf16.msrb.mxu1 %v4494_v36  ;;  %2605 = vmatmul.bf16.vlgmr.msrb.gmra.mxu2 %v6280_v40  ;;  %v4366_v29 = vor.u32 %v5520_v21, %v4365_v19  ;;  %v5672_v26 = vld [vmem:[#allocation13 + $0x724] sm:$0xf0]  ;;  %v4686_v36 = vor.u32 %v5600_v28, %v4685_v27  ;;  %v5620_v23 = vld [vmem:[#allocation13 + $0x58c] sm:$0xf] }
 0x295   :  { %v1001_v52 = vadd.f32 %v1000_v42, %v987_v48  ;;  %2633 = vmatmul.bf16.vlgmr.msra.gmra.mxu0 %v6272_v55  ;;  %2709 = vmatpush.bf16.msrb.mxu2 %v4814_v37  ;;  %v5564_v37 = vld [vmem:[#allocation13 + $0x3cc] sm:$0xf]  ;;  %v4653_v41 = vld [vmem:[#allocation13 + $0x488] sm:$0xf]  ;;  %v4974_v46 = vor.u32 %v5672_v26, %v4973_v35 }
 0x296   :  { %2685 = vmatpush.bf16.msrb.mxu0 %v4174_v44  ;;  %v5592_v44 = vld [vmem:[#allocation13 + $0x4a4] sm:$0xf0]  ;;  %v4239_v48 = vld [vmem:[#allocation13 + $0x168] sm:$0xf0]  ;;  %v4562_v49 = vor.u32 %v5564_v37, %v4559_v38 }
 0x297   :  { %v1010_v62 = vmax.f32 %v1001_v52, 0.0  ;;  %v5664_v42 = vld [vmem:[#allocation13 + $0x6e4] sm:$0xf0]  ;;  %v4527_v52 = vld [vmem:[#allocation13 + $0x3a8] sm:$0xf0] }
 0x298   :  { %2698 = vmatpush.bf16.msrb.mxu1 %v4462_v51  ;;  %v4654_v51 = vor.u32 %v5592_v44, %v4653_v41  ;;  %v4621_v54 = vld [vmem:[#allocation13 + $0x448] sm:$0xf]  ;;  %v4942_v57 = vor.u32 %v5664_v42, %v4941_v50  ;;  %v4530_v60 = vor.u32 %v5556_v43, %v4527_v52  ;;  %v5692_v31 = vld [vmem:[#allocation13 + $0x7cc] sm:$0xf] }
 0x299   :  { %v6284_v4 = vpack.c.bf16 %v1010_v62, %v1006_v61  ;;  %2710 = vmatpush.bf16.msrb.mxu2 %v4782_v53  ;;  %v4242_v53 = vor.u32 %v5484_v47, %v4239_v48  ;;  %v5584_v56 = vld [vmem:[#allocation13 + $0x464] sm:$0xf0]  ;;  %v5071_v32 = vld [vmem:[#allocation13 + $0x7e8] sm:$0xf0] }
 0x29a   :  { %2686 = vmatpush.bf16.msrb.mxu0 %v4142_v58  ;;  %v5476_v58 = vld [vmem:[#allocation13 + $0x10c] sm:$0xf]  ;;  %v4909_v61 = vld [vmem:[#allocation13 + $0x688] sm:$0xf]  ;;  %v4622_v63 = vor.u32 %v5584_v56, %v4621_v54  ;;  %v5074_v41 = vor.u32 %v5692_v31, %v5071_v32  ;;  %v4309_v54 = vld [vmem:[#allocation13 + $0x1d0] sm:$0xf] }
 0x29b   :  { %2619 = vmatmul.bf16.vlgmr.msrb.gmra.mxu3 %v6284_v4  ;;  %2647 = vmatmul.bf16.vlgmr.msra.gmra.mxu1 %v6276_v11  ;;  %v5656_v62 = vld [vmem:[#allocation13 + $0x6a4] sm:$0xf0]  ;;  %v5452_v35 = vld [vmem:[#allocation13 + $0x4c] sm:$0xf]  ;;  %v5505_v56 = vld [vmem:[#allocation13 + $0x1ec] sm:$0xf0] }
 0x29c   :  { %2699 = vmatpush.bf16.msrb.mxu1 %v4430_v1  ;;  %2723 = vmatpush.bf16.msrb.mxu3 %v5070_v2  ;;  %v4495_v1 = vld [vmem:[#allocation13 + $0x368] sm:$0xf0]  ;;  %v4210_v2 = vor.u32 %v5476_v58, %v4207_v59  ;;  %v4589_v3 = vld [vmem:[#allocation13 + $0x408] sm:$0xf]  ;;  %v4910_v7 = vor.u32 %v5656_v62, %v4909_v61 }
 0x29d   :  { %2711 = vmatpush.bf16.msrb.mxu2 %v4750_v5  ;;  %v5576_v5 = vld [vmem:[#allocation13 + $0x424] sm:$0xf0]  ;;  %v4498_v12 = vor.u32 %v5548_v0, %v4495_v1  ;;  %v5612_v37 = vld [vmem:[#allocation13 + $0x54c] sm:$0xf] }
 0x29e   :  { %2687 = vmatpush.bf16.msrb.mxu0 %v4110_v9  ;;  %v5628_v9 = vld [vmem:[#allocation13 + $0x5cc] sm:$0xf]  ;;  %v4877_v13 = vld [vmem:[#allocation13 + $0x648] sm:$0xf] }
 0x29f   :  { %v5648_v14 = vld [vmem:[#allocation13 + $0x664] sm:$0xf0]  ;;  %v4818_v19 = vor.u32 %v5628_v9, %v4815_v10  ;;  %v4751_v38 = vld [vmem:[#allocation13 + $0x568] sm:$0xf0] }
 0x2a0   :  { %2700 = vmatpush.bf16.msrb.mxu1 %v4398_v15  ;;  %2724 = vmatpush.bf16.msrb.mxu3 %v5038_v16  ;;  %v4590_v15 = vor.u32 %v5576_v5, %v4589_v3  ;;  %v5540_v16 = vld [vmem:[#allocation13 + $0x30c] sm:$0xf]  ;;  %v4878_v21 = vor.u32 %v5648_v14, %v4877_v13  ;;  %v4845_v27 = vld [vmem:[#allocation13 + $0x608] sm:$0xf]  ;;  %v4277_v5 = vld [vmem:[#allocation13 + $0x190] sm:$0xf] }
 0x2a1   :  { %2712 = vmatpush.bf16.msrb.mxu2 %v4718_v20  ;;  %v5460_v20 = vld [vmem:[#allocation13 + $0x8c] sm:$0xf]  ;;  %v5640_v28 = vld [vmem:[#allocation13 + $0x624] sm:$0xf0]  ;;  %v4565_v13 = vld [vmem:[#allocation13 + $0x3d0] sm:$0xf] }
 0x2a2   :  { %2688 = vmatpush.bf16.msrb.mxu0 %v4078_v24  ;;  %v4783_v24 = vld [vmem:[#allocation13 + $0x5a8] sm:$0xf0]  ;;  %v4146_v33 = vor.u32 %v5460_v20, %v4143_v22  ;;  %v4846_v26 = vor.u32 %v5640_v28, %v4845_v27  ;;  %v5569_v14 = vld [vmem:[#allocation13 + $0x3ec] sm:$0xf0] }
 0x2a3   :  { %v4786_v34 = vor.u32 %v5620_v23, %v4783_v24  ;;  %v5524_v44 = vld [vmem:[#allocation13 + $0x28c] sm:$0xf]  ;;  %v4245_v20 = vld [vmem:[#allocation13 + $0x150] sm:$0xf]  ;;  %v4566_v22 = vor.u32 %v5569_v14, %v4565_v13 }
 0x2a4   :  { %2701 = vmatpush.bf16.msrb.mxu1 %v4366_v29  ;;  %2725 = vmatpush.bf16.msrb.mxu3 %v5006_v30  ;;  %v5532_v29 = vld [vmem:[#allocation13 + $0x2cc] sm:$0xf]  ;;  %v4533_v27 = vld [vmem:[#allocation13 + $0x390] sm:$0xf] }
 0x2a5   :  { %2661 = vmatmul.bf16.vlgmr.msra.gmra.mxu2 %v6280_v40  ;;  %2689 = vmatmul.bf16.vlgmr.msrb.gmra.mxu0 %v6272_v55  ;;  %v4431_v30 = vld [vmem:[#allocation13 + $0x2e8] sm:$0xf0]  ;;  %v5561_v28 = vld [vmem:[#allocation13 + $0x3ac] sm:$0xf0] }
 0x2a6   :  { %2737 = vmatpush.bf16.msra.mxu0 %v4306_v25  ;;  %2713 = vmatpush.bf16.msrb.mxu2 %v4686_v36  ;;  %v4466_v25 = vor.u32 %v5540_v16, %v4463_v17  ;;  %v4111_v36 = vld [vmem:[#allocation13 + $0x68] sm:$0xf0] }
 0x2a7   :  { %v5039_v47 = vld [vmem:[#allocation13 + $0x7a8] sm:$0xf0]  ;;  %v4114_v48 = vor.u32 %v5452_v35, %v4111_v36  ;;  %v4534_v35 = vor.u32 %v5561_v28, %v4533_v27  ;;  %v5609_v27 = vld [vmem:[#allocation13 + $0x52c] sm:$0xf0] }
 0x2a8   :  { %2702 = vmatpush.bf16.msrb.mxu1 %v4334_v45  ;;  %2726 = vmatpush.bf16.msrb.mxu3 %v4974_v46  ;;  %v4399_v45 = vld [vmem:[#allocation13 + $0x2a8] sm:$0xf0] }
 0x2a9   :  { %v5684_v46 = vld [vmem:[#allocation13 + $0x78c] sm:$0xf]  ;;  %v4402_v52 = vor.u32 %v5524_v44, %v4399_v45 }
 0x2aa   :  { %2738 = vmatpush.bf16.msra.mxu0 %v4274_v39  ;;  %2714 = vmatpush.bf16.msrb.mxu2 %v4654_v51  ;;  %v4434_v39 = vor.u32 %v5532_v29, %v4431_v30  ;;  %v5444_v50 = vld [vmem:[#allocation13 + $0xc] sm:$0xf] }
 0x2ab   :  { %2675 = vmatmul.bf16.vlgmr.msra.gmra.mxu3 %v6284_v4  ;;  %2703 = vmatmul.bf16.vlgmr.msrb.gmra.mxu1 %v6276_v11  ;;  %v4079_v42 = vld [vmem:[#allocation13 + $0x28] sm:$0xf0] }
 0x2ac   :  { %2751 = vmatpush.bf16.msra.mxu1 %v4562_v49  ;;  %2727 = vmatpush.bf16.msrb.mxu3 %v4942_v57  ;;  %v4754_v49 = vor.u32 %v5612_v37, %v4751_v38  ;;  %v5604_v51 = vld [vmem:[#allocation13 + $0x50c] sm:$0xf]  ;;  %v4082_v61 = vor.u32 %v5444_v50, %v4079_v42  ;;  %v4501_v38 = vld [vmem:[#allocation13 + $0x350] sm:$0xf] }
 0x2ad   :  { %v4719_v43 = vld [vmem:[#allocation13 + $0x528] sm:$0xf0]  ;;  %v5633_v50 = vld [vmem:[#allocation13 + $0x5ec] sm:$0xf0] }
 0x2ae   :  { %2739 = vmatpush.bf16.msra.mxu0 %v4242_v53  ;;  %2715 = vmatpush.bf16.msrb.mxu2 %v4622_v63  ;;  %v5042_v53 = vor.u32 %v5684_v46, %v5039_v47  ;;  %v5516_v57 = vld [vmem:[#allocation13 + $0x24c] sm:$0xf]  ;;  %v4722_v62 = vor.u32 %v5604_v51, %v4719_v43  ;;  %v4310_v63 = vor.u32 %v5505_v56, %v4309_v54  ;;  %v4181_v46 = vld [vmem:[#allocation13 + $0xd0] sm:$0xf] }
 0x2af   :  { %v4367_v58 = vld [vmem:[#allocation13 + $0x268] sm:$0xf0]  ;;  %v5545_v54 = vld [vmem:[#allocation13 + $0x32c] sm:$0xf0] }
 0x2b0   :  { %2752 = vmatpush.bf16.msra.mxu1 %v4530_v60  ;;  %2728 = vmatpush.bf16.msrb.mxu3 %v4910_v7  ;;  %v5676_v59 = vld [vmem:[#allocation13 + $0x74c] sm:$0xf] }
 0x2b1   :  { %v5007_v60 = vld [vmem:[#allocation13 + $0x768] sm:$0xf0] }
 0x2b2   :  { %2740 = vmatpush.bf16.msra.mxu0 %v4210_v2  ;;  %2716 = vmatpush.bf16.msrb.mxu2 %v4590_v15  ;;  %v5596_v0 = vld [vmem:[#allocation13 + $0x4cc] sm:$0xf]  ;;  %v4370_v2 = vor.u32 %v5516_v57, %v4367_v58  ;;  %v5010_v3 = vor.u32 %v5676_v59, %v5007_v60  ;;  %v4278_v15 = vor.u32 %v5497_v6, %v4277_v5  ;;  %v4149_v58 = vld [vmem:[#allocation13 + $0x90] sm:$0xf] }
 0x2b3   :  { %v4687_v1 = vld [vmem:[#allocation13 + $0x4e8] sm:$0xf0]  ;;  %v5465_v60 = vld [vmem:[#allocation13 + $0xac] sm:$0xf0] }
 0x2b4   :  { %2753 = vmatpush.bf16.msra.mxu1 %v4498_v12  ;;  %2729 = vmatpush.bf16.msrb.mxu3 %v4878_v21  ;;  %v5508_v7 = vld [vmem:[#allocation13 + $0x20c] sm:$0xf]  ;;  %v4690_v12 = vor.u32 %v5596_v0, %v4687_v1  ;;  %v5489_v21 = vld [vmem:[#allocation13 + $0x16c] sm:$0xf0] }
 0x2b5   :  { %2717 = vmatmul.bf16.vlgmr.msrb.gmra.mxu2 %v6280_v40  ;;  %v4335_v8 = vld [vmem:[#allocation13 + $0x228] sm:$0xf0]  ;;  %v4246_v29 = vor.u32 %v5489_v21, %v4245_v20  ;;  %v5077_v5 = vld [vmem:[#allocation13 + $0x7d0] sm:$0xf] }
 0x2b6   :  { %2741 = vmatpush.bf16.msra.mxu0 %v4178_v18  ;;  %2765 = vmatpush.bf16.msra.mxu2 %v4818_v19  ;;  %v5668_v9 = vld [vmem:[#allocation13 + $0x70c] sm:$0xf]  ;;  %v4338_v18 = vor.u32 %v5508_v7, %v4335_v8  ;;  %v5697_v6 = vld [vmem:[#allocation13 + $0x7ec] sm:$0xf0]  ;;  %v4150_v7 = vor.u32 %v5465_v60, %v4149_v58  ;;  %v5485_v58 = vld [vmem:[#allocation13 + $0x154] sm:$0xf] }
 0x2b7   :  { %v4975_v10 = vld [vmem:[#allocation13 + $0x728] sm:$0xf0]  ;;  %v5078_v14 = vor.u32 %v5697_v6, %v5077_v5  ;;  %v5689_v20 = vld [vmem:[#allocation13 + $0x7ac] sm:$0xf0]  ;;  %v4247_v60 = vld [vmem:[#allocation13 + $0x170] sm:$0xf0] }
 0x2b8   :  { %2754 = vmatpush.bf16.msra.mxu1 %v4466_v25  ;;  %2730 = vmatpush.bf16.msrb.mxu3 %v4846_v26  ;;  %v5588_v16 = vld [vmem:[#allocation13 + $0x48c] sm:$0xf]  ;;  %v4978_v19 = vor.u32 %v5668_v9, %v4975_v10  ;;  %v4117_v10 = vld [vmem:[#allocation13 + $0x50] sm:$0xf] }
 0x2b9   :  { %v4655_v17 = vld [vmem:[#allocation13 + $0x4a8] sm:$0xf0]  ;;  %v4629_v5 = vld [vmem:[#allocation13 + $0x450] sm:$0xf] }
 0x2ba   :  { %2742 = vmatpush.bf16.msra.mxu0 %v4146_v33  ;;  %2766 = vmatpush.bf16.msra.mxu2 %v4786_v34  ;;  %v5660_v23 = vld [vmem:[#allocation13 + $0x6cc] sm:$0xf]  ;;  %v4658_v25 = vor.u32 %v5588_v16, %v4655_v17  ;;  %v4213_v33 = vld [vmem:[#allocation13 + $0x110] sm:$0xf] }
 0x2bb   :  { %2731 = vmatmul.bf16.vlgmr.msrb.gmra.mxu3 %v6284_v4  ;;  %v4943_v24 = vld [vmem:[#allocation13 + $0x6e8] sm:$0xf0]  ;;  %v5481_v34 = vld [vmem:[#allocation13 + $0x12c] sm:$0xf0] }
 0x2bc   :  { %2755 = vmatpush.bf16.msra.mxu1 %v4434_v39  ;;  %2779 = vmatpush.bf16.msra.mxu3 %v5074_v41  ;;  %v5580_v30 = vld [vmem:[#allocation13 + $0x44c] sm:$0xf]  ;;  %v4946_v32 = vor.u32 %v5660_v23, %v4943_v24  ;;  %v5553_v39 = vld [vmem:[#allocation13 + $0x36c] sm:$0xf0]  ;;  %v4214_v41 = vor.u32 %v5481_v34, %v4213_v33 }
 0x2bd   :  { %v4623_v31 = vld [vmem:[#allocation13 + $0x468] sm:$0xf0]  ;;  %v4502_v42 = vor.u32 %v5553_v39, %v4501_v38  ;;  %v5617_v16 = vld [vmem:[#allocation13 + $0x56c] sm:$0xf0] }
 0x2be   :  { %2743 = vmatpush.bf16.msra.mxu0 %v4114_v48  ;;  %2767 = vmatpush.bf16.msra.mxu2 %v4754_v49  ;;  %v5652_v26 = vld [vmem:[#allocation13 + $0x68c] sm:$0xf]  ;;  %v4626_v37 = vor.u32 %v5580_v30, %v4623_v31  ;;  %v5473_v48 = vld [vmem:[#allocation13 + $0xec] sm:$0xf0]  ;;  %v5501_v30 = vld [vmem:[#allocation13 + $0x1d4] sm:$0xf] }
 0x2bf   :  { %v4911_v36 = vld [vmem:[#allocation13 + $0x6a8] sm:$0xf0]  ;;  %v4821_v49 = vld [vmem:[#allocation13 + $0x5d0] sm:$0xf]  ;;  %v4182_v56 = vor.u32 %v5473_v48, %v4181_v46  ;;  %v4311_v31 = vld [vmem:[#allocation13 + $0x1f0] sm:$0xf0] }
 0x2c0   :  { %2756 = vmatpush.bf16.msra.mxu1 %v4402_v52  ;;  %2780 = vmatpush.bf16.msra.mxu3 %v5042_v53  ;;  %v5572_v44 = vld [vmem:[#allocation13 + $0x40c] sm:$0xf]  ;;  %v4914_v47 = vor.u32 %v5652_v26, %v4911_v36  ;;  %v4469_v53 = vld [vmem:[#allocation13 + $0x310] sm:$0xf]  ;;  %v4822_v57 = vor.u32 %v5633_v50, %v4821_v49  ;;  %v4279_v46 = vld [vmem:[#allocation13 + $0x1b0] sm:$0xf0] }
 0x2c1   :  { %v4591_v45 = vld [vmem:[#allocation13 + $0x428] sm:$0xf0]  ;;  %v4405_v17 = vld [vmem:[#allocation13 + $0x290] sm:$0xf] }
 0x2c2   :  { %2744 = vmatpush.bf16.msra.mxu0 %v4082_v61  ;;  %2768 = vmatpush.bf16.msra.mxu2 %v4722_v62  ;;  %v5644_v51 = vld [vmem:[#allocation13 + $0x64c] sm:$0xf]  ;;  %v4594_v52 = vor.u32 %v5572_v44, %v4591_v45  ;;  %v4789_v61 = vld [vmem:[#allocation13 + $0x590] sm:$0xf]  ;;  %v5493_v45 = vld [vmem:[#allocation13 + $0x194] sm:$0xf] }
 0x2c3   :  { %v4879_v43 = vld [vmem:[#allocation13 + $0x668] sm:$0xf0]  ;;  %v5625_v62 = vld [vmem:[#allocation13 + $0x5ac] sm:$0xf0] }
 0x2c4   :  { %2757 = vmatpush.bf16.msra.mxu1 %v4370_v2  ;;  %2781 = vmatpush.bf16.msra.mxu3 %v5010_v3  ;;  %v4882_v59 = vor.u32 %v5644_v51, %v4879_v43  ;;  %v5636_v0 = vld [vmem:[#allocation13 + $0x60c] sm:$0xf]  ;;  %v4437_v2 = vld [vmem:[#allocation13 + $0x2d0] sm:$0xf]  ;;  %v4790_v8 = vor.u32 %v5625_v62, %v4789_v61  ;;  %v4567_v51 = vld [vmem:[#allocation13 + $0x3f0] sm:$0xf0] }
 0x2c5   :  { %2745 = vmatmul.bf16.vlgmr.msra.gmra.mxu0 %v6272_v55  ;;  %v4847_v1 = vld [vmem:[#allocation13 + $0x628] sm:$0xf0]  ;;  %v5537_v3 = vld [vmem:[#allocation13 + $0x2ec] sm:$0xf0] }
 0x2c6   :  { %2793 = vmatpush.bf16.msrb.mxu0 %v4310_v63  ;;  %2769 = vmatpush.bf16.msra.mxu2 %v4690_v12  ;;  %v4470_v63 = vor.u32 %v5545_v54, %v4469_v53  ;;  %v4850_v9 = vor.u32 %v5636_v0, %v4847_v1  ;;  %v5457_v12 = vld [vmem:[#allocation13 + $0x6c] sm:$0xf0]  ;;  %v4438_v13 = vor.u32 %v5537_v3, %v4437_v2  ;;  %v4535_v0 = vld [vmem:[#allocation13 + $0x3b0] sm:$0xf0] }
 0x2c7   :  { %v4118_v21 = vor.u32 %v5457_v12, %v4117_v10  ;;  %v5449_v24 = vld [vmem:[#allocation13 + $0x2c] sm:$0xf0]  ;;  %v4250_v2 = vor.u32 %v5485_v58, %v4247_v60  ;;  %v5047_v58 = vld [vmem:[#allocation13 + $0x7b0] sm:$0xf0] }
 0x2c8   :  { %2758 = vmatpush.bf16.msra.mxu1 %v4338_v18  ;;  %2782 = vmatpush.bf16.msra.mxu3 %v4978_v19  ;;  %v5529_v18 = vld [vmem:[#allocation13 + $0x2ac] sm:$0xf0]  ;;  %v5445_v60 = vld [vmem:[#allocation13 + $0x14] sm:$0xf] }
 0x2c9   :  { %v5045_v19 = vld [vmem:[#allocation13 + $0x790] sm:$0xf]  ;;  %v4406_v28 = vor.u32 %v5529_v18, %v4405_v17 }
 0x2ca   :  { %2794 = vmatpush.bf16.msrb.mxu0 %v4278_v15  ;;  %2770 = vmatpush.bf16.msra.mxu2 %v4658_v25  ;;  %v4757_v15 = vld [vmem:[#allocation13 + $0x550] sm:$0xf] }
 0x2cb   :  { %2759 = vmatmul.bf16.vlgmr.msra.gmra.mxu1 %v6276_v11  ;;  %v4758_v23 = vor.u32 %v5617_v16, %v4757_v15  ;;  %v4725_v25 = vld [vmem:[#allocation13 + $0x510] sm:$0xf] }
 0x2cc   :  { %2807 = vmatpush.bf16.msrb.mxu1 %v4566_v22  ;;  %2783 = vmatpush.bf16.msra.mxu3 %v4946_v32  ;;  %v4085_v22 = vld [vmem:[#allocation13 + $0x10] sm:$0xf]  ;;  %v4726_v36 = vor.u32 %v5609_v27, %v4725_v25 }
 0x2cd   :  { %v4373_v32 = vld [vmem:[#allocation13 + $0x250] sm:$0xf]  ;;  %v4086_v26 = vor.u32 %v5449_v24, %v4085_v22  ;;  %v4823_v24 = vld [vmem:[#allocation13 + $0x5f0] sm:$0xf0] }
 0x2ce   :  { %2795 = vmatpush.bf16.msrb.mxu0 %v4246_v29  ;;  %2771 = vmatpush.bf16.msra.mxu2 %v4626_v37  ;;  %v5046_v29 = vor.u32 %v5689_v20, %v5045_v19  ;;  %v5521_v33 = vld [vmem:[#allocation13 + $0x26c] sm:$0xf0]  ;;  %v4314_v37 = vor.u32 %v5501_v30, %v4311_v31  ;;  %v5469_v20 = vld [vmem:[#allocation13 + $0xd4] sm:$0xf] }
 0x2cf   :  { %v5013_v34 = vld [vmem:[#allocation13 + $0x750] sm:$0xf] }
 0x2d0   :  { %2808 = vmatpush.bf16.msrb.mxu1 %v4534_v35  ;;  %2784 = vmatpush.bf16.msra.mxu3 %v4914_v47  ;;  %v5681_v35 = vld [vmem:[#allocation13 + $0x76c] sm:$0xf0] }
 0x2d1   :  { %v4693_v38 = vld [vmem:[#allocation13 + $0x4d0] sm:$0xf]  ;;  %v5014_v44 = vor.u32 %v5681_v35, %v5013_v34  ;;  %v4151_v34 = vld [vmem:[#allocation13 + $0xb0] sm:$0xf0] }
 0x2d2   :  { %2796 = vmatpush.bf16.msrb.mxu0 %v4214_v41  ;;  %2772 = vmatpush.bf16.msra.mxu2 %v4594_v52  ;;  %v5601_v39 = vld [vmem:[#allocation13 + $0x4ec] sm:$0xf0]  ;;  %v4374_v41 = vor.u32 %v5521_v33, %v4373_v32  ;;  %v4282_v52 = vor.u32 %v5493_v45, %v4279_v46  ;;  %v5461_v33 = vld [vmem:[#allocation13 + $0x94] sm:$0xf] }
 0x2d3   :  { %v4341_v47 = vld [vmem:[#allocation13 + $0x210] sm:$0xf]  ;;  %v4694_v43 = vor.u32 %v5601_v39, %v4693_v38  ;;  %v5693_v45 = vld [vmem:[#allocation13 + $0x7d4] sm:$0xf] }
 0x2d4   :  { %2809 = vmatpush.bf16.msrb.mxu1 %v4502_v42  ;;  %2785 = vmatpush.bf16.msra.mxu3 %v4882_v59  ;;  %v5513_v48 = vld [vmem:[#allocation13 + $0x22c] sm:$0xf0]  ;;  %v5565_v42 = vld [vmem:[#allocation13 + $0x3d4] sm:$0xf] }
 0x2d5   :  { %2773 = vmatmul.bf16.vlgmr.msra.gmra.mxu2 %v6280_v40  ;;  %v4981_v49 = vld [vmem:[#allocation13 + $0x710] sm:$0xf]  ;;  %v4342_v53 = vor.u32 %v5513_v48, %v4341_v47  ;;  %v4570_v59 = vor.u32 %v5565_v42, %v4567_v51  ;;  %v5079_v46 = vld [vmem:[#allocation13 + $0x7f0] sm:$0xf0]  ;;  %v4154_v47 = vor.u32 %v5461_v33, %v4151_v34  ;;  %v4253_v33 = vld [vmem:[#allocation13 + $0x158] sm:$0xf] }
 0x2d6   :  { %2797 = vmatpush.bf16.msrb.mxu0 %v4182_v56  ;;  %2821 = vmatpush.bf16.msrb.mxu2 %v4822_v57  ;;  %v5673_v50 = vld [vmem:[#allocation13 + $0x72c] sm:$0xf0]  ;;  %v5453_v42 = vld [vmem:[#allocation13 + $0x54] sm:$0xf] }
 0x2d7   :  { %v4982_v54 = vor.u32 %v5673_v50, %v4981_v49  ;;  %v4661_v56 = vld [vmem:[#allocation13 + $0x490] sm:$0xf]  ;;  %v4119_v51 = vld [vmem:[#allocation13 + $0x70] sm:$0xf0] }
 0x2d8   :  { %2810 = vmatpush.bf16.msrb.mxu1 %v4470_v63  ;;  %2786 = vmatpush.bf16.msra.mxu3 %v4850_v9  ;;  %v5593_v57 = vld [vmem:[#allocation13 + $0x4ac] sm:$0xf0]  ;;  %v5557_v63 = vld [vmem:[#allocation13 + $0x394] sm:$0xf] }
 0x2d9   :  { %v4949_v61 = vld [vmem:[#allocation13 + $0x6d0] sm:$0xf]  ;;  %v4662_v1 = vor.u32 %v5593_v57, %v4661_v56  ;;  %v4215_v9 = vld [vmem:[#allocation13 + $0x130] sm:$0xf0] }
 0x2da   :  { %2798 = vmatpush.bf16.msrb.mxu0 %v4150_v7  ;;  %2822 = vmatpush.bf16.msrb.mxu2 %v4790_v8  ;;  %v5665_v62 = vld [vmem:[#allocation13 + $0x6ec] sm:$0xf0]  ;;  %v5477_v7 = vld [vmem:[#allocation13 + $0x114] sm:$0xf]  ;;  %v4538_v8 = vor.u32 %v5557_v63, %v4535_v0 }
 0x2db   :  { %2787 = vmatmul.bf16.vlgmr.msra.gmra.mxu3 %v6284_v4  ;;  %v4950_v3 = vor.u32 %v5665_v62, %v4949_v61  ;;  %v5585_v6 = vld [vmem:[#allocation13 + $0x46c] sm:$0xf0]  ;;  %v4218_v17 = vor.u32 %v5477_v7, %v4215_v9  ;;  %v4407_v56 = vld [vmem:[#allocation13 + $0x2b0] sm:$0xf0] }
 0x2dc   :  { %2811 = vmatpush.bf16.msrb.mxu1 %v4438_v13  ;;  %2835 = vmatpush.bf16.msrb.mxu3 %v5078_v14  ;;  %v4917_v10 = vld [vmem:[#allocation13 + $0x690] sm:$0xf]  ;;  %v5549_v13 = vld [vmem:[#allocation13 + $0x354] sm:$0xf]  ;;  %v4630_v15 = vor.u32 %v5585_v6, %v4629_v5  ;;  %v5506_v5 = vld [vmem:[#allocation13 + $0x1f4] sm:$0xf0] }
 0x2dd   :  { %v5657_v12 = vld [vmem:[#allocation13 + $0x6ac] sm:$0xf0]  ;;  %v4503_v14 = vld [vmem:[#allocation13 + $0x370] sm:$0xf0] }
 0x2de   :  { %2799 = vmatpush.bf16.msrb.mxu0 %v4118_v21  ;;  %2823 = vmatpush.bf16.msrb.mxu2 %v4758_v23  ;;  %v4597_v16 = vld [vmem:[#allocation13 + $0x410] sm:$0xf]  ;;  %v4918_v18 = vor.u32 %v5657_v12, %v4917_v10  ;;  %v4183_v21 = vld [vmem:[#allocation13 + $0xf0] sm:$0xf0]  ;;  %v4506_v22 = vor.u32 %v5549_v13, %v4503_v14 }
 0x2df   :  { %v5577_v19 = vld [vmem:[#allocation13 + $0x42c] sm:$0xf0]  ;;  %v5629_v23 = vld [vmem:[#allocation13 + $0x5d4] sm:$0xf]  ;;  %v4186_v31 = vor.u32 %v5469_v20, %v4183_v21 }
 0x2e0   :  { %2812 = vmatpush.bf16.msrb.mxu1 %v4406_v28  ;;  %2836 = vmatpush.bf16.msrb.mxu3 %v5046_v29  ;;  %v4885_v25 = vld [vmem:[#allocation13 + $0x650] sm:$0xf]  ;;  %v5541_v28 = vld [vmem:[#allocation13 + $0x314] sm:$0xf]  ;;  %v4598_v30 = vor.u32 %v5577_v19, %v4597_v16  ;;  %v4826_v32 = vor.u32 %v5629_v23, %v4823_v24  ;;  %v5498_v19 = vld [vmem:[#allocation13 + $0x1b4] sm:$0xf0] }
 0x2e1   :  { %v5649_v27 = vld [vmem:[#allocation13 + $0x66c] sm:$0xf0]  ;;  %v4471_v29 = vld [vmem:[#allocation13 + $0x330] sm:$0xf0]  ;;  %v4573_v24 = vld [vmem:[#allocation13 + $0x3d8] sm:$0xf] }
 0x2e2   :  { %2800 = vmatpush.bf16.msrb.mxu0 %v4086_v26  ;;  %2824 = vmatpush.bf16.msrb.mxu2 %v4726_v36  ;;  %v4886_v35 = vor.u32 %v5649_v27, %v4885_v25  ;;  %v4474_v26 = vor.u32 %v5541_v28, %v4471_v29  ;;  %v5621_v36 = vld [vmem:[#allocation13 + $0x594] sm:$0xf]  ;;  %v4853_v38 = vld [vmem:[#allocation13 + $0x610] sm:$0xf]  ;;  %v5570_v25 = vld [vmem:[#allocation13 + $0x3f4] sm:$0xf0] }
 0x2e3   :  { %v5641_v39 = vld [vmem:[#allocation13 + $0x62c] sm:$0xf0]  ;;  %v5685_v57 = vld [vmem:[#allocation13 + $0x794] sm:$0xf]  ;;  %v4574_v34 = vor.u32 %v5570_v25, %v4573_v24  ;;  %v4125_v24 = vld [vmem:[#allocation13 + $0x58] sm:$0xf] }
 0x2e4   :  { %2813 = vmatpush.bf16.msrb.mxu1 %v4374_v41  ;;  %2837 = vmatpush.bf16.msrb.mxu3 %v5014_v44  ;;  %v5533_v41 = vld [vmem:[#allocation13 + $0x2d4] sm:$0xf]  ;;  %v4854_v49 = vor.u32 %v5641_v39, %v4853_v38  ;;  %v5562_v38 = vld [vmem:[#allocation13 + $0x3b4] sm:$0xf0] }
 0x2e5   :  { %2801 = vmatmul.bf16.vlgmr.msrb.gmra.mxu0 %v6272_v55  ;;  %v4439_v44 = vld [vmem:[#allocation13 + $0x2f0] sm:$0xf0]  ;;  %v5458_v25 = vld [vmem:[#allocation13 + $0x74] sm:$0xf0] }
 0x2e6   :  { %2849 = vmatpush.bf16.msra.mxu0 %v4314_v37  ;;  %2825 = vmatpush.bf16.msrb.mxu2 %v4694_v43  ;;  %v4791_v37 = vld [vmem:[#allocation13 + $0x5b0] sm:$0xf0]  ;;  %v4442_v50 = vor.u32 %v5533_v41, %v4439_v44 }
 0x2e7   :  { %v4794_v48 = vor.u32 %v5621_v36, %v4791_v37  ;;  %v5613_v43 = vld [vmem:[#allocation13 + $0x554] sm:$0xf]  ;;  %v4541_v37 = vld [vmem:[#allocation13 + $0x398] sm:$0xf] }
 0x2e8   :  { %2814 = vmatpush.bf16.msrb.mxu1 %v4342_v53  ;;  %2838 = vmatpush.bf16.msrb.mxu3 %v4982_v54  ;;  %v4759_v53 = vld [vmem:[#allocation13 + $0x570] sm:$0xf0] }
 0x2e9   :  { %v5525_v54 = vld [vmem:[#allocation13 + $0x294] sm:$0xf]  ;;  %v4762_v61 = vor.u32 %v5613_v43, %v4759_v53  ;;  %v5554_v43 = vld [vmem:[#allocation13 + $0x374] sm:$0xf0] }
 0x2ea   :  { %2850 = vmatpush.bf16.msra.mxu0 %v4282_v52  ;;  %2826 = vmatpush.bf16.msrb.mxu2 %v4662_v1  ;;  %v5082_v52 = vor.u32 %v5693_v45, %v5079_v46  ;;  %v4410_v62 = vor.u32 %v5525_v54, %v4407_v56  ;;  %v4087_v63 = vld [vmem:[#allocation13 + $0x30] sm:$0xf0] }
 0x2eb   :  { %2815 = vmatmul.bf16.vlgmr.msrb.gmra.mxu1 %v6276_v11  ;;  %v5605_v0 = vld [vmem:[#allocation13 + $0x514] sm:$0xf]  ;;  %v4090_v10 = vor.u32 %v5445_v60, %v4087_v63 }
 0x2ec   :  { %2863 = vmatpush.bf16.msra.mxu1 %v4570_v59  ;;  %2839 = vmatpush.bf16.msrb.mxu3 %v4950_v3  ;;  %v4122_v59 = vor.u32 %v5453_v42, %v4119_v51  ;;  %v4727_v1 = vld [vmem:[#allocation13 + $0x530] sm:$0xf0]  ;;  %v4317_v3 = vld [vmem:[#allocation13 + $0x1d8] sm:$0xf] }
 0x2ed   :  { %v5517_v6 = vld [vmem:[#allocation13 + $0x254] sm:$0xf]  ;;  %v4730_v12 = vor.u32 %v5605_v0, %v4727_v1  ;;  %v4318_v13 = vor.u32 %v5506_v5, %v4317_v3  ;;  %v4509_v51 = vld [vmem:[#allocation13 + $0x358] sm:$0xf] }
 0x2ee   :  { %2851 = vmatpush.bf16.msra.mxu0 %v4250_v2  ;;  %2827 = vmatpush.bf16.msrb.mxu2 %v4630_v15  ;;  %v5050_v2 = vor.u32 %v5685_v57, %v5047_v58  ;;  %v4375_v7 = vld [vmem:[#allocation13 + $0x270] sm:$0xf0]  ;;  %v4189_v58 = vld [vmem:[#allocation13 + $0xd8] sm:$0xf]  ;;  %v4510_v60 = vor.u32 %v5554_v43, %v4509_v51 }
 0x2ef   :  { %v5015_v9 = vld [vmem:[#allocation13 + $0x770] sm:$0xf0]  ;;  %v4378_v16 = vor.u32 %v5517_v6, %v4375_v7  ;;  %v4477_v1 = vld [vmem:[#allocation13 + $0x318] sm:$0xf] }
 0x2f0   :  { %2864 = vmatpush.bf16.msra.mxu1 %v4538_v8  ;;  %2840 = vmatpush.bf16.msrb.mxu3 %v4918_v18  ;;  %v5677_v8 = vld [vmem:[#allocation13 + $0x754] sm:$0xf]  ;;  %v4285_v18 = vld [vmem:[#allocation13 + $0x198] sm:$0xf] }
 0x2f1   :  { %v5597_v14 = vld [vmem:[#allocation13 + $0x4d4] sm:$0xf]  ;;  %v4286_v28 = vor.u32 %v5498_v19, %v4285_v18  ;;  %v4157_v7 = vld [vmem:[#allocation13 + $0x98] sm:$0xf] }
 0x2f2   :  { %2852 = vmatpush.bf16.msra.mxu0 %v4218_v17  ;;  %2828 = vmatpush.bf16.msrb.mxu2 %v4598_v30  ;;  %v4695_v15 = vld [vmem:[#allocation13 + $0x4f0] sm:$0xf0]  ;;  %v5018_v17 = vor.u32 %v5677_v8, %v5015_v9  ;;  %v5466_v8 = vld [vmem:[#allocation13 + $0xb4] sm:$0xf0] }
 0x2f3   :  { %v5509_v20 = vld [vmem:[#allocation13 + $0x214] sm:$0xf]  ;;  %v4698_v27 = vor.u32 %v5597_v14, %v4695_v15  ;;  %v5085_v18 = vld [vmem:[#allocation13 + $0x7d8] sm:$0xf] }
 0x2f4   :  { %2865 = vmatpush.bf16.msra.mxu1 %v4506_v22  ;;  %2841 = vmatpush.bf16.msrb.mxu3 %v4886_v35  ;;  %v4343_v21 = vld [vmem:[#allocation13 + $0x230] sm:$0xf0]  ;;  %v5490_v35 = vld [vmem:[#allocation13 + $0x174] sm:$0xf0] }
 0x2f5   :  { %2829 = vmatmul.bf16.vlgmr.msrb.gmra.mxu2 %v6280_v40  ;;  %v5669_v22 = vld [vmem:[#allocation13 + $0x714] sm:$0xf]  ;;  %v4346_v29 = vor.u32 %v5509_v20, %v4343_v21  ;;  %v4254_v41 = vor.u32 %v5490_v35, %v4253_v33  ;;  %v5698_v19 = vld [vmem:[#allocation13 + $0x7f4] sm:$0xf0]  ;;  %v4158_v20 = vor.u32 %v5466_v8, %v4157_v7 }
 0x2f6   :  { %2853 = vmatpush.bf16.msra.mxu0 %v4186_v31  ;;  %2877 = vmatpush.bf16.msra.mxu2 %v4826_v32  ;;  %v4983_v23 = vld [vmem:[#allocation13 + $0x730] sm:$0xf0]  ;;  %v5690_v33 = vld [vmem:[#allocation13 + $0x7b4] sm:$0xf0] }
 0x2f7   :  { %v4986_v30 = vor.u32 %v5669_v22, %v4983_v23  ;;  %v5589_v31 = vld [vmem:[#allocation13 + $0x494] sm:$0xf]  ;;  %v4093_v35 = vld [vmem:[#allocation13 + $0x18] sm:$0xf] }
 0x2f8   :  { %2866 = vmatpush.bf16.msra.mxu1 %v4474_v26  ;;  %2842 = vmatpush.bf16.msrb.mxu3 %v4854_v49  ;;  %v4663_v32 = vld [vmem:[#allocation13 + $0x4b0] sm:$0xf0]  ;;  %v5482_v49 = vld [vmem:[#allocation13 + $0x134] sm:$0xf0] }
 0x2f9   :  { %v5661_v26 = vld [vmem:[#allocation13 + $0x6d4] sm:$0xf]  ;;  %v4666_v39 = vor.u32 %v5589_v31, %v4663_v32  ;;  %v5530_v31 = vld [vmem:[#allocation13 + $0x2b4] sm:$0xf0] }
 0x2fa   :  { %2854 = vmatpush.bf16.msra.mxu0 %v4154_v47  ;;  %2878 = vmatpush.bf16.msra.mxu2 %v4794_v48  ;;  %v4951_v36 = vld [vmem:[#allocation13 + $0x6f0] sm:$0xf0]  ;;  %v4221_v47 = vld [vmem:[#allocation13 + $0x118] sm:$0xf]  ;;  %v4542_v48 = vor.u32 %v5562_v38, %v4541_v37 }
 0x2fb   :  { %2843 = vmatmul.bf16.vlgmr.msrb.gmra.mxu3 %v6284_v4  ;;  %v4954_v44 = vor.u32 %v5661_v26, %v4951_v36  ;;  %v5581_v45 = vld [vmem:[#allocation13 + $0x454] sm:$0xf]  ;;  %v4222_v54 = vor.u32 %v5482_v49, %v4221_v47  ;;  %v5053_v32 = vld [vmem:[#allocation13 + $0x798] sm:$0xf] }
 0x2fc   :  { %2867 = vmatpush.bf16.msra.mxu1 %v4442_v50  ;;  %2891 = vmatpush.bf16.msra.mxu3 %v5082_v52  ;;  %v4631_v46 = vld [vmem:[#allocation13 + $0x470] sm:$0xf0]  ;;  %v5450_v37 = vld [vmem:[#allocation13 + $0x34] sm:$0xf0] }
 0x2fd   :  { %v5653_v50 = vld [vmem:[#allocation13 + $0x694] sm:$0xf]  ;;  %v4634_v52 = vor.u32 %v5581_v45, %v4631_v46  ;;  %v4733_v38 = vld [vmem:[#allocation13 + $0x518] sm:$0xf]  ;;  %v4319_v45 = vld [vmem:[#allocation13 + $0x1f8] sm:$0xf0] }
 0x2fe   :  { %2855 = vmatpush.bf16.msra.mxu0 %v4122_v59  ;;  %2879 = vmatpush.bf16.msra.mxu2 %v4762_v61  ;;  %v4919_v42 = vld [vmem:[#allocation13 + $0x6b0] sm:$0xf0]  ;;  %v5474_v59 = vld [vmem:[#allocation13 + $0xf4] sm:$0xf0] }
 0x2ff   :  { %v5573_v53 = vld [vmem:[#allocation13 + $0x414] sm:$0xf]  ;;  %v4922_v56 = vor.u32 %v5653_v50, %v4919_v42  ;;  %v4829_v61 = vld [vmem:[#allocation13 + $0x5d8] sm:$0xf]  ;;  %v4190_v5 = vor.u32 %v5474_v59, %v4189_v58  ;;  %v4094_v50 = vor.u32 %v5450_v37, %v4093_v35  ;;  %v5470_v37 = vld [vmem:[#allocation13 + $0xdc] sm:$0xf] }
 0x300   :  { %2868 = vmatpush.bf16.msra.mxu1 %v4410_v62  ;;  %2892 = vmatpush.bf16.msra.mxu3 %v5050_v2  ;;  %v4599_v57 = vld [vmem:[#allocation13 + $0x430] sm:$0xf0]  ;;  %v5634_v62 = vld [vmem:[#allocation13 + $0x5f4] sm:$0xf0] }
 0x301   :  { %v5645_v63 = vld [vmem:[#allocation13 + $0x654] sm:$0xf]  ;;  %v5546_v2 = vld [vmem:[#allocation13 + $0x334] sm:$0xf0]  ;;  %v4602_v3 = vor.u32 %v5573_v53, %v4599_v57  ;;  %v4830_v6 = vor.u32 %v5634_v62, %v4829_v61  ;;  %v4287_v57 = vld [vmem:[#allocation13 + $0x1b8] sm:$0xf0]  ;;  %v6306_v59 = vpop.f32.mrf.mxu0 }
 0x302   :  { %2856 = vmatpush.bf16.msra.mxu0 %v4090_v10  ;;  %2880 = vmatpush.bf16.msra.mxu2 %v4730_v12  ;;  %v4887_v0 = vld [vmem:[#allocation13 + $0x670] sm:$0xf0]  ;;  %v4478_v10 = vor.u32 %v5546_v2, %v4477_v1  ;;  %v4797_v12 = vld [vmem:[#allocation13 + $0x598] sm:$0xf] }
 0x303   :  { %v4890_v9 = vor.u32 %v5645_v63, %v4887_v0  ;;  %v5637_v14 = vld [vmem:[#allocation13 + $0x614] sm:$0xf]  ;;  %v4381_v46 = vld [vmem:[#allocation13 + $0x258] sm:$0xf]  ;;  %v5566_v63 = vld [vmem:[#allocation13 + $0x3dc] sm:$0xf] }
 0x304   :  { %2869 = vmatpush.bf16.msra.mxu1 %v4378_v16  ;;  %2893 = vmatpush.bf16.msra.mxu3 %v5018_v17  ;;  %v4855_v15 = vld [vmem:[#allocation13 + $0x630] sm:$0xf0]  ;;  %v4445_v16 = vld [vmem:[#allocation13 + $0x2d8] sm:$0xf]  ;;  %v4575_v0 = vld [vmem:[#allocation13 + $0x3f8] sm:$0xf0] }
 0x305   :  { %2857 = vmatmul.bf16.vlgmr.msra.gmra.mxu0 %v6272_v55  ;;  %v5538_v17 = vld [vmem:[#allocation13 + $0x2f4] sm:$0xf0]  ;;  %v4858_v22 = vor.u32 %v5637_v14, %v4855_v15 }
 0x306   :  { %2905 = vmatpush.bf16.msrb.mxu0 %v4318_v13  ;;  %2881 = vmatpush.bf16.msra.mxu2 %v4698_v27  ;;  %v5626_v13 = vld [vmem:[#allocation13 + $0x5b4] sm:$0xf0]  ;;  %v4446_v23 = vor.u32 %v5538_v17, %v4445_v16  ;;  %v5558_v16 = vld [vmem:[#allocation13 + $0x39c] sm:$0xf] }
 0x307   :  { %v4798_v21 = vor.u32 %v5626_v13, %v4797_v12  ;;  %v4765_v27 = vld [vmem:[#allocation13 + $0x558] sm:$0xf]  ;;  %v4578_v12 = vor.u32 %v5566_v63, %v4575_v0  ;;  %v4255_v13 = vld [vmem:[#allocation13 + $0x178] sm:$0xf0] }
 0x308   :  { %2870 = vmatpush.bf16.msra.mxu1 %v4346_v29  ;;  %2894 = vmatpush.bf16.msra.mxu3 %v4986_v30  ;;  %v5618_v29 = vld [vmem:[#allocation13 + $0x574] sm:$0xf0]  ;;  %v6308_v1 = vpop.f32.mrf.mxu1  ;;  %v4543_v17 = vld [vmem:[#allocation13 + $0x3b8] sm:$0xf0] }
 0x309   :  { %v4413_v30 = vld [vmem:[#allocation13 + $0x298] sm:$0xf]  ;;  %v4766_v26 = vor.u32 %v5618_v29, %v4765_v27  ;;  %v5550_v29 = vld [vmem:[#allocation13 + $0x35c] sm:$0xf] }
 0x30a   :  { %2906 = vmatpush.bf16.msrb.mxu0 %v4286_v28  ;;  %2882 = vmatpush.bf16.msra.mxu2 %v4666_v39  ;;  %v5086_v28 = vor.u32 %v5698_v19, %v5085_v18  ;;  %v4414_v36 = vor.u32 %v5530_v31, %v4413_v30  ;;  %v5610_v39 = vld [vmem:[#allocation13 + $0x534] sm:$0xf0]  ;;  %v4511_v30 = vld [vmem:[#allocation13 + $0x378] sm:$0xf0]  ;;  %v6313_v31 = vpop.f32.mrf.mxu0 }
 0x30b   :  { %2871 = vmatmul.bf16.vlgmr.msra.gmra.mxu1 %v6276_v11  ;;  %v5522_v47 = vld [vmem:[#allocation13 + $0x274] sm:$0xf0]  ;;  %v4734_v42 = vor.u32 %v5610_v39, %v4733_v38  ;;  %v4191_v38 = vld [vmem:[#allocation13 + $0xf8] sm:$0xf0] }
 0x30c   :  { %2919 = vmatpush.bf16.msrb.mxu1 %v4574_v34  ;;  %2895 = vmatpush.bf16.msra.mxu3 %v4954_v44  ;;  %v4126_v34 = vor.u32 %v5458_v25, %v4125_v24  ;;  %v5502_v44 = vld [vmem:[#allocation13 + $0x1dc] sm:$0xf]  ;;  %v5682_v49 = vld [vmem:[#allocation13 + $0x774] sm:$0xf0]  ;;  %v4382_v53 = vor.u32 %v5522_v47, %v4381_v46  ;;  %v4546_v24 = vor.u32 %v5558_v16, %v4543_v17 }
 0x30d   :  { %v4322_v51 = vor.u32 %v5502_v44, %v4319_v45  ;;  %v4701_v43 = vld [vmem:[#allocation13 + $0x4d8] sm:$0xf]  ;;  %v4223_v25 = vld [vmem:[#allocation13 + $0x138] sm:$0xf0] }
 0x30e   :  { %2907 = vmatpush.bf16.msrb.mxu0 %v4254_v41  ;;  %2883 = vmatpush.bf16.msra.mxu2 %v4634_v52  ;;  %v5054_v41 = vor.u32 %v5690_v33, %v5053_v32  ;;  %v5602_v52 = vld [vmem:[#allocation13 + $0x4f4] sm:$0xf0]  ;;  %v5630_v44 = vld [vmem:[#allocation13 + $0x5dc] sm:$0xf] }
 0x30f   :  { %v4349_v58 = vld [vmem:[#allocation13 + $0x218] sm:$0xf]  ;;  %v4702_v2 = vor.u32 %v5602_v52, %v4701_v43  ;;  %v4831_v45 = vld [vmem:[#allocation13 + $0x5f8] sm:$0xf0] }
 0x310   :  { %2920 = vmatpush.bf16.msrb.mxu1 %v4542_v48  ;;  %2896 = vmatpush.bf16.msra.mxu3 %v4922_v56  ;;  %v5021_v48 = vld [vmem:[#allocation13 + $0x758] sm:$0xf]  ;;  %v5494_v56 = vld [vmem:[#allocation13 + $0x19c] sm:$0xf]  ;;  %v6318_v39 = vpop.f32.mrf.mxu1  ;;  %v4834_v43 = vor.u32 %v5630_v44, %v4831_v45 }
 0x311   :  { %v4989_v61 = vld [vmem:[#allocation13 + $0x718] sm:$0xf]  ;;  %v5462_v52 = vld [vmem:[#allocation13 + $0x9c] sm:$0xf] }
 0x312   :  { %2908 = vmatpush.bf16.msrb.mxu0 %v4222_v54  ;;  %2884 = vmatpush.bf16.msra.mxu2 %v4602_v3  ;;  %v5022_v54 = vor.u32 %v5682_v49, %v5021_v48  ;;  %v5674_v62 = vld [vmem:[#allocation13 + $0x734] sm:$0xf0]  ;;  %v4290_v3 = vor.u32 %v5494_v56, %v4287_v57  ;;  %v5542_v48 = vld [vmem:[#allocation13 + $0x31c] sm:$0xf] }
 0x313   :  { %v4669_v7 = vld [vmem:[#allocation13 + $0x498] sm:$0xf]  ;;  %v4479_v49 = vld [vmem:[#allocation13 + $0x338] sm:$0xf0] }
 0x314   :  { %2921 = vmatpush.bf16.msrb.mxu1 %v4510_v60  ;;  %2897 = vmatpush.bf16.msra.mxu3 %v4890_v9  ;;  %v5514_v60 = vld [vmem:[#allocation13 + $0x234] sm:$0xf0]  ;;  %v5486_v9 = vld [vmem:[#allocation13 + $0x15c] sm:$0xf]  ;;  %v4482_v56 = vor.u32 %v5542_v48, %v4479_v49 }
 0x315   :  { %2885 = vmatmul.bf16.vlgmr.msra.gmra.mxu2 %v6280_v40  ;;  %v5594_v8 = vld [vmem:[#allocation13 + $0x4b4] sm:$0xf0]  ;;  %v4258_v19 = vor.u32 %v5486_v9, %v4255_v13  ;;  %v5622_v57 = vld [vmem:[#allocation13 + $0x59c] sm:$0xf] }
 0x316   :  { %2909 = vmatpush.bf16.msrb.mxu0 %v4190_v5  ;;  %2933 = vmatpush.bf16.msrb.mxu2 %v4830_v6  ;;  %v4350_v5 = vor.u32 %v5514_v60, %v4349_v58  ;;  %v4990_v6 = vor.u32 %v5674_v62, %v4989_v61  ;;  %v4957_v14 = vld [vmem:[#allocation13 + $0x6d8] sm:$0xf]  ;;  %v4670_v18 = vor.u32 %v5594_v8, %v4669_v7  ;;  %v4799_v58 = vld [vmem:[#allocation13 + $0x5b8] sm:$0xf0] }
 0x317   :  { %v5666_v15 = vld [vmem:[#allocation13 + $0x6f4] sm:$0xf0]  ;;  %v5534_v62 = vld [vmem:[#allocation13 + $0x2dc] sm:$0xf] }
 0x318   :  { %2922 = vmatpush.bf16.msrb.mxu1 %v4478_v10  ;;  %2898 = vmatpush.bf16.msra.mxu3 %v4858_v22  ;;  %v6310_v10 = vpop.f32.mrf.mxu2  ;;  %v5586_v22 = vld [vmem:[#allocation13 + $0x474] sm:$0xf0]  ;;  %v4447_v63 = vld [vmem:[#allocation13 + $0x2f8] sm:$0xf0] }
 0x319   :  { %v4925_v27 = vld [vmem:[#allocation13 + $0x698] sm:$0xf]  ;;  %v5694_v0 = vld [vmem:[#allocation13 + $0x7dc] sm:$0xf]  ;;  %v4450_v9 = vor.u32 %v5534_v62, %v4447_v63  ;;  %v5714_v63 = vld [vmem:[%s6593_s11 + $0x78] sm:$0xff] }
 0x31a   :  { %2910 = vmatpush.bf16.msrb.mxu0 %v4158_v20  ;;  %2934 = vmatpush.bf16.msrb.mxu2 %v4798_v21  ;;  %v4958_v20 = vor.u32 %v5666_v15, %v4957_v14  ;;  %v4637_v21 = vld [vmem:[#allocation13 + $0x458] sm:$0xf]  ;;  %v4127_v13 = vld [vmem:[#allocation13 + $0x78] sm:$0xf0] }
 0x31b   :  { %2899 = vmatmul.bf16.vlgmr.msra.gmra.mxu3 %v6284_v4  ;;  %v4638_v33 = vor.u32 %v5586_v22, %v4637_v21  ;;  %v4893_v46 = vld [vmem:[#allocation13 + $0x658] sm:$0xf]  ;;  %v5614_v14 = vld [vmem:[#allocation13 + $0x55c] sm:$0xf] }
 0x31c   :  { %2923 = vmatpush.bf16.msrb.mxu1 %v4446_v23  ;;  %2947 = vmatpush.bf16.msrb.mxu3 %v5086_v28  ;;  %v5478_v23 = vld [vmem:[#allocation13 + $0x11c] sm:$0xf]  ;;  %v5658_v28 = vld [vmem:[#allocation13 + $0x6b4] sm:$0xf0] }
 0x31d   :  { %v4226_v35 = vor.u32 %v5478_v23, %v4223_v25  ;;  %v5650_v47 = vld [vmem:[#allocation13 + $0x674] sm:$0xf0]  ;;  %v4767_v16 = vld [vmem:[#allocation13 + $0x578] sm:$0xf0] }
 0x31e   :  { %2911 = vmatpush.bf16.msrb.mxu0 %v4126_v34  ;;  %2935 = vmatpush.bf16.msrb.mxu2 %v4766_v26  ;;  %v6315_v32 = vpop.f32.mrf.mxu3  ;;  %v4605_v34 = vld [vmem:[#allocation13 + $0x418] sm:$0xf]  ;;  %v4926_v26 = vor.u32 %v5658_v28, %v4925_v27  ;;  %v5526_v17 = vld [vmem:[#allocation13 + $0x29c] sm:$0xf] }
 0x31f   :  { %v4861_v60 = vld [vmem:[#allocation13 + $0x618] sm:$0xf]  ;;  %v5055_v21 = vld [vmem:[#allocation13 + $0x7b8] sm:$0xf0] }
 0x320   :  { %2924 = vmatpush.bf16.msrb.mxu1 %v4414_v36  ;;  %2948 = vmatpush.bf16.msrb.mxu3 %v5054_v41  ;;  %v5578_v36 = vld [vmem:[#allocation13 + $0x434] sm:$0xf0]  ;;  %v4514_v41 = vor.u32 %v5550_v29, %v4511_v30  ;;  %v5446_v27 = vld [vmem:[#allocation13 + $0x1c] sm:$0xf] }
 0x321   :  { %v5642_v61 = vld [vmem:[#allocation13 + $0x634] sm:$0xf0]  ;;  %v4095_v28 = vld [vmem:[#allocation13 + $0x38] sm:$0xf0] }
 0x322   :  { %2912 = vmatpush.bf16.msrb.mxu0 %v4094_v50  ;;  %2936 = vmatpush.bf16.msrb.mxu2 %v4734_v42  ;;  %v6320_v50 = vpop.f32.mrf.mxu2  ;;  %v4606_v42 = vor.u32 %v5578_v36, %v4605_v34  ;;  %v4862_v8 = vor.u32 %v5642_v61, %v4861_v60  ;;  %v5606_v30 = vld [vmem:[#allocation13 + $0x51c] sm:$0xf] }
 0x323   :  { %v5518_v34 = vld [vmem:[#allocation13 + $0x25c] sm:$0xf] }
 0x324   :  { %2925 = vmatpush.bf16.msrb.mxu1 %v4382_v53  ;;  %2949 = vmatpush.bf16.msrb.mxu3 %v5022_v54  ;;  %v4159_v53 = vld [vmem:[#allocation13 + $0xb8] sm:$0xf0]  ;;  %v4894_v54 = vor.u32 %v5650_v47, %v4893_v46 }
 0x325   :  { %2913 = vmatmul.bf16.vlgmr.msrb.gmra.mxu0 %v6272_v55  ;;  %v5023_v36 = vld [vmem:[#allocation13 + $0x778] sm:$0xf0] }
 0x326   :  { %2961 = vmatpush.bf16.msra.mxu0 %v4322_v51  ;;  %2937 = vmatpush.bf16.msrb.mxu2 %v4702_v2  ;;  %v4194_v51 = vor.u32 %v5470_v37, %v4191_v38  ;;  %v5087_v2 = vld [vmem:[#allocation13 + $0x7f8] sm:$0xf0]  ;;  %v6324_v7 = vpop.f32.mrf.mxu3  ;;  %v4098_v37 = vor.u32 %v5446_v27, %v4095_v28  ;;  %v6369_v27 = vld [vmem:[#allocation15] sm:$0xff] }
 0x327   :  { %v5090_v15 = vor.u32 %v5694_v0, %v5087_v2  ;;  %v5598_v46 = vld [vmem:[#allocation13 + $0x4dc] sm:$0xf] }
 0x328   :  { %2926 = vmatpush.bf16.msrb.mxu1 %v4350_v5  ;;  %2950 = vmatpush.bf16.msrb.mxu3 %v4990_v6  ;;  %v4802_v5 = vor.u32 %v5622_v57, %v4799_v58  ;;  %v6322_v6 = vpop.f32.mrf.mxu0  ;;  %v4703_v47 = vld [vmem:[#allocation13 + $0x4f8] sm:$0xf0] }
 0x329   :  { %v5510_v48 = vld [vmem:[#allocation13 + $0x21c] sm:$0xf] }
 0x32a   :  { %2962 = vmatpush.bf16.msra.mxu0 %v4290_v3  ;;  %2938 = vmatpush.bf16.msrb.mxu2 %v4670_v18  ;;  %v4162_v3 = vor.u32 %v5462_v52, %v4159_v53  ;;  %v4415_v18 = vld [vmem:[#allocation13 + $0x2b8] sm:$0xf0]  ;;  %v6329_v23 = vpop.f32.mrf.mxu2 }
 0x32b   :  { %2927 = vmatmul.bf16.vlgmr.msrb.gmra.mxu1 %v6276_v11  ;;  %v4418_v25 = vor.u32 %v5526_v17, %v4415_v18  ;;  %v4991_v52 = vld [vmem:[#allocation13 + $0x738] sm:$0xf0] }
 0x32c   :  { %2975 = vmatpush.bf16.msra.mxu1 %v4578_v12  ;;  %2951 = vmatpush.bf16.msrb.mxu3 %v4958_v20  ;;  %v5454_v12 = vld [vmem:[#allocation13 + $0x5c] sm:$0xf] }
 0x32d   :  { %v5686_v20 = vld [vmem:[#allocation13 + $0x79c] sm:$0xf]  ;;  %v4130_v22 = vor.u32 %v5454_v12, %v4127_v13 }
 0x32e   :  { %2963 = vmatpush.bf16.msra.mxu0 %v4258_v19  ;;  %2939 = vmatpush.bf16.msrb.mxu2 %v4638_v33  ;;  %v6327_v19 = vpop.f32.mrf.mxu1  ;;  %v5058_v29 = vor.u32 %v5686_v20, %v5055_v21  ;;  %v4735_v33 = vld [vmem:[#allocation13 + $0x538] sm:$0xf0] }
 0x32f   :  { %v4738_v38 = vor.u32 %v5606_v30, %v4735_v33  ;;  %v5590_v60 = vld [vmem:[#allocation13 + $0x49c] sm:$0xf]  ;;  %v5702_v33 = vld [vmem:[%s6593_s11 + $0x18] sm:$0xff] }
 0x330   :  { %2976 = vmatpush.bf16.msra.mxu1 %v4546_v24  ;;  %2952 = vmatpush.bf16.msrb.mxu3 %v4926_v26  ;;  %v4770_v24 = vor.u32 %v5614_v14, %v4767_v16  ;;  %v5678_v26 = vld [vmem:[#allocation13 + $0x75c] sm:$0xf]  ;;  %v6335_v49 = vpop.f32.mrf.mxu0 }
 0x331   :  { %v5026_v45 = vor.u32 %v5678_v26, %v5023_v36  ;;  %v4671_v61 = vld [vmem:[#allocation13 + $0x4b8] sm:$0xf0] }
 0x332   :  { %2964 = vmatpush.bf16.msra.mxu0 %v4226_v35  ;;  %2940 = vmatpush.bf16.msrb.mxu2 %v4606_v42  ;;  %v4383_v35 = vld [vmem:[#allocation13 + $0x278] sm:$0xf0]  ;;  %v6337_v42 = vpop.f32.mrf.mxu3  ;;  %v6344_v62 = vpop.f32.mrf.mxu2 }
 0x333   :  { %v4386_v44 = vor.u32 %v5518_v34, %v4383_v35  ;;  %v5662_v0 = vld [vmem:[#allocation13 + $0x6dc] sm:$0xf]  ;;  %v5722_v34 = vld [vmem:[%s6593_s11 + $0xb8] sm:$0xff]  ;;  %v1273_v35 = vperm.slane %v6369_v27, 0 }
 0x334   :  { %2977 = vmatpush.bf16.msra.mxu1 %v4514_v41  ;;  %2953 = vmatpush.bf16.msrb.mxu3 %v4894_v54  ;;  %v5706_v41 = vld [vmem:[%s6593_s11 + $0x38] sm:$0xff]  ;;  %v4706_v54 = vor.u32 %v5598_v46, %v4703_v47  ;;  %v4959_v2 = vld [vmem:[#allocation13 + $0x6f8] sm:$0xf0] }
 0x335   :  { %2941 = vmatmul.bf16.vlgmr.msrb.gmra.mxu2 %v6280_v40  ;;  %v4639_v12 = vld [vmem:[#allocation13 + $0x478] sm:$0xf0]  ;;  %v2579_v46 = vadd.f32 %v6306_v59, %v1273_v35  ;;  %v5730_v59 = vld [vmem:[%s6593_s11 + $0xf8] sm:$0xff] }
 0x336   :  { %2965 = vmatpush.bf16.msra.mxu0 %v4194_v51  ;;  %2989 = vmatpush.bf16.msra.mxu2 %v4834_v43  ;;  %v4351_v51 = vld [vmem:[#allocation13 + $0x238] sm:$0xf0]  ;;  %v6339_v53 = vpop.f32.mrf.mxu1 }
 0x337   :  { %v5670_v43 = vld [vmem:[#allocation13 + $0x71c] sm:$0xf]  ;;  %v4354_v57 = vor.u32 %v5510_v48, %v4351_v51 }
 0x338   :  { %2978 = vmatpush.bf16.msra.mxu1 %v4482_v56  ;;  %2954 = vmatpush.bf16.msrb.mxu3 %v4862_v8  ;;  %v5705_v56 = vld [vmem:[%s6593_s11 + $0x30] sm:$0xff]  ;;  %v4994_v58 = vor.u32 %v5670_v43, %v4991_v52  ;;  %v4962_v8 = vor.u32 %v5662_v0, %v4959_v2  ;;  %v5654_v13 = vld [vmem:[#allocation13 + $0x69c] sm:$0xf]  ;;  %v5710_v43 = vld [vmem:[%s6593_s11 + $0x58] sm:$0xff]  ;;  %v1274_v52 = vperm.slane %v6369_v27, 1 }
 0x339   :  { %v4927_v14 = vld [vmem:[#allocation13 + $0x6b8] sm:$0xf0] }
 0x33a   :  { %2966 = vmatpush.bf16.msra.mxu0 %v4162_v3  ;;  %2990 = vmatpush.bf16.msra.mxu2 %v4802_v5  ;;  %v4674_v3 = vor.u32 %v5590_v60, %v4671_v61  ;;  %v5704_v5 = vld [vmem:[%s6593_s11 + $0x28] sm:$0xff]  ;;  %v6358_v16 = vpop.f32.mrf.mxu3  ;;  %v5703_v18 = vld [vmem:[%s6593_s11 + $0x20] sm:$0xff]  ;;  %v4930_v20 = vor.u32 %v5654_v13, %v4927_v14 }
 0x33b   :  { %2955 = vmatmul.bf16.vlgmr.msrb.gmra.mxu3 %v6284_v4  ;;  %v5574_v21 = vld [vmem:[#allocation13 + $0x41c] sm:$0xf] }
 0x33c   :  { %2979 = vmatpush.bf16.msra.mxu1 %v4450_v9  ;;  %3003 = vmatpush.bf16.msra.mxu3 %v5090_v15  ;;  %v5582_v9 = vld [vmem:[#allocation13 + $0x45c] sm:$0xf]  ;;  %v6356_v15 = vpop.f32.mrf.mxu0 }
 0x33d   :  { %v4642_v17 = vor.u32 %v5582_v9, %v4639_v12  ;;  %v4895_v28 = vld [vmem:[#allocation13 + $0x678] sm:$0xf0] }
 0x33e   :  { %2967 = vmatpush.bf16.msra.mxu0 %v4130_v22  ;;  %2991 = vmatpush.bf16.msra.mxu2 %v4770_v24  ;;  %v4607_v22 = vld [vmem:[#allocation13 + $0x438] sm:$0xf0]  ;;  %v6364_v24 = vpop.f32.mrf.mxu1 }
 0x33f   :  { %v4610_v30 = vor.u32 %v5574_v21, %v4607_v22  ;;  %v5711_v36 = vld [vmem:[%s6593_s11 + $0x60] sm:$0xff]  ;;  %v5737_v21 = vld [vmem:[%s6593_s11 + $0x130] sm:$0xff] }
 0x340   :  { %2980 = vmatpush.bf16.msra.mxu1 %v4418_v25  ;;  %3004 = vmatpush.bf16.msra.mxu3 %v5058_v29  ;;  %v5712_v25 = vld [vmem:[%s6593_s11 + $0x68] sm:$0xff]  ;;  %v6371_v29 = vpop.f32.mrf.mxu2 }
 0x342   :  { %2968 = vmatpush.bf16.msra.mxu0 %v4098_v37  ;;  %2992 = vmatpush.bf16.msra.mxu2 %v4738_v38  ;;  %v5638_v37 = vld [vmem:[#allocation13 + $0x61c] sm:$0xf]  ;;  %v6392_v51 = vpop.f32.mrf.mxu3 }
 0x343   :  { %v4863_v38 = vld [vmem:[#allocation13 + $0x638] sm:$0xf0] }
 0x344   :  { %2981 = vmatpush.bf16.msra.mxu1 %v4386_v44  ;;  %3005 = vmatpush.bf16.msra.mxu3 %v5026_v45  ;;  %v5701_v44 = vld [vmem:[%s6593_s11 + $0x10] sm:$0xff]  ;;  %v2692_v48 = vpop.f32.mrf.mxu0 }
 0x345   :  { %2969 = vmatmul.bf16.vlgmr.msra.gmra.mxu0 %v6272_v55  ;;  %v5713_v55 = vld [vmem:[%s6593_s11 + $0x70] sm:$0xff] }
 0x346   :  { %3557 = vmatpush.bf16.msrb.mxu0 %v5706_v41  ;;  %2993 = vmatpush.bf16.msra.mxu2 %v4706_v54  ;;  %v2581_v41 = vadd.f32 %v6313_v31, %v1273_v35  ;;  %v5721_v45 = vld [vmem:[%s6593_s11 + $0xb0] sm:$0xff]  ;;  %v4866_v31 = vor.u32 %v5638_v37, %v4863_v38  ;;  %v5726_v35 = vld [vmem:[%s6593_s11 + $0xd8] sm:$0xff] }
 0x348   :  { %2982 = vmatpush.bf16.msra.mxu1 %v4354_v57  ;;  %3006 = vmatpush.bf16.msra.mxu3 %v4994_v58  ;;  %v2595_v47 = vadd.f32 %v6318_v39, %v2581_v41  ;;  %v2593_v39 = vadd.f32 %v6308_v1, %v2579_v46  ;;  %v2637_v57 = vadd.f32 %v6335_v49, %v1274_v52  ;;  %v5700_v58 = vld [vmem:[%s6593_s11 + $0x8] sm:$0xff]  ;;  %v2720_v61 = vpop.f32.mrf.mxu2 }
 0x349   :  { %v5720_v1 = vld [vmem:[%s6593_s11 + $0xa8] sm:$0xff]  ;;  %v2635_v49 = vadd.f32 %v6322_v6, %v1274_v52  ;;  %v5699_v6 = vld [vmem:[%s6593_s11] sm:$0xff] }
 0x34a   :  { %3558 = vmatpush.bf16.msrb.mxu0 %v5705_v56  ;;  %2994 = vmatpush.bf16.msra.mxu2 %v4674_v3  ;;  %v2609_v54 = vadd.f32 %v6320_v50, %v2595_v47  ;;  %v2706_v56 = vpop.f32.mrf.mxu1  ;;  %v2607_v60 = vadd.f32 %v6310_v10, %v2593_v39  ;;  %v5709_v50 = vld [vmem:[%s6593_s11 + $0x50] sm:$0xff] }
 0x34b   :  { %2983 = vmatmul.bf16.vlgmr.msra.gmra.mxu1 %v6276_v11  ;;  %v5646_v11 = vld [vmem:[#allocation13 + $0x65c] sm:$0xf]  ;;  %v5729_v10 = vld [vmem:[%s6593_s11 + $0xf0] sm:$0xff]  ;;  %v2649_v0 = vadd.f32 %v6327_v19, %v2635_v49 }
 0x34c   :  { %3571 = vmatpush.bf16.msrb.mxu1 %v5714_v63  ;;  %3007 = vmatpush.bf16.msra.mxu3 %v4962_v8  ;;  %v4898_v26 = vor.u32 %v5646_v11, %v4895_v28  ;;  %v2651_v63 = vadd.f32 %v6339_v53, %v2637_v57  ;;  %v2746_v53 = vpop.f32.mrf.mxu0  ;;  %v5738_v8 = vld [vmem:[%s6593_s11 + $0x138] sm:$0xff]  ;;  %v1276_v11 = vperm.slane %v6369_v27, 3  ;;  %v5717_v28 = vld [vmem:[%s6593_s11 + $0x90] sm:$0xff] }
 0x34d   :  { %v2663_v19 = vadd.f32 %v6329_v23, %v2649_v0  ;;  %v5718_v23 = vld [vmem:[%s6593_s11 + $0x98] sm:$0xff] }
 0x34e   :  { %3559 = vmatpush.bf16.msrb.mxu0 %v5704_v5  ;;  %2995 = vmatpush.bf16.msra.mxu2 %v4642_v17  ;;  %v2665_v2 = vadd.f32 %v6344_v62, %v2651_v63  ;;  %v5719_v5 = vld [vmem:[%s6593_s11 + $0xa0] sm:$0xff]  ;;  %v5728_v62 = vld [vmem:[%s6593_s11 + $0xe8] sm:$0xff] }
 0x34f   :  { %v2677_v13 = vadd.f32 %v6337_v42, %v2663_v19  ;;  %v5707_v17 = vld [vmem:[%s6593_s11 + $0x40] sm:$0xff] }
 0x350   :  { %3572 = vmatpush.bf16.msrb.mxu1 %v5713_v55  ;;  %3008 = vmatpush.bf16.msra.mxu3 %v4930_v20  ;;  %v2734_v55 = vpop.f32.mrf.mxu3  ;;  %v5727_v42 = vld [vmem:[%s6593_s11 + $0xe0] sm:$0xff] }
 0x351   :  { %v5723_v63 = vld [vmem:[%s6593_s11 + $0xc0] sm:$0xff] }
 0x352   :  { %3560 = vmatpush.bf16.msrb.mxu0 %v5703_v18  ;;  %2996 = vmatpush.bf16.msra.mxu2 %v4610_v30  ;;  %v2760_v12 = vpop.f32.mrf.mxu1  ;;  %v1275_v18 = vperm.slane %v6369_v27, 2 }
 0x354   :  { %3573 = vmatpush.bf16.msrb.mxu1 %v5712_v25  ;;  %3009 = vmatpush.bf16.msra.mxu3 %v4898_v26  ;;  %v2693_v22 = vadd.f32 %v2692_v48, %v1275_v18  ;;  %v3018_v25 = vmax.f32 %v2677_v13, 0.0  ;;  %v2691_v30 = vadd.f32 %v6356_v15, %v1275_v18  ;;  %v5736_v26 = vld [vmem:[%s6593_s11 + $0x128] sm:$0xff] }
 0x355   :  { %2997 = vmatmul.bf16.vlgmr.msra.gmra.mxu2 %v6280_v40  ;;  %v2623_v40 = vadd.f32 %v6324_v7, %v2609_v54  ;;  %v2621_v7 = vadd.f32 %v6315_v32, %v2607_v60  ;;  %v5708_v32 = vld [vmem:[%s6593_s11 + $0x48] sm:$0xff]  ;;  %v5734_v60 = vld [vmem:[%s6593_s11 + $0x118] sm:$0xff] }
 0x356   :  { %3561 = vmatpush.bf16.msrb.mxu0 %v5702_v33  ;;  %3585 = vmatpush.bf16.msrb.mxu2 %v5722_v34  ;;  %v2707_v33 = vadd.f32 %v2706_v56, %v2693_v22  ;;  %v2705_v38 = vadd.f32 %v6364_v24, %v2691_v30  ;;  %v5735_v24 = vld [vmem:[%s6593_s11 + $0x120] sm:$0xff] }
 0x357   :  { %v3025_v3 = vmax.f32 %v2623_v40, 0.0  ;;  %v3017_v9 = vmax.f32 %v2621_v7, 0.0  ;;  %v5746_v7 = vld [vmem:[%s6593_s11 + $0x178] sm:$0xff] }
 0x358   :  { %3574 = vmatpush.bf16.msrb.mxu1 %v5711_v36  ;;  %3010 = vmatpush.bf16.msra.mxu3 %v4866_v31  ;;  %v2748_v36 = vpop.f32.mrf.mxu0  ;;  %v2721_v41 = vadd.f32 %v2720_v61, %v2707_v33  ;;  %v2719_v46 = vadd.f32 %v6371_v29, %v2705_v38  ;;  %v5725_v31 = vld [vmem:[%s6593_s11 + $0xd0] sm:$0xff]  ;;  %v5715_v29 = vld [vmem:[%s6593_s11 + $0x80] sm:$0xff] }
 0x359   :  { %v3033_v14 = vpack.c.bf16 %v3025_v3, %v3017_v9  ;;  %v2749_v48 = vadd.f32 %v2748_v36, %v1276_v11  ;;  %v5732_v3 = vld [vmem:[%s6593_s11 + $0x108] sm:$0xff]  ;;  %v5742_v9 = vld [vmem:[%s6593_s11 + $0x158] sm:$0xff]  ;;  %v5753_v36 = vld [vmem:[%s6593_s11 + $0x1b0] sm:$0xff] }
 0x35a   :  { %3562 = vmatpush.bf16.msrb.mxu0 %v5701_v44  ;;  %3586 = vmatpush.bf16.msrb.mxu2 %v5721_v45  ;;  %v2747_v44 = vadd.f32 %v2746_v53, %v1276_v11  ;;  %v2762_v15 = vpop.f32.mrf.mxu1  ;;  %v5716_v45 = vld [vmem:[%s6593_s11 + $0x88] sm:$0xff]  ;;  %v2735_v47 = vadd.f32 %v2734_v55, %v2721_v41 }
 0x35b   :  { %3011 = vmatmul.bf16.vlgmr.msra.gmra.mxu3 %v6284_v4  ;;  %v2679_v4 = vadd.f32 %v6358_v16, %v2665_v2  ;;  %v2774_v16 = vpop.f32.mrf.mxu2  ;;  %v2763_v39 = vadd.f32 %v2762_v15, %v2749_v48  ;;  %v5744_v53 = vld [vmem:[%s6593_s11 + $0x168] sm:$0xff] }
 0x35c   :  { %3575 = vmatpush.bf16.msrb.mxu1 %v5710_v43  ;;  %3599 = vmatpush.bf16.msrb.mxu3 %v5730_v59  ;;  %v2761_v43 = vadd.f32 %v2760_v12, %v2747_v44  ;;  %v2733_v59 = vadd.f32 %v6392_v51, %v2719_v46  ;;  %v3027_v56 = vmax.f32 %v2735_v47, 0.0  ;;  %v5751_v44 = vld [vmem:[%s6593_s11 + $0x1a0] sm:$0xff]  ;;  %v5750_v46 = vld [vmem:[%s6593_s11 + $0x198] sm:$0xff] }
 0x35d   :  { %v3026_v20 = vmax.f32 %v2679_v4, 0.0  ;;  %v5743_v4 = vld [vmem:[%s6593_s11 + $0x160] sm:$0xff] }
 0x35e   :  { %3563 = vmatpush.bf16.msrb.mxu0 %v5700_v58  ;;  %3587 = vmatpush.bf16.msrb.mxu2 %v5720_v1  ;;  %v2788_v37 = vpop.f32.mrf.mxu3  ;;  %v2775_v54 = vadd.f32 %v2774_v16, %v2761_v43  ;;  %v5724_v58 = vld [vmem:[%s6593_s11 + $0xc8] sm:$0xff]  ;;  %v3019_v61 = vmax.f32 %v2733_v59, 0.0 }
 0x35f   :  { %v3034_v34 = vpack.c.bf16 %v3026_v20, %v3018_v25  ;;  %v5740_v25 = vld [vmem:[%s6593_s11 + $0x148] sm:$0xff] }
 0x360   :  { %3576 = vmatpush.bf16.msrb.mxu1 %v5709_v50  ;;  %3600 = vmatpush.bf16.msrb.mxu3 %v5729_v10  ;;  %v2789_v51 = vadd.f32 %v2788_v37, %v2775_v54  ;;  %v3035_v50 = vpack.c.bf16 %v3027_v56, %v3019_v61  ;;  %v5733_v10 = vld [vmem:[%s6593_s11 + $0x110] sm:$0xff]  ;;  %v5752_v37 = vld [vmem:[%s6593_s11 + $0x1a8] sm:$0xff] }
 0x361   :  { %v5748_v56 = vld [vmem:[%s6593_s11 + $0x188] sm:$0xff] }
 0x362   :  { %3564 = vmatpush.bf16.msrb.mxu0 %v5699_v6  ;;  %3588 = vmatpush.bf16.msrb.mxu2 %v5719_v5  ;;  %v3020_v0 = vmax.f32 %v2789_v51, 0.0  ;;  %v5745_v6 = vld [vmem:[%s6593_s11 + $0x170] sm:$0xff]  ;;  %v5731_v5 = vld [vmem:[%s6593_s11 + $0x100] sm:$0xff] }
 0x363   :  { %v2776_v52 = vpop.f32.mrf.mxu2 }
 0x364   :  { %3577 = vmatpush.bf16.msrb.mxu1 %v5708_v32  ;;  %3601 = vmatpush.bf16.msrb.mxu3 %v5728_v62  ;;  %v2777_v57 = vadd.f32 %v2776_v52, %v2763_v39  ;;  %v2802_v32 = vpop.f32.mrf.mxu0 }
 0x365   :  { %3565 = vmatmul.bf16.vlgmr.msrb.gmra.mxu0 %v3033_v14  ;;  %v5741_v14 = vld [vmem:[%s6593_s11 + $0x150] sm:$0xff] }
 0x366   :  { %3613 = vmatpush.bf16.msra.mxu0 %v5738_v8  ;;  %3589 = vmatpush.bf16.msrb.mxu2 %v5718_v23  ;;  %v2790_v40 = vpop.f32.mrf.mxu3  ;;  %v1277_v8 = vperm.slane %v6369_v27, 4 }
 0x367   :  { %v2791_v1 = vadd.f32 %v2790_v40, %v2777_v57  ;;  %v5747_v40 = vld [vmem:[%s6593_s11 + $0x180] sm:$0xff] }
 0x368   :  { %3578 = vmatpush.bf16.msrb.mxu1 %v5707_v17  ;;  %3602 = vmatpush.bf16.msrb.mxu3 %v5727_v42  ;;  %v2816_v19 = vpop.f32.mrf.mxu1  ;;  %v2803_v13 = vadd.f32 %v2802_v32, %v1277_v8 }
 0x369   :  { %v3028_v49 = vmax.f32 %v2791_v1, 0.0 }
 0x36a   :  { %3614 = vmatpush.bf16.msra.mxu0 %v5737_v21  ;;  %3590 = vmatpush.bf16.msrb.mxu2 %v5717_v28  ;;  %v2817_v16 = vadd.f32 %v2816_v19, %v2803_v13 }
 0x36b   :  { %3579 = vmatmul.bf16.vlgmr.msrb.gmra.mxu1 %v3034_v34  ;;  %v3036_v2 = vpack.c.bf16 %v3028_v49, %v3020_v0  ;;  %v5739_v34 = vld [vmem:[%s6593_s11 + $0x140] sm:$0xff] }
 0x36c   :  { %3603 = vmatpush.bf16.msrb.mxu3 %v5726_v35  ;;  %3627 = vmatpush.bf16.msra.mxu1 %v5746_v7  ;;  %v2804_v12 = vpop.f32.mrf.mxu0  ;;  %v5754_v35 = vld [vmem:[%s6593_s11 + $0x1b8] sm:$0xff] }
 0x36d   :  { %v2805_v17 = vadd.f32 %v2804_v12, %v1277_v8 }
 0x36e   :  { %3615 = vmatpush.bf16.msra.mxu0 %v5736_v26  ;;  %3591 = vmatpush.bf16.msrb.mxu2 %v5716_v45  ;;  %v1278_v45 = vperm.slane %v6369_v27, 5 }
 0x370   :  { %3604 = vmatpush.bf16.msrb.mxu3 %v5725_v31  ;;  %3628 = vmatpush.bf16.msra.mxu1 %v5745_v6  ;;  %v2818_v23 = vpop.f32.mrf.mxu1 }
 0x371   :  { %v2819_v20 = vadd.f32 %v2818_v23, %v2805_v17 }
 0x372   :  { %3616 = vmatpush.bf16.msra.mxu0 %v5735_v24  ;;  %3592 = vmatpush.bf16.msrb.mxu2 %v5715_v29  ;;  %v5749_v24 = vld [vmem:[%s6593_s11 + $0x190] sm:$0xff] }
 0x374   :  { %3605 = vmatpush.bf16.msrb.mxu3 %v5724_v58  ;;  %3629 = vmatpush.bf16.msra.mxu1 %v5744_v53  ;;  %v5758_v53 = vld [vmem:[%s6593_s11 + $0x1d8] sm:$0xff] }
 0x375   :  { %3593 = vmatmul.bf16.vlgmr.msrb.gmra.mxu2 %v3035_v50  ;;  %v5762_v50 = vld [vmem:[%s6593_s11 + $0x1f8] sm:$0xff] }
 0x376   :  { %3617 = vmatpush.bf16.msra.mxu0 %v5734_v60  ;;  %3641 = vmatpush.bf16.msra.mxu2 %v5754_v35 }
 0x378   :  { %3606 = vmatpush.bf16.msrb.mxu3 %v5723_v63  ;;  %v2830_v62 = vpop.f32.mrf.mxu2  ;;  %3630 = vmatpush.bf16.msra.mxu1 %v5743_v4  ;;  %v5761_v63 = vld [vmem:[%s6593_s11 + $0x1f0] sm:$0xff] }
 0x379   :  { %v2831_v42 = vadd.f32 %v2830_v62, %v2817_v16  ;;  %v5757_v4 = vld [vmem:[%s6593_s11 + $0x1d0] sm:$0xff] }
 0x37a   :  { %3618 = vmatpush.bf16.msra.mxu0 %v5733_v10  ;;  %3642 = vmatpush.bf16.msra.mxu2 %v5753_v36  ;;  %v5760_v10 = vld [vmem:[%s6593_s11 + $0x1e8] sm:$0xff] }
 0x37b   :  { %3607 = vmatmul.bf16.vlgmr.msrb.gmra.mxu3 %v3036_v2  ;;  %v5759_v2 = vld [vmem:[%s6593_s11 + $0x1e0] sm:$0xff] }
 0x37c   :  { %3631 = vmatpush.bf16.msra.mxu1 %v5742_v9  ;;  %3655 = vmatpush.bf16.msra.mxu3 %v5762_v50 }
 0x37e   :  { %3619 = vmatpush.bf16.msra.mxu0 %v5732_v3  ;;  %v2844_v55 = vpop.f32.mrf.mxu3  ;;  %3643 = vmatpush.bf16.msra.mxu2 %v5752_v37  ;;  %v1279_v3 = vperm.slane %v6369_v27, 6 }
 0x37f   :  { %v2845_v21 = vadd.f32 %v2844_v55, %v2831_v42 }
 0x380   :  { %v2832_v18 = vpop.f32.mrf.mxu2  ;;  %3632 = vmatpush.bf16.msra.mxu1 %v5741_v14  ;;  %3656 = vmatpush.bf16.msra.mxu3 %v5761_v63  ;;  %v5756_v14 = vld [vmem:[%s6593_s11 + $0x1c8] sm:$0xff] }
 0x381   :  { %v2833_v22 = vadd.f32 %v2832_v18, %v2819_v20  ;;  %v3021_v30 = vmax.f32 %v2845_v21, 0.0  ;;  %v5755_v20 = vld [vmem:[%s6593_s11 + $0x1c0] sm:$0xff] }
 0x382   :  { %3620 = vmatpush.bf16.msra.mxu0 %v5731_v5  ;;  %v2858_v38 = vpop.f32.mrf.mxu0  ;;  %3644 = vmatpush.bf16.msra.mxu2 %v5751_v44 }
 0x383   :  { %v2859_v31 = vadd.f32 %v2858_v38, %v1278_v45 }
 0x384   :  { %3633 = vmatpush.bf16.msra.mxu1 %v5740_v25  ;;  %3657 = vmatpush.bf16.msra.mxu3 %v5760_v10 }
 0x386   :  { %v2846_v11 = vpop.f32.mrf.mxu3  ;;  %3645 = vmatpush.bf16.msra.mxu2 %v5750_v46 }
 0x387   :  { %v2847_v28 = vadd.f32 %v2846_v11, %v2833_v22 }
 0x388   :  { %3634 = vmatpush.bf16.msra.mxu1 %v5739_v34  ;;  %v2872_v41 = vpop.f32.mrf.mxu1  ;;  %3658 = vmatpush.bf16.msra.mxu3 %v5759_v2 }
 0x389   :  { %v3029_v33 = vmax.f32 %v2847_v28, 0.0  ;;  %v2873_v52 = vadd.f32 %v2872_v41, %v2859_v31 }
 0x38a   :  { %v2860_v47 = vpop.f32.mrf.mxu0  ;;  %3646 = vmatpush.bf16.msra.mxu2 %v5749_v24 }
 0x38b   :  { %v3037_v26 = vpack.c.bf16 %v3029_v33, %v3021_v30  ;;  %v2861_v59 = vadd.f32 %v2860_v47, %v1278_v45  ;;  %v1280_v30 = vperm.slane %v6369_v27, 7 }
 0x38c   :  { %3659 = vmatpush.bf16.msra.mxu3 %v5758_v53 }
 0x38d   :  { %3621 = vmatmul.bf16.vlgmr.msra.gmra.mxu0 %v3037_v26 }
 0x38e   :  { %3647 = vmatpush.bf16.msra.mxu2 %v5748_v56 }
 0x390   :  { %v2874_v43 = vpop.f32.mrf.mxu1  ;;  %3660 = vmatpush.bf16.msra.mxu3 %v5757_v4 }
 0x391   :  { %v2875_v54 = vadd.f32 %v2874_v43, %v2861_v59 }
 0x392   :  { %3648 = vmatpush.bf16.msra.mxu2 %v5747_v40 }
 0x394   :  { %3661 = vmatpush.bf16.msra.mxu3 %v5756_v14 }
 0x398   :  { %v2886_v15 = vpop.f32.mrf.mxu2  ;;  %3662 = vmatpush.bf16.msra.mxu3 %v5755_v20 }
 0x399   :  { %v2887_v29 = vadd.f32 %v2886_v15, %v2873_v52 }
 0x39e   :  { %v2900_v48 = vpop.f32.mrf.mxu3 }
 0x39f   :  { %v2901_v57 = vadd.f32 %v2900_v48, %v2887_v29 }
 0x3a0   :  { %v2888_v39 = vpop.f32.mrf.mxu2 }
 0x3a1   :  { %v2889_v58 = vadd.f32 %v2888_v39, %v2875_v54  ;;  %v3022_v61 = vmax.f32 %v2901_v57, 0.0  ;;  %v5781_v54 = vld [vmem:[#allocation16] ss:$0 sm:$0xff] }
 0x3a2   :  { %v2914_v7 = vpop.f32.mrf.mxu0 }
 0x3a3   :  { %v2915_v19 = vadd.f32 %v2914_v7, %v1279_v3 }
 0x3a6   :  { %v2902_v60 = vpop.f32.mrf.mxu3 }
 0x3a7   :  { %v2903_v51 = vadd.f32 %v2902_v60, %v2889_v58 }
 0x3a8   :  { %v2928_v0 = vpop.f32.mrf.mxu1 }
 0x3a9   :  { %v3030_v1 = vmax.f32 %v2903_v51, 0.0  ;;  %v2929_v8 = vadd.f32 %v2928_v0, %v2915_v19 }
 0x3aa   :  { %v2916_v5 = vpop.f32.mrf.mxu0 }
 0x3ab   :  { %v3038_v49 = vpack.c.bf16 %v3030_v1, %v3022_v61  ;;  %v2917_v9 = vadd.f32 %v2916_v5, %v1279_v3 }
 0x3ad   :  { %3635 = vmatmul.bf16.vlgmr.msra.gmra.mxu1 %v3038_v49 }
 0x3b0   :  { %v2930_v62 = vpop.f32.mrf.mxu1 }
 0x3b1   :  { %v2931_v55 = vadd.f32 %v2930_v62, %v2917_v9 }
 0x3b8   :  { %v2942_v6 = vpop.f32.mrf.mxu2 }
 0x3b9   :  { %v2943_v13 = vadd.f32 %v2942_v6, %v2929_v8 }
 0x3be   :  { %v2956_v32 = vpop.f32.mrf.mxu3 }
 0x3bf   :  { %v2957_v23 = vadd.f32 %v2956_v32, %v2943_v13 }
 0x3c0   :  { %v2944_v12 = vpop.f32.mrf.mxu2 }
 0x3c1   :  { %v2945_v16 = vadd.f32 %v2944_v12, %v2931_v55  ;;  %v3023_v42 = vmax.f32 %v2957_v23, 0.0 }
 0x3c2   :  { %v2970_v25 = vpop.f32.mrf.mxu0 }
 0x3c3   :  { %v2971_v35 = vadd.f32 %v2970_v25, %v1280_v30 }
 0x3c6   :  { %v2958_v17 = vpop.f32.mrf.mxu3 }
 0x3c7   :  { %v2959_v18 = vadd.f32 %v2958_v17, %v2945_v16 }
 0x3c8   :  { %v2984_v11 = vpop.f32.mrf.mxu1 }
 0x3c9   :  { %v3031_v21 = vmax.f32 %v2959_v18, 0.0  ;;  %v2985_v36 = vadd.f32 %v2984_v11, %v2971_v35 }
 0x3ca   :  { %v2972_v33 = vpop.f32.mrf.mxu0 }
 0x3cb   :  { %v3039_v22 = vpack.c.bf16 %v3031_v21, %v3023_v42  ;;  %v2973_v37 = vadd.f32 %v2972_v33, %v1280_v30 }
 0x3cd   :  { %3649 = vmatmul.bf16.vlgmr.msra.gmra.mxu2 %v3039_v22 }
 0x3d0   :  { %v2986_v26 = vpop.f32.mrf.mxu1 }
 0x3d1   :  { %v2987_v41 = vadd.f32 %v2986_v26, %v2973_v37 }
 0x3d8   :  { %v2998_v28 = vpop.f32.mrf.mxu2 }
 0x3d9   :  { %v2999_v44 = vadd.f32 %v2998_v28, %v2985_v36 }
 0x3de   :  { %v3012_v34 = vpop.f32.mrf.mxu3 }
 0x3df   :  { %v3013_v15 = vadd.f32 %v3012_v34, %v2999_v44 }
 0x3e0   :  { %v3000_v38 = vpop.f32.mrf.mxu2 }
 0x3e1   :  { %v3001_v45 = vadd.f32 %v3000_v38, %v2987_v41  ;;  %v3024_v48 = vmax.f32 %v3013_v15, 0.0 }
 0x3e2   :  { %v3566_v43 = vpop.f32.mrf.mxu0 }
 0x3e3   :  { %v3567_v57 = vadd.f32 %v5781_v54, %v3566_v43 }
 0x3e6   :  { %v3014_v46 = vpop.f32.mrf.mxu3 }
 0x3e7   :  { %v3015_v47 = vadd.f32 %v3014_v46, %v3001_v45 }
 0x3e8   :  { %v3580_v52 = vpop.f32.mrf.mxu1 }
 0x3e9   :  { %v3032_v31 = vmax.f32 %v3015_v47, 0.0  ;;  %v3581_v58 = vadd.f32 %v3580_v52, %v3567_v57 }
 0x3ea   :  { %v3568_v59 = vpop.f32.mrf.mxu0 }
 0x3eb   :  { %v3040_v24 = vpack.c.bf16 %v3032_v31, %v3024_v48  ;;  %v3569_v49 = vadd.f32 %v5781_v54, %v3568_v59 }
 0x3ed   :  { %3663 = vmatmul.bf16.vlgmr.msra.gmra.mxu3 %v3040_v24 }
 0x3f0   :  { %v3582_v29 = vpop.f32.mrf.mxu1 }
 0x3f1   :  { %v3583_v10 = vadd.f32 %v3582_v29, %v3569_v49 }
 0x3f8   :  { %v3594_v27 = vpop.f32.mrf.mxu2 }
 0x3f9   :  { %v3595_v51 = vadd.f32 %v3594_v27, %v3581_v58 }
 0x3fe   :  { %v3608_v39 = vpop.f32.mrf.mxu3 }
 0x3ff   :  { %v3609_v1 = vadd.f32 %v3608_v39, %v3595_v51 }
 0x400   :  { %v3596_v56 = vpop.f32.mrf.mxu2 }
 0x401   :  { %v3597_v0 = vadd.f32 %v3596_v56, %v3583_v10 }
 0x406   :  { %v3610_v40 = vpop.f32.mrf.mxu3 }
 0x407   :  { %v3611_v53 = vadd.f32 %v3610_v40, %v3597_v0 }
 0x40a   :  { %v3622_v60 = vpop.f32.mrf.mxu0 }
 0x40b   :  { %v3623_v63 = vadd.f32 %v3622_v60, %v3609_v1 }
 0x412   :  { %v3624_v6 = vpop.f32.mrf.mxu0 }
 0x413   :  { %v3625_v19 = vadd.f32 %v3624_v6, %v3611_v53 }
 0x42a   :  { %v3636_v61 = vpop.f32.mrf.mxu1 }
 0x42b   :  { %v3637_v7 = vadd.f32 %v3636_v61, %v3623_v63 }
 0x432   :  { %v3638_v32 = vpop.f32.mrf.mxu1 }
 0x433   :  { %v3639_v62 = vadd.f32 %v3638_v32, %v3625_v19 }
 0x450   :  { %v3650_v50 = vpop.f32.mrf.mxu2 }
 0x451   :  { %v3651_v2 = vadd.f32 %v3650_v50, %v3637_v7 }
 0x458   :  { %v3652_v4 = vpop.f32.mrf.mxu2 }
 0x459   :  { %v3653_v8 = vadd.f32 %v3652_v4, %v3639_v62 }
 0x470   :  { %v3664_v3 = vpop.f32.mrf.mxu3 }
 0x471   :  { %v3665_v5 = vadd.f32 %v3664_v3, %v3651_v2 }
 0x473   :  { %5782 = vtanh.f32 %v3665_v5 }
 0x478   :  { %v3666_v9 = vpop.f32.mrf.mxu3 }
 0x479   :  { %v5783_v12 = vpop.eup %5782  ;;  %v3667_v55 = vadd.f32 %v3666_v9, %v3653_v8 }
 0x47a   :  { %3671 = vst [vmem:[%s6595_s13] sm:$0xff] %v5783_v12 }
 0x47b   :  { %5784 = vtanh.f32 %v3667_v55 }
 0x481   :  { %v5785_v13 = vpop.eup %5784 }
 0x482   :  { %3672 = vst [vmem:[%s6595_s13 + $0x8] sm:$0xff] %v5785_v13 }
 0x483   :  { %3677 = vsyncpa [#allocation3], 1 }
 0x484   :  { %3678 = vsyncpa [#allocation5], 1 }
 0x485   :  { %3679 = vsyncpa [#allocation8], 1 }
 0x486   :  { %3680 = vsyncpa [#allocation11], 1 }
 0x487   :  { %3681 = vsyncpa [#allocation14], 1 }
 0x488   :  { %3682 = vsyncpa [#allocation17], 1 }

</bundles_post_ra>
